<compile_context>
chip_gen: v5e
topology: v5e:2x2
jax: 0.10.0
libtpu: 0.0.40
codegen_flags: <defaults>
</compile_context>

<pallas_src>
import functools

import jax
import jax.numpy as jnp
from jax import lax
from jax.experimental import pallas as pl
from jax.experimental.pallas import tpu as pltpu

_LN_EPS = 1e-5  # PyTorch nn.LayerNorm default


# ----------------------------- in-kernel helpers -----------------------------

def _layernorm(x, g, b, eps=_LN_EPS):
    """Row-wise LayerNorm over the last dim (f32 statistics). g/b are (1, D)."""
    mu = jnp.mean(x, axis=-1, keepdims=True)
    xc = x - mu
    var = jnp.mean(xc * xc, axis=-1, keepdims=True)
    return xc * lax.rsqrt(var + eps) * g + b


def _gelu_tanh(x):
    # tanh-approximate GELU (uses the EUP tanh slot).
    # TODO(synk): switch back to exact erf GELU if bit-accuracy vs torch nn.GELU() is required.
    c = 0.7978845608028654  # sqrt(2/pi)
    return 0.5 * x * (1.0 + jnp.tanh(c * (x + 0.044715 * x * x * x)))


# ----------------------------- Pallas kernels -----------------------------

def _joints_proj_kernel(x_ref, w_ref, b_ref, o_ref):
    y = jnp.dot(x_ref[0].astype(jnp.bfloat16), w_ref[...],
                preferred_element_type=jnp.float32) + b_ref[...]
    o_ref[0] = y.astype(o_ref.dtype)


def _layer_kernel(x_ref, m_ref, g1_ref, b1_ref, wqkv_ref, bqkv_ref, wo_ref, bo_ref,
                  g2_ref, b2_ref, wfc_ref, bfc_ref, wpr_ref, bpr_ref, o_ref, *, heads):
    """One fused pre-LN transformer layer (attention block + MLP block) per batch element."""
    x = x_ref[0]                                         # (S, W) f32 residual stream
    S, W = x.shape
    C = W // heads

    # ---------------- attention sub-block: LN1 -> QKV -> MHA -> out-proj -> +x ----------------
    xl = _layernorm(x, g1_ref[...], b1_ref[...]).astype(jnp.bfloat16)
    # qkv_w is head-major [Q_all | K_all | V_all]; the 1/sqrt(C) scale is folded into Q columns.
    qkv = jnp.dot(xl, wqkv_ref[...], preferred_element_type=jnp.float32) + bqkv_ref[...]

    # Key-padding bias hoisted out of the head loop (one select).
    # Reference uses masked_fill(-inf); -1e30 is equivalent because every query row always has
    # valid keys (the appended latent tokens have mask == 1).
    neg_bias = jnp.where(m_ref[0] == 0.0, -1e30, 0.0)    # (1, S) over the key axis

    att_out = jnp.zeros((S, W), jnp.float32)
    for h in range(heads):                               # static unroll: all heads per grid step
        q = qkv[:, h * C:(h + 1) * C].astype(jnp.bfloat16)
        k = qkv[:, W + h * C:W + (h + 1) * C].astype(jnp.bfloat16)
        v = qkv[:, 2 * W + h * C:2 * W + (h + 1) * C].astype(jnp.bfloat16)
        aw = lax.dot_general(q, k, (((1,), (1,)), ((), ())),
                             preferred_element_type=jnp.float32)        # (S, S)
        aw = aw + neg_bias
        aw = aw - jnp.max(aw, axis=-1, keepdims=True)
        e = jnp.exp(aw)
        p = (e * pl.reciprocal(jnp.sum(e, axis=-1, keepdims=True), approx=True)
             ).astype(jnp.bfloat16)
        ho = jnp.dot(p, v, preferred_element_type=jnp.float32).astype(jnp.bfloat16)  # (S, C)
        # No concat of head outputs: fold each head straight into the out-projection by
        # accumulating against the matching row-slab of W_o.
        att_out = att_out + jnp.dot(ho, wo_ref[h * C:(h + 1) * C, :],
                                    preferred_element_type=jnp.float32)
    x = x + att_out + bo_ref[...]

    # ---------------- MLP sub-block: LN2 -> fc -> GELU -> proj -> +x ----------------
    xl2 = _layernorm(x, g2_ref[...], b2_ref[...]).astype(jnp.bfloat16)
    hmid = jnp.dot(xl2, wfc_ref[...], preferred_element_type=jnp.float32) + bfc_ref[...]
    hmid = _gelu_tanh(hmid).astype(jnp.bfloat16)
    y = jnp.dot(hmid, wpr_ref[...], preferred_element_type=jnp.float32) + bpr_ref[...]
    o_ref[0] = (x + y).astype(o_ref.dtype)


def _head_tail_logits_kernel(j_ref, g_ref, b_ref, wout_ref, bout_ref,
                             w1_ref, b1_ref, w2_ref, b2_ref, w3_ref, b3_ref,
                             mg_ref, mb_ref, o_ref):
    """Fused tail of the network for one batch element:
       final LN + output_proj_joints + head/tail MLP stacks + logits einsum."""
    x = j_ref[0]                                                      # (N, W) f32
    xl = _layernorm(x, g_ref[...], b_ref[...]).astype(jnp.bfloat16)
    jp = (jnp.dot(xl, wout_ref[...], preferred_element_type=jnp.float32)
          + bout_ref[...]).astype(jnp.bfloat16)                       # (N, W)

    def branch(i):                                                    # i=0 -> head, i=1 -> tail
        # cat([jp, token]) @ W1 + b1  ==  jp @ W1[:W] + (token @ W1[W:] + b1)
        # the token term is batch-independent and precomputed host-side into b1_ref.
        h = jnp.dot(jp, w1_ref[i], preferred_element_type=jnp.float32) + b1_ref[i]
        h = jnp.dot(h.astype(jnp.bfloat16), w2_ref[i],
                    preferred_element_type=jnp.float32) + b2_ref[i]
        h = jnp.dot(h.astype(jnp.bfloat16), w3_ref[i],
                    preferred_element_type=jnp.float32) + b3_ref[i]
        return _layernorm(h, mg_ref[i], mb_ref[i]).astype(jnp.bfloat16)

    head = branch(0)                                                  # (N, W)
    tail = branch(1)                                                  # (N, W)
    # einsum('ik,jk->ij') with f32 accumulation.
    logits = lax.dot_general(head, tail, (((1,), (1,)), ((), ())),
                             preferred_element_type=jnp.float32)      # (N, N)
    # TODO(synk): at real scale pad N to a multiple of 128 for lane-dense stores (v5e).
    o_ref[0] = logits.astype(o_ref.dtype)


# ----------------------------- pallas_call wrappers -----------------------------

def _weight_spec(shape, single_buffer):
    """Constant (grid-invariant) weight block. Single-buffered when supported."""
    idx = lambda *_: (0,) * len(shape)
    if single_buffer:
        try:
            return pl.BlockSpec(shape, idx, pipeline_mode=pl.Buffered(1))
        except Exception:  # older JAX without pipeline_mode / Buffered
            pass
    return pl.BlockSpec(shape, idx)


def _parallel():
    return pltpu.CompilerParams(dimension_semantics=("parallel",))


def joints_proj(je, w, b, single_buffer):
    B, N, F = je.shape
    W = w.shape[1]
    return pl.pallas_call(
        _joints_proj_kernel,
        out_shape=jax.ShapeDtypeStruct((B, N, W), jnp.float32),
        grid=(B,),
        in_specs=[pl.BlockSpec((1, N, F), lambda i: (i, 0, 0)),
                  _weight_spec((F, W), single_buffer),
                  _weight_spec((1, W), single_buffer)],
        out_specs=pl.BlockSpec((1, N, W), lambda i: (i, 0, 0)),
        compiler_params=_parallel(),
    )(je, w, b)


def transformer_layer(x, mask3, p, heads, single_buffer):
    B, S, W = x.shape
    H4 = p['fc_w'].shape[1]
    ws = functools.partial(_weight_spec, single_buffer=single_buffer)
    return pl.pallas_call(
        functools.partial(_layer_kernel, heads=heads),
        out_shape=jax.ShapeDtypeStruct((B, S, W), x.dtype),
        grid=(B,),
        in_specs=[pl.BlockSpec((1, S, W), lambda i: (i, 0, 0)),
                  pl.BlockSpec((1, 1, S), lambda i: (i, 0, 0)),
                  ws((1, W)), ws((1, W)),
                  ws((W, 3 * W)), ws((1, 3 * W)),
                  ws((W, W)), ws((1, W)),
                  ws((1, W)), ws((1, W)),
                  ws((W, H4)), ws((1, H4)),
                  ws((H4, W)), ws((1, W))],
        out_specs=pl.BlockSpec((1, S, W), lambda i: (i, 0, 0)),
        input_output_aliases={0: 0},
        compiler_params=_parallel(),
    )(x, mask3, p['ln1_g'], p['ln1_b'], p['qkv_w'], p['qkv_b'],
      p['attn_proj_w'], p['attn_proj_b'], p['ln2_g'], p['ln2_b'],
      p['fc_w'], p['fc_b'], p['proj_w'], p['proj_b'])


def head_tail_logits(joints_x, p, single_buffer):
    B, N, W = joints_x.shape
    HID = p['ht_w1a'].shape[-1]
    ws = functools.partial(_weight_spec, single_buffer=single_buffer)
    return pl.pallas_call(
        _head_tail_logits_kernel,
        out_shape=jax.ShapeDtypeStruct((B, N, N), jnp.float32),
        grid=(B,),
        in_specs=[pl.BlockSpec((1, N, W), lambda i: (i, 0, 0)),
                  ws((1, W)), ws((1, W)),
                  ws((W, W)), ws((1, W)),
                  ws((2, W, HID)), ws((2, 1, HID)),
                  ws((2, HID, HID)), ws((2, 1, HID)),
                  ws((2, HID, W)), ws((2, 1, W)),
                  ws((2, 1, W)), ws((2, 1, W))],
        out_specs=pl.BlockSpec((1, N, N), lambda i: (i, 0, 0)),
        compiler_params=_parallel(),
    )(joints_x, p['final_ln_g'], p['final_ln_b'], p['out_proj_w'], p['out_proj_b'],
      p['ht_w1a'], p['ht_b1'], p['ht_w2'], p['ht_b2'],
      p['ht_w3'], p['ht_b3'], p['ht_ln_g'], p['ht_ln_b'])


# ----------------------------- glue / forward -----------------------------

def fourier_embed(x, num_freqs=8, include_pi=True):
    freqs = 2.0 ** jnp.arange(num_freqs, dtype=jnp.float32)
    if include_pi:
        freqs = freqs * jnp.pi
    emb = (x[..., None] * freqs).reshape(x.shape[:-1] + (-1,))
    return jnp.concatenate([x, jnp.sin(emb), jnp.cos(emb)], axis=-1)


def attend_decoder_forward(params, latents, joints, joints_mask, *, heads, layers,
                           single_buffer_weights=True):
    B, N, _ = joints.shape
    M = latents.shape[1]

    je = fourier_embed(joints)                                         # (B, N, 51)  glue
    F_pad = params['joints_proj_w'].shape[0]
    je = jnp.pad(je, ((0, 0), (0, 0), (0, F_pad - je.shape[-1])))      # lane-friendly K=64
    joints_embeds = joints_proj(je, params['joints_proj_w'], params['joints_proj_b'],
                                single_buffer_weights)

    x = jnp.concatenate([joints_embeds, latents.astype(jnp.float32)], axis=1)   # (B, S, W)
    mask = jnp.concatenate([joints_mask, jnp.ones((B, M), joints_mask.dtype)], axis=-1)
    mask3 = mask[:, None, :]                                           # (B, 1, S)

    for i in range(layers):
        x = transformer_layer(x, mask3, params['blocks'][i], heads, single_buffer_weights)

    joints_x = x[:, :N, :]                                             # glue split
    return head_tail_logits(joints_x, params, single_buffer_weights)   # (B, N, N)


# ----------------------------- parameter init -----------------------------

def init_params(key, *, width, layers, heads, fourier_dim, fourier_dim_padded,
                head_token_len, mlp_hidden):
    keys = jax.random.split(key, 256)
    it = iter(range(256))

    def rnd(*shape, scale=0.02):
        return (scale * jax.random.normal(keys[next(it)], shape)).astype(jnp.float32)

    bf16 = lambda w: w.astype(jnp.bfloat16)
    ones_w = lambda: jnp.ones((1, width), jnp.float32)
    zeros_w = lambda: jnp.zeros((1, width), jnp.float32)
    C = width // heads

    def block_p():
        # torch-import note: permute the nn.Linear(width, 3*width) columns from the
        # reference's per-head-interleaved [h][q|k|v] layout to head-major
        # [Q_all | K_all | V_all], and fold the 1/sqrt(C) attention scale into the Q
        # columns (and Q bias, if qkv_bias were True — it is False here).
        qkv_w = rnd(width, 3 * width)
        qkv_w = qkv_w.at[:, :width].multiply(C ** -0.5)
        qkv_b = jnp.zeros((1, 3 * width), jnp.float32)                 # qkv_bias=False
        return dict(ln1_g=ones_w(), ln1_b=zeros_w(),
                    qkv_w=bf16(qkv_w), qkv_b=qkv_b,
                    attn_proj_w=bf16(rnd(width, width)), attn_proj_b=rnd(1, width),
                    ln2_g=ones_w(), ln2_b=zeros_w(),
                    fc_w=bf16(rnd(width, 4 * width)), fc_b=rnd(1, 4 * width),
                    proj_w=bf16(rnd(4 * width, width)), proj_b=rnd(1, width))

    # joints_proj: rows [fourier_dim:fourier_dim_padded] are zero (features are zero-padded).
    jp_w = jnp.zeros((fourier_dim_padded, width), jnp.float32)
    jp_w = jp_w.at[:fourier_dim].set(rnd(fourier_dim, width))

    # head/tail MLP stacks: index 0 = head branch, index 1 = tail branch.
    # The first Linear(width + head_token_len, hidden) is split: the joints part is ht_w1a;
    # the token part is precomputed host-side into the fused bias ht_b1 = tok @ W1_tok + b1.
    tok = rnd(2, 1, head_token_len)
    w1a = rnd(2, width, mlp_hidden)
    w1b = rnd(2, head_token_len, mlp_hidden)
    b1 = rnd(2, 1, mlp_hidden)
    ht_b1 = jnp.einsum('zij,zjk->zik', tok, w1b) + b1                  # (2, 1, HID) f32

    return dict(
        joints_proj_w=bf16(jp_w), joints_proj_b=rnd(1, width),
        blocks=[block_p() for _ in range(layers)],
        final_ln_g=ones_w(), final_ln_b=zeros_w(),
        out_proj_w=bf16(rnd(width, width)), out_proj_b=rnd(1, width),
        ht_w1a=bf16(w1a), ht_b1=ht_b1,
        ht_w2=bf16(rnd(2, mlp_hidden, mlp_hidden)), ht_b2=rnd(2, 1, mlp_hidden),
        ht_w3=bf16(rnd(2, mlp_hidden, width)), ht_b3=rnd(2, 1, width),
        ht_ln_g=jnp.ones((2, 1, width), jnp.float32),
        ht_ln_b=jnp.zeros((2, 1, width), jnp.float32),
    )


# ----------------------------- main -----------------------------

if __name__ == "__main__":
    # small stand-ins for width=768 / heads=12 / layers=4 / head_token=128 / hidden=512
    WIDTH, HEADS, LAYERS, NUM_FREQS = 64, 4, 2, 8
    HEAD_TOKEN_LEN, MLP_HIDDEN = 32, 128
    B, N_JOINTS, N_LATENTS = 2, 8, 16
    FOURIER_DIM = 3 * (2 * NUM_FREQS + 1)              # = 51
    FOURIER_DIM_PAD = 64                               # zero-padded, lane/sublane friendly

    key = jax.random.PRNGKey(0)
    kp, kl, kj = jax.random.split(key, 3)
    params = init_params(kp, width=WIDTH, layers=LAYERS, heads=HEADS,
                         fourier_dim=FOURIER_DIM, fourier_dim_padded=FOURIER_DIM_PAD,
                         head_token_len=HEAD_TOKEN_LEN, mlp_hidden=MLP_HIDDEN)
    latents = jax.random.normal(kl, (B, N_LATENTS, WIDTH), jnp.float32)
    joints = jax.random.uniform(kj, (B, N_JOINTS, 3), jnp.float32, minval=-1.0, maxval=1.0)
    joints_mask = jnp.array([[1.0] * N_JOINTS,
                             [1.0] * (N_JOINTS - 2) + [0.0] * 2], jnp.float32)

    def run(single_buffer):
        fwd = jax.jit(functools.partial(attend_decoder_forward, heads=HEADS, layers=LAYERS,
                                        single_buffer_weights=single_buffer))
        out = fwd(params, latents, joints, joints_mask)
        jax.block_until_ready(out)
        assert out.shape == (B, N_JOINTS, N_JOINTS)
        assert bool(jnp.all(jnp.isfinite(out)))
        return out

    try:
        logits = run(True)
    except Exception:
        # TODO(synk): pipeline_mode=pl.Buffered(1) not supported by this JAX/Mosaic build;
        # fall back to default double-buffered weight blocks (bf16 weights still halve VMEM).
        logits = run(False)

    print("KERNEL_OK")
</pallas_src>

<mosaic_0001>
module attributes {stable_mosaic.version = 11 : i64} {
  func.func @_joints_proj_kernel(%arg0: i32, %arg1: memref<1x8x64xf32, #tpu.memory_space<vmem>>, %arg2: memref<64x64xbf16, #tpu.memory_space<vmem>>, %arg3: memref<1x64xf32, #tpu.memory_space<vmem>>, %arg4: memref<1x8x64xf32, #tpu.memory_space<vmem>>) attributes {dimension_semantics = [#tpu.dimension_semantics<parallel>], iteration_bounds = array<i64: 2>, scalar_prefetch = 0 : i64, scratch_operands = 0 : i64, tpu.core_type = #tpu.core_type<tc>, window_params = [{transform_indices = @transform_0, window_bounds = array<i64: 1, 8, 64>}, {pipeline_mode = #tpu.pipeline_mode<synchronous>, transform_indices = @transform_1, window_bounds = array<i64: 64, 64>}, {pipeline_mode = #tpu.pipeline_mode<synchronous>, transform_indices = @transform_2, window_bounds = array<i64: 1, 64>}, {transform_indices = @transform_3, window_bounds = array<i64: 1, 8, 64>}]} {
    %c0 = arith.constant 0 : index
    %c0_0 = arith.constant 0 : index
    %c0_1 = arith.constant 0 : index
    %0 = vector.load %arg1[%c0, %c0_0, %c0_1] : memref<1x8x64xf32, #tpu.memory_space<vmem>>, vector<1x8x64xf32>
    %1 = vector.shape_cast %0 : vector<1x8x64xf32> to vector<8x64xf32>
    %2 = arith.truncf %1 : vector<8x64xf32> to vector<8x64xbf16>
    %c0_2 = arith.constant 0 : index
    %c0_3 = arith.constant 0 : index
    %3 = vector.load %arg2[%c0_2, %c0_3] : memref<64x64xbf16, #tpu.memory_space<vmem>>, vector<64x64xbf16>
    %cst = arith.constant dense<0.000000e+00> : vector<8x64xf32>
    %4 = tpu.matmul %2, %3, %cst {dimension_numbers = #tpu.dot_dimension_numbers<[1], [0], [0], [1], [0, 0, 1, 1], [], []>} : vector<8x64xbf16>, vector<64x64xbf16>, vector<8x64xf32> -> vector<8x64xf32>
    %c0_4 = arith.constant 0 : index
    %c0_5 = arith.constant 0 : index
    %5 = vector.load %arg3[%c0_4, %c0_5] : memref<1x64xf32, #tpu.memory_space<vmem>>, vector<1x64xf32>
    %6 = vector.broadcast %5 : vector<1x64xf32> to vector<8x64xf32>
    %7 = arith.addf %4, %6 : vector<8x64xf32>
    %c0_6 = arith.constant 0 : index
    %c0_7 = arith.constant 0 : index
    %c0_8 = arith.constant 0 : index
    %8 = vector.load %arg4[%c0_6, %c0_7, %c0_8] : memref<1x8x64xf32, #tpu.memory_space<vmem>>, vector<1x8x64xf32>
    %9 = vector.shape_cast %8 : vector<1x8x64xf32> to vector<8x64xf32>
    %10 = vector.shape_cast %7 : vector<8x64xf32> to vector<1x8x64xf32>
    tpu.vector_store %arg4[%c0_6, %c0_7, %c0_8], %10 {strides = array<i32>} : memref<1x8x64xf32, #tpu.memory_space<vmem>>, vector<1x8x64xf32>,
    return
  }
  func.func @transform_0(%arg0: i32) -> (i32, i32, i32) {
    %c0_i32 = arith.constant 0 : i32
    %c0_i32_0 = arith.constant 0 : i32
    %c0_i32_1 = arith.constant 0 : i32
    return %arg0, %c0_i32, %c0_i32_0 : i32, i32, i32
  }
  func.func @transform_1(%arg0: i32) -> (i32, i32) {
    %c0_i32 = arith.constant 0 : i32
    %c0_i32_0 = arith.constant 0 : i32
    %c0_i32_1 = arith.constant 0 : i32
    return %c0_i32, %c0_i32_0 : i32, i32
  }
  func.func @transform_2(%arg0: i32) -> (i32, i32) {
    %c0_i32 = arith.constant 0 : i32
    %c0_i32_0 = arith.constant 0 : i32
    %c0_i32_1 = arith.constant 0 : i32
    return %c0_i32, %c0_i32_0 : i32, i32
  }
  func.func @transform_3(%arg0: i32) -> (i32, i32, i32) {
    %c0_i32 = arith.constant 0 : i32
    %c0_i32_0 = arith.constant 0 : i32
    %c0_i32_1 = arith.constant 0 : i32
    return %arg0, %c0_i32, %c0_i32_0 : i32, i32, i32
  }
}

module attributes {stable_mosaic.version = 11 : i64} {
  func.func @_layer_kernel(%arg0: i32, %arg1: memref<1x24x64xf32, #tpu.memory_space<vmem>>, %arg2: memref<1x1x24xf32, #tpu.memory_space<vmem>>, %arg3: memref<1x64xf32, #tpu.memory_space<vmem>>, %arg4: memref<1x64xf32, #tpu.memory_space<vmem>>, %arg5: memref<64x192xbf16, #tpu.memory_space<vmem>>, %arg6: memref<1x192xf32, #tpu.memory_space<vmem>>, %arg7: memref<64x64xbf16, #tpu.memory_space<vmem>>, %arg8: memref<1x64xf32, #tpu.memory_space<vmem>>, %arg9: memref<1x64xf32, #tpu.memory_space<vmem>>, %arg10: memref<1x64xf32, #tpu.memory_space<vmem>>, %arg11: memref<64x256xbf16, #tpu.memory_space<vmem>>, %arg12: memref<1x256xf32, #tpu.memory_space<vmem>>, %arg13: memref<256x64xbf16, #tpu.memory_space<vmem>>, %arg14: memref<1x64xf32, #tpu.memory_space<vmem>>, %arg15: memref<1x24x64xf32, #tpu.memory_space<vmem>>) attributes {dimension_semantics = [#tpu.dimension_semantics<parallel>], iteration_bounds = array<i64: 2>, scalar_prefetch = 0 : i64, scratch_operands = 0 : i64, tpu.core_type = #tpu.core_type<tc>, window_params = [{transform_indices = @transform_0, window_bounds = array<i64: 1, 24, 64>}, {transform_indices = @transform_1, window_bounds = array<i64: 1, 1, 24>}, {pipeline_mode = #tpu.pipeline_mode<synchronous>, transform_indices = @transform_2, window_bounds = array<i64: 1, 64>}, {pipeline_mode = #tpu.pipeline_mode<synchronous>, transform_indices = @transform_3, window_bounds = array<i64: 1, 64>}, {pipeline_mode = #tpu.pipeline_mode<synchronous>, transform_indices = @transform_4, window_bounds = array<i64: 64, 192>}, {pipeline_mode = #tpu.pipeline_mode<synchronous>, transform_indices = @transform_5, window_bounds = array<i64: 1, 192>}, {pipeline_mode = #tpu.pipeline_mode<synchronous>, transform_indices = @transform_6, window_bounds = array<i64: 64, 64>}, {pipeline_mode = #tpu.pipeline_mode<synchronous>, transform_indices = @transform_7, window_bounds = array<i64: 1, 64>}, {pipeline_mode = #tpu.pipeline_mode<synchronous>, transform_indices = @transform_8, window_bounds = array<i64: 1, 64>}, {pipeline_mode = #tpu.pipeline_mode<synchronous>, transform_indices = @transform_9, window_bounds = array<i64: 1, 64>}, {pipeline_mode = #tpu.pipeline_mode<synchronous>, transform_indices = @transform_10, window_bounds = array<i64: 64, 256>}, {pipeline_mode = #tpu.pipeline_mode<synchronous>, transform_indices = @transform_11, window_bounds = array<i64: 1, 256>}, {pipeline_mode = #tpu.pipeline_mode<synchronous>, transform_indices = @transform_12, window_bounds = array<i64: 256, 64>}, {pipeline_mode = #tpu.pipeline_mode<synchronous>, transform_indices = @transform_13, window_bounds = array<i64: 1, 64>}, {transform_indices = @transform_14, window_bounds = array<i64: 1, 24, 64>}]} {
    %c0 = arith.constant 0 : index
    %c0_0 = arith.constant 0 : index
    %c0_1 = arith.constant 0 : index
    %0 = vector.load %arg1[%c0, %c0_0, %c0_1] : memref<1x24x64xf32, #tpu.memory_space<vmem>>, vector<1x24x64xf32>
    %1 = vector.shape_cast %0 : vector<1x24x64xf32> to vector<24x64xf32>
    %c0_2 = arith.constant 0 : index
    %c0_3 = arith.constant 0 : index
    %2 = vector.load %arg3[%c0_2, %c0_3] : memref<1x64xf32, #tpu.memory_space<vmem>>, vector<1x64xf32>
    %c0_4 = arith.constant 0 : index
    %c0_5 = arith.constant 0 : index
    %3 = vector.load %arg4[%c0_4, %c0_5] : memref<1x64xf32, #tpu.memory_space<vmem>>, vector<1x64xf32>
    %cst = arith.constant dense<0.000000e+00> : vector<24xf32>
    %4 = vector.multi_reduction <add>, %1, %cst [1] : vector<24x64xf32> to vector<24xf32>
    %5 = vector.shape_cast %4 : vector<24xf32> to vector<24x1xf32>
    %cst_6 = arith.constant 6.400000e+01 : f32
    %6 = vector.broadcast %cst_6 : f32 to vector<24x1xf32>
    %7 = arith.divf %5, %6 : vector<24x1xf32>
    %8 = vector.broadcast %7 : vector<24x1xf32> to vector<24x64xf32>
    %9 = arith.subf %1, %8 : vector<24x64xf32>
    %10 = arith.mulf %9, %9 : vector<24x64xf32>
    %cst_7 = arith.constant dense<0.000000e+00> : vector<24xf32>
    %11 = vector.multi_reduction <add>, %10, %cst_7 [1] : vector<24x64xf32> to vector<24xf32>
    %12 = vector.shape_cast %11 : vector<24xf32> to vector<24x1xf32>
    %cst_8 = arith.constant 6.400000e+01 : f32
    %13 = vector.broadcast %cst_8 : f32 to vector<24x1xf32>
    %14 = arith.divf %12, %13 : vector<24x1xf32>
    %cst_9 = arith.constant 9.99999974E-6 : f32
    %15 = vector.broadcast %cst_9 : f32 to vector<24x1xf32>
    %16 = arith.addf %14, %15 : vector<24x1xf32>
    %17 = math.rsqrt %16 : vector<24x1xf32>
    %18 = vector.broadcast %17 : vector<24x1xf32> to vector<24x64xf32>
    %19 = arith.mulf %9, %18 : vector<24x64xf32>
    %20 = vector.broadcast %2 : vector<1x64xf32> to vector<24x64xf32>
    %21 = arith.mulf %19, %20 : vector<24x64xf32>
    %22 = vector.broadcast %3 : vector<1x64xf32> to vector<24x64xf32>
    %23 = arith.addf %21, %22 : vector<24x64xf32>
    %24 = arith.truncf %23 : vector<24x64xf32> to vector<24x64xbf16>
    %c0_10 = arith.constant 0 : index
    %c0_11 = arith.constant 0 : index
    %25 = vector.load %arg5[%c0_10, %c0_11] : memref<64x192xbf16, #tpu.memory_space<vmem>>, vector<64x192xbf16>
    %cst_12 = arith.constant dense<0.000000e+00> : vector<24x192xf32>
    %26 = tpu.matmul %24, %25, %cst_12 {dimension_numbers = #tpu.dot_dimension_numbers<[1], [0], [0], [1], [0, 0, 1, 1], [], []>} : vector<24x64xbf16>, vector<64x192xbf16>, vector<24x192xf32> -> vector<24x192xf32>
    %c0_13 = arith.constant 0 : index
    %c0_14 = arith.constant 0 : index
    %27 = vector.load %arg6[%c0_13, %c0_14] : memref<1x192xf32, #tpu.memory_space<vmem>>, vector<1x192xf32>
    %28 = vector.broadcast %27 : vector<1x192xf32> to vector<24x192xf32>
    %29 = arith.addf %26, %28 : vector<24x192xf32>
    %c0_15 = arith.constant 0 : index
    %c0_16 = arith.constant 0 : index
    %c0_17 = arith.constant 0 : index
    %30 = vector.load %arg2[%c0_15, %c0_16, %c0_17] : memref<1x1x24xf32, #tpu.memory_space<vmem>>, vector<1x1x24xf32>
    %31 = vector.shape_cast %30 : vector<1x1x24xf32> to vector<1x24xf32>
    %cst_18 = arith.constant 0.000000e+00 : f32
    %32 = vector.broadcast %cst_18 : f32 to vector<1x24xf32>
    %33 = arith.cmpf oeq, %31, %32 : vector<1x24xf32>
    %cst_19 = arith.constant -1.000000e+30 : f32
    %cst_20 = arith.constant 0.000000e+00 : f32
    %34 = vector.broadcast %cst_19 : f32 to vector<1x24xf32>
    %35 = vector.broadcast %cst_20 : f32 to vector<1x24xf32>
    %36 = arith.select %33, %34, %35 : vector<1x24xi1>, vector<1x24xf32>
    %cst_21 = arith.constant 0.000000e+00 : f32
    %37 = vector.broadcast %cst_21 : f32 to vector<24x64xf32>
    %38 = vector.extract_strided_slice %29 {offsets = [0, 0], sizes = [24, 16], strides = [1, 1]} : vector<24x192xf32> to vector<24x16xf32>
    %39 = arith.truncf %38 : vector<24x16xf32> to vector<24x16xbf16>
    %40 = vector.extract_strided_slice %29 {offsets = [0, 64], sizes = [24, 16], strides = [1, 1]} : vector<24x192xf32> to vector<24x16xf32>
    %41 = arith.truncf %40 : vector<24x16xf32> to vector<24x16xbf16>
    %42 = vector.extract_strided_slice %29 {offsets = [0, 128], sizes = [24, 16], strides = [1, 1]} : vector<24x192xf32> to vector<24x16xf32>
    %43 = arith.truncf %42 : vector<24x16xf32> to vector<24x16xbf16>
    %cst_22 = arith.constant dense<0.000000e+00> : vector<24x24xf32>
    %44 = tpu.matmul %39, %41, %cst_22 {dimension_numbers = #tpu.dot_dimension_numbers<[1], [1], [0], [0], [0, 0, 1, 0], [], []>} : vector<24x16xbf16>, vector<24x16xbf16>, vector<24x24xf32> -> vector<24x24xf32>
    %45 = vector.broadcast %36 : vector<1x24xf32> to vector<24x24xf32>
    %46 = arith.addf %44, %45 : vector<24x24xf32>
    %cst_23 = arith.constant dense<0xFF800000> : vector<24xf32>
    %47 = vector.multi_reduction <maximumf>, %46, %cst_23 [1] : vector<24x24xf32> to vector<24xf32>
    %48 = vector.shape_cast %47 : vector<24xf32> to vector<24x1xf32>
    %49 = vector.broadcast %48 : vector<24x1xf32> to vector<24x24xf32>
    %50 = arith.subf %46, %49 : vector<24x24xf32>
    %51 = math.exp %50 : vector<24x24xf32>
    %cst_24 = arith.constant dense<0.000000e+00> : vector<24xf32>
    %52 = vector.multi_reduction <add>, %51, %cst_24 [1] : vector<24x24xf32> to vector<24xf32>
    %53 = vector.shape_cast %52 : vector<24xf32> to vector<24x1xf32>
    %54 = tpu.reciprocal %53 {approx = true} : vector<24x1xf32> -> vector<24x1xf32>
    %55 = vector.broadcast %54 : vector<24x1xf32> to vector<24x24xf32>
    %56 = arith.mulf %51, %55 : vector<24x24xf32>
    %57 = arith.truncf %56 : vector<24x24xf32> to vector<24x24xbf16>
    %cst_25 = arith.constant dense<0.000000e+00> : vector<24x16xf32>
    %58 = tpu.matmul %57, %43, %cst_25 {dimension_numbers = #tpu.dot_dimension_numbers<[1], [0], [0], [1], [0, 0, 1, 1], [], []>} : vector<24x24xbf16>, vector<24x16xbf16>, vector<24x16xf32> -> vector<24x16xf32>
    %59 = arith.truncf %58 : vector<24x16xf32> to vector<24x16xbf16>
    %c0_26 = arith.constant 0 : index
    %c0_27 = arith.constant 0 : index
    %60 = vector.load %arg7[%c0_26, %c0_27] : memref<64x64xbf16, #tpu.memory_space<vmem>>, vector<16x64xbf16>
    %cst_28 = arith.constant dense<0.000000e+00> : vector<24x64xf32>
    %61 = tpu.matmul %59, %60, %cst_28 {dimension_numbers = #tpu.dot_dimension_numbers<[1], [0], [0], [1], [0, 0, 1, 1], [], []>} : vector<24x16xbf16>, vector<16x64xbf16>, vector<24x64xf32> -> vector<24x64xf32>
    %62 = arith.addf %37, %61 : vector<24x64xf32>
    %63 = vector.extract_strided_slice %29 {offsets = [0, 16], sizes = [24, 16], strides = [1, 1]} : vector<24x192xf32> to vector<24x16xf32>
    %64 = arith.truncf %63 : vector<24x16xf32> to vector<24x16xbf16>
    %65 = vector.extract_strided_slice %29 {offsets = [0, 80], sizes = [24, 16], strides = [1, 1]} : vector<24x192xf32> to vector<24x16xf32>
    %66 = arith.truncf %65 : vector<24x16xf32> to vector<24x16xbf16>
    %67 = vector.extract_strided_slice %29 {offsets = [0, 144], sizes = [24, 16], strides = [1, 1]} : vector<24x192xf32> to vector<24x16xf32>
    %68 = arith.truncf %67 : vector<24x16xf32> to vector<24x16xbf16>
    %cst_29 = arith.constant dense<0.000000e+00> : vector<24x24xf32>
    %69 = tpu.matmul %64, %66, %cst_29 {dimension_numbers = #tpu.dot_dimension_numbers<[1], [1], [0], [0], [0, 0, 1, 0], [], []>} : vector<24x16xbf16>, vector<24x16xbf16>, vector<24x24xf32> -> vector<24x24xf32>
    %70 = vector.broadcast %36 : vector<1x24xf32> to vector<24x24xf32>
    %71 = arith.addf %69, %70 : vector<24x24xf32>
    %cst_30 = arith.constant dense<0xFF800000> : vector<24xf32>
    %72 = vector.multi_reduction <maximumf>, %71, %cst_30 [1] : vector<24x24xf32> to vector<24xf32>
    %73 = vector.shape_cast %72 : vector<24xf32> to vector<24x1xf32>
    %74 = vector.broadcast %73 : vector<24x1xf32> to vector<24x24xf32>
    %75 = arith.subf %71, %74 : vector<24x24xf32>
    %76 = math.exp %75 : vector<24x24xf32>
    %cst_31 = arith.constant dense<0.000000e+00> : vector<24xf32>
    %77 = vector.multi_reduction <add>, %76, %cst_31 [1] : vector<24x24xf32> to vector<24xf32>
    %78 = vector.shape_cast %77 : vector<24xf32> to vector<24x1xf32>
    %79 = tpu.reciprocal %78 {approx = true} : vector<24x1xf32> -> vector<24x1xf32>
    %80 = vector.broadcast %79 : vector<24x1xf32> to vector<24x24xf32>
    %81 = arith.mulf %76, %80 : vector<24x24xf32>
    %82 = arith.truncf %81 : vector<24x24xf32> to vector<24x24xbf16>
    %cst_32 = arith.constant dense<0.000000e+00> : vector<24x16xf32>
    %83 = tpu.matmul %82, %68, %cst_32 {dimension_numbers = #tpu.dot_dimension_numbers<[1], [0], [0], [1], [0, 0, 1, 1], [], []>} : vector<24x24xbf16>, vector<24x16xbf16>, vector<24x16xf32> -> vector<24x16xf32>
    %84 = arith.truncf %83 : vector<24x16xf32> to vector<24x16xbf16>
    %c16 = arith.constant 16 : index
    %c0_33 = arith.constant 0 : index
    %85 = vector.load %arg7[%c16, %c0_33] : memref<64x64xbf16, #tpu.memory_space<vmem>>, vector<16x64xbf16>
    %cst_34 = arith.constant dense<0.000000e+00> : vector<24x64xf32>
    %86 = tpu.matmul %84, %85, %cst_34 {dimension_numbers = #tpu.dot_dimension_numbers<[1], [0], [0], [1], [0, 0, 1, 1], [], []>} : vector<24x16xbf16>, vector<16x64xbf16>, vector<24x64xf32> -> vector<24x64xf32>
    %87 = arith.addf %62, %86 : vector<24x64xf32>
    %88 = vector.extract_strided_slice %29 {offsets = [0, 32], sizes = [24, 16], strides = [1, 1]} : vector<24x192xf32> to vector<24x16xf32>
    %89 = arith.truncf %88 : vector<24x16xf32> to vector<24x16xbf16>
    %90 = vector.extract_strided_slice %29 {offsets = [0, 96], sizes = [24, 16], strides = [1, 1]} : vector<24x192xf32> to vector<24x16xf32>
    %91 = arith.truncf %90 : vector<24x16xf32> to vector<24x16xbf16>
    %92 = vector.extract_strided_slice %29 {offsets = [0, 160], sizes = [24, 16], strides = [1, 1]} : vector<24x192xf32> to vector<24x16xf32>
    %93 = arith.truncf %92 : vector<24x16xf32> to vector<24x16xbf16>
    %cst_35 = arith.constant dense<0.000000e+00> : vector<24x24xf32>
    %94 = tpu.matmul %89, %91, %cst_35 {dimension_numbers = #tpu.dot_dimension_numbers<[1], [1], [0], [0], [0, 0, 1, 0], [], []>} : vector<24x16xbf16>, vector<24x16xbf16>, vector<24x24xf32> -> vector<24x24xf32>
    %95 = vector.broadcast %36 : vector<1x24xf32> to vector<24x24xf32>
    %96 = arith.addf %94, %95 : vector<24x24xf32>
    %cst_36 = arith.constant dense<0xFF800000> : vector<24xf32>
    %97 = vector.multi_reduction <maximumf>, %96, %cst_36 [1] : vector<24x24xf32> to vector<24xf32>
    %98 = vector.shape_cast %97 : vector<24xf32> to vector<24x1xf32>
    %99 = vector.broadcast %98 : vector<24x1xf32> to vector<24x24xf32>
    %100 = arith.subf %96, %99 : vector<24x24xf32>
    %101 = math.exp %100 : vector<24x24xf32>
    %cst_37 = arith.constant dense<0.000000e+00> : vector<24xf32>
    %102 = vector.multi_reduction <add>, %101, %cst_37 [1] : vector<24x24xf32> to vector<24xf32>
    %103 = vector.shape_cast %102 : vector<24xf32> to vector<24x1xf32>
    %104 = tpu.reciprocal %103 {approx = true} : vector<24x1xf32> -> vector<24x1xf32>
    %105 = vector.broadcast %104 : vector<24x1xf32> to vector<24x24xf32>
    %106 = arith.mulf %101, %105 : vector<24x24xf32>
    %107 = arith.truncf %106 : vector<24x24xf32> to vector<24x24xbf16>
    %cst_38 = arith.constant dense<0.000000e+00> : vector<24x16xf32>
    %108 = tpu.matmul %107, %93, %cst_38 {dimension_numbers = #tpu.dot_dimension_numbers<[1], [0], [0], [1], [0, 0, 1, 1], [], []>} : vector<24x24xbf16>, vector<24x16xbf16>, vector<24x16xf32> -> vector<24x16xf32>
    %109 = arith.truncf %108 : vector<24x16xf32> to vector<24x16xbf16>
    %c32 = arith.constant 32 : index
    %c0_39 = arith.constant 0 : index
    %110 = vector.load %arg7[%c32, %c0_39] : memref<64x64xbf16, #tpu.memory_space<vmem>>, vector<16x64xbf16>
    %cst_40 = arith.constant dense<0.000000e+00> : vector<24x64xf32>
    %111 = tpu.matmul %109, %110, %cst_40 {dimension_numbers = #tpu.dot_dimension_numbers<[1], [0], [0], [1], [0, 0, 1, 1], [], []>} : vector<24x16xbf16>, vector<16x64xbf16>, vector<24x64xf32> -> vector<24x64xf32>
    %112 = arith.addf %87, %111 : vector<24x64xf32>
    %113 = vector.extract_strided_slice %29 {offsets = [0, 48], sizes = [24, 16], strides = [1, 1]} : vector<24x192xf32> to vector<24x16xf32>
    %114 = arith.truncf %113 : vector<24x16xf32> to vector<24x16xbf16>
    %115 = vector.extract_strided_slice %29 {offsets = [0, 112], sizes = [24, 16], strides = [1, 1]} : vector<24x192xf32> to vector<24x16xf32>
    %116 = arith.truncf %115 : vector<24x16xf32> to vector<24x16xbf16>
    %117 = vector.extract_strided_slice %29 {offsets = [0, 176], sizes = [24, 16], strides = [1, 1]} : vector<24x192xf32> to vector<24x16xf32>
    %118 = arith.truncf %117 : vector<24x16xf32> to vector<24x16xbf16>
    %cst_41 = arith.constant dense<0.000000e+00> : vector<24x24xf32>
    %119 = tpu.matmul %114, %116, %cst_41 {dimension_numbers = #tpu.dot_dimension_numbers<[1], [1], [0], [0], [0, 0, 1, 0], [], []>} : vector<24x16xbf16>, vector<24x16xbf16>, vector<24x24xf32> -> vector<24x24xf32>
    %120 = vector.broadcast %36 : vector<1x24xf32> to vector<24x24xf32>
    %121 = arith.addf %119, %120 : vector<24x24xf32>
    %cst_42 = arith.constant dense<0xFF800000> : vector<24xf32>
    %122 = vector.multi_reduction <maximumf>, %121, %cst_42 [1] : vector<24x24xf32> to vector<24xf32>
    %123 = vector.shape_cast %122 : vector<24xf32> to vector<24x1xf32>
    %124 = vector.broadcast %123 : vector<24x1xf32> to vector<24x24xf32>
    %125 = arith.subf %121, %124 : vector<24x24xf32>
    %126 = math.exp %125 : vector<24x24xf32>
    %cst_43 = arith.constant dense<0.000000e+00> : vector<24xf32>
    %127 = vector.multi_reduction <add>, %126, %cst_43 [1] : vector<24x24xf32> to vector<24xf32>
    %128 = vector.shape_cast %127 : vector<24xf32> to vector<24x1xf32>
    %129 = tpu.reciprocal %128 {approx = true} : vector<24x1xf32> -> vector<24x1xf32>
    %130 = vector.broadcast %129 : vector<24x1xf32> to vector<24x24xf32>
    %131 = arith.mulf %126, %130 : vector<24x24xf32>
    %132 = arith.truncf %131 : vector<24x24xf32> to vector<24x24xbf16>
    %cst_44 = arith.constant dense<0.000000e+00> : vector<24x16xf32>
    %133 = tpu.matmul %132, %118, %cst_44 {dimension_numbers = #tpu.dot_dimension_numbers<[1], [0], [0], [1], [0, 0, 1, 1], [], []>} : vector<24x24xbf16>, vector<24x16xbf16>, vector<24x16xf32> -> vector<24x16xf32>
    %134 = arith.truncf %133 : vector<24x16xf32> to vector<24x16xbf16>
    %c48 = arith.constant 48 : index
    %c0_45 = arith.constant 0 : index
    %135 = vector.load %arg7[%c48, %c0_45] : memref<64x64xbf16, #tpu.memory_space<vmem>>, vector<16x64xbf16>
    %cst_46 = arith.constant dense<0.000000e+00> : vector<24x64xf32>
    %136 = tpu.matmul %134, %135, %cst_46 {dimension_numbers = #tpu.dot_dimension_numbers<[1], [0], [0], [1], [0, 0, 1, 1], [], []>} : vector<24x16xbf16>, vector<16x64xbf16>, vector<24x64xf32> -> vector<24x64xf32>
    %137 = arith.addf %112, %136 : vector<24x64xf32>
    %138 = arith.addf %1, %137 : vector<24x64xf32>
    %c0_47 = arith.constant 0 : index
    %c0_48 = arith.constant 0 : index
    %139 = vector.load %arg8[%c0_47, %c0_48] : memref<1x64xf32, #tpu.memory_space<vmem>>, vector<1x64xf32>
    %140 = vector.broadcast %139 : vector<1x64xf32> to vector<24x64xf32>
    %141 = arith.addf %138, %140 : vector<24x64xf32>
    %c0_49 = arith.constant 0 : index
    %c0_50 = arith.constant 0 : index
    %142 = vector.load %arg9[%c0_49, %c0_50] : memref<1x64xf32, #tpu.memory_space<vmem>>, vector<1x64xf32>
    %c0_51 = arith.constant 0 : index
    %c0_52 = arith.constant 0 : index
    %143 = vector.load %arg10[%c0_51, %c0_52] : memref<1x64xf32, #tpu.memory_space<vmem>>, vector<1x64xf32>
    %cst_53 = arith.constant dense<0.000000e+00> : vector<24xf32>
    %144 = vector.multi_reduction <add>, %141, %cst_53 [1] : vector<24x64xf32> to vector<24xf32>
    %145 = vector.shape_cast %144 : vector<24xf32> to vector<24x1xf32>
    %cst_54 = arith.constant 6.400000e+01 : f32
    %146 = vector.broadcast %cst_54 : f32 to vector<24x1xf32>
    %147 = arith.divf %145, %146 : vector<24x1xf32>
    %148 = vector.broadcast %147 : vector<24x1xf32> to vector<24x64xf32>
    %149 = arith.subf %141, %148 : vector<24x64xf32>
    %150 = arith.mulf %149, %149 : vector<24x64xf32>
    %cst_55 = arith.constant dense<0.000000e+00> : vector<24xf32>
    %151 = vector.multi_reduction <add>, %150, %cst_55 [1] : vector<24x64xf32> to vector<24xf32>
    %152 = vector.shape_cast %151 : vector<24xf32> to vector<24x1xf32>
    %cst_56 = arith.constant 6.400000e+01 : f32
    %153 = vector.broadcast %cst_56 : f32 to vector<24x1xf32>
    %154 = arith.divf %152, %153 : vector<24x1xf32>
    %cst_57 = arith.constant 9.99999974E-6 : f32
    %155 = vector.broadcast %cst_57 : f32 to vector<24x1xf32>
    %156 = arith.addf %154, %155 : vector<24x1xf32>
    %157 = math.rsqrt %156 : vector<24x1xf32>
    %158 = vector.broadcast %157 : vector<24x1xf32> to vector<24x64xf32>
    %159 = arith.mulf %149, %158 : vector<24x64xf32>
    %160 = vector.broadcast %142 : vector<1x64xf32> to vector<24x64xf32>
    %161 = arith.mulf %159, %160 : vector<24x64xf32>
    %162 = vector.broadcast %143 : vector<1x64xf32> to vector<24x64xf32>
    %163 = arith.addf %161, %162 : vector<24x64xf32>
    %164 = arith.truncf %163 : vector<24x64xf32> to vector<24x64xbf16>
    %c0_58 = arith.constant 0 : index
    %c0_59 = arith.constant 0 : index
    %165 = vector.load %arg11[%c0_58, %c0_59] : memref<64x256xbf16, #tpu.memory_space<vmem>>, vector<64x256xbf16>
    %cst_60 = arith.constant dense<0.000000e+00> : vector<24x256xf32>
    %166 = tpu.matmul %164, %165, %cst_60 {dimension_numbers = #tpu.dot_dimension_numbers<[1], [0], [0], [1], [0, 0, 1, 1], [], []>} : vector<24x64xbf16>, vector<64x256xbf16>, vector<24x256xf32> -> vector<24x256xf32>
    %c0_61 = arith.constant 0 : index
    %c0_62 = arith.constant 0 : index
    %167 = vector.load %arg12[%c0_61, %c0_62] : memref<1x256xf32, #tpu.memory_space<vmem>>, vector<1x256xf32>
    %168 = vector.broadcast %167 : vector<1x256xf32> to vector<24x256xf32>
    %169 = arith.addf %166, %168 : vector<24x256xf32>
    %cst_63 = arith.constant 5.000000e-01 : f32
    %170 = vector.broadcast %cst_63 : f32 to vector<24x256xf32>
    %171 = arith.mulf %170, %169 : vector<24x256xf32>
    %cst_64 = arith.constant 4.471500e-02 : f32
    %172 = vector.broadcast %cst_64 : f32 to vector<24x256xf32>
    %173 = arith.mulf %172, %169 : vector<24x256xf32>
    %174 = arith.mulf %173, %169 : vector<24x256xf32>
    %175 = arith.mulf %174, %169 : vector<24x256xf32>
    %176 = arith.addf %169, %175 : vector<24x256xf32>
    %cst_65 = arith.constant 0.797884583 : f32
    %177 = vector.broadcast %cst_65 : f32 to vector<24x256xf32>
    %178 = arith.mulf %177, %176 : vector<24x256xf32>
    %179 = math.tanh %178 : vector<24x256xf32>
    %cst_66 = arith.constant 1.000000e+00 : f32
    %180 = vector.broadcast %cst_66 : f32 to vector<24x256xf32>
    %181 = arith.addf %180, %179 : vector<24x256xf32>
    %182 = arith.mulf %171, %181 : vector<24x256xf32>
    %183 = arith.truncf %182 : vector<24x256xf32> to vector<24x256xbf16>
    %c0_67 = arith.constant 0 : index
    %c0_68 = arith.constant 0 : index
    %184 = vector.load %arg13[%c0_67, %c0_68] : memref<256x64xbf16, #tpu.memory_space<vmem>>, vector<256x64xbf16>
    %cst_69 = arith.constant dense<0.000000e+00> : vector<24x64xf32>
    %185 = tpu.matmul %183, %184, %cst_69 {dimension_numbers = #tpu.dot_dimension_numbers<[1], [0], [0], [1], [0, 0, 1, 1], [], []>} : vector<24x256xbf16>, vector<256x64xbf16>, vector<24x64xf32> -> vector<24x64xf32>
    %c0_70 = arith.constant 0 : index
    %c0_71 = arith.constant 0 : index
    %186 = vector.load %arg14[%c0_70, %c0_71] : memref<1x64xf32, #tpu.memory_space<vmem>>, vector<1x64xf32>
    %187 = vector.broadcast %186 : vector<1x64xf32> to vector<24x64xf32>
    %188 = arith.addf %185, %187 : vector<24x64xf32>
    %189 = arith.addf %141, %188 : vector<24x64xf32>
    %c0_72 = arith.constant 0 : index
    %c0_73 = arith.constant 0 : index
    %c0_74 = arith.constant 0 : index
    %190 = vector.load %arg15[%c0_72, %c0_73, %c0_74] : memref<1x24x64xf32, #tpu.memory_space<vmem>>, vector<1x24x64xf32>
    %191 = vector.shape_cast %190 : vector<1x24x64xf32> to vector<24x64xf32>
    %192 = vector.shape_cast %189 : vector<24x64xf32> to vector<1x24x64xf32>
    tpu.vector_store %arg15[%c0_72, %c0_73, %c0_74], %192 {strides = array<i32>} : memref<1x24x64xf32, #tpu.memory_space<vmem>>, vector<1x24x64xf32>,
    return
  }
  func.func @transform_0(%arg0: i32) -> (i32, i32, i32) {
    %c0_i32 = arith.constant 0 : i32
    %c0_i32_0 = arith.constant 0 : i32
    %c0_i32_1 = arith.constant 0 : i32
    return %arg0, %c0_i32, %c0_i32_0 : i32, i32, i32
  }
  func.func @transform_1(%arg0: i32) -> (i32, i32, i32) {
    %c0_i32 = arith.constant 0 : i32
    %c0_i32_0 = arith.constant 0 : i32
    %c0_i32_1 = arith.constant 0 : i32
    return %arg0, %c0_i32, %c0_i32_0 : i32, i32, i32
  }
  func.func @transform_2(%arg0: i32) -> (i32, i32) {
    %c0_i32 = arith.constant 0 : i32
    %c0_i32_0 = arith.constant 0 : i32
    %c0_i32_1 = arith.constant 0 : i32
    return %c0_i32, %c0_i32_0 : i32, i32
  }
  func.func @transform_3(%arg0: i32) -> (i32, i32) {
    %c0_i32 = arith.constant 0 : i32
    %c0_i32_0 = arith.constant 0 : i32
    %c0_i32_1 = arith.constant 0 : i32
    return %c0_i32, %c0_i32_0 : i32, i32
  }
  func.func @transform_4(%arg0: i32) -> (i32, i32) {
    %c0_i32 = arith.constant 0 : i32
    %c0_i32_0 = arith.constant 0 : i32
    %c0_i32_1 = arith.constant 0 : i32
    return %c0_i32, %c0_i32_0 : i32, i32
  }
  func.func @transform_5(%arg0: i32) -> (i32, i32) {
    %c0_i32 = arith.constant 0 : i32
    %c0_i32_0 = arith.constant 0 : i32
    %c0_i32_1 = arith.constant 0 : i32
    return %c0_i32, %c0_i32_0 : i32, i32
  }
  func.func @transform_6(%arg0: i32) -> (i32, i32) {
    %c0_i32 = arith.constant 0 : i32
    %c0_i32_0 = arith.constant 0 : i32
    %c0_i32_1 = arith.constant 0 : i32
    return %c0_i32, %c0_i32_0 : i32, i32
  }
  func.func @transform_7(%arg0: i32) -> (i32, i32) {
    %c0_i32 = arith.constant 0 : i32
    %c0_i32_0 = arith.constant 0 : i32
    %c0_i32_1 = arith.constant 0 : i32
    return %c0_i32, %c0_i32_0 : i32, i32
  }
  func.func @transform_8(%arg0: i32) -> (i32, i32) {
    %c0_i32 = arith.constant 0 : i32
    %c0_i32_0 = arith.constant 0 : i32
    %c0_i32_1 = arith.constant 0 : i32
    return %c0_i32, %c0_i32_0 : i32, i32
  }
  func.func @transform_9(%arg0: i32) -> (i32, i32) {
    %c0_i32 = arith.constant 0 : i32
    %c0_i32_0 = arith.constant 0 : i32
    %c0_i32_1 = arith.constant 0 : i32
    return %c0_i32, %c0_i32_0 : i32, i32
  }
  func.func @transform_10(%arg0: i32) -> (i32, i32) {
    %c0_i32 = arith.constant 0 : i32
    %c0_i32_0 = arith.constant 0 : i32
    %c0_i32_1 = arith.constant 0 : i32
    return %c0_i32, %c0_i32_0 : i32, i32
  }
  func.func @transform_11(%arg0: i32) -> (i32, i32) {
    %c0_i32 = arith.constant 0 : i32
    %c0_i32_0 = arith.constant 0 : i32
    %c0_i32_1 = arith.constant 0 : i32
    return %c0_i32, %c0_i32_0 : i32, i32
  }
  func.func @transform_12(%arg0: i32) -> (i32, i32) {
    %c0_i32 = arith.constant 0 : i32
    %c0_i32_0 = arith.constant 0 : i32
    %c0_i32_1 = arith.constant 0 : i32
    return %c0_i32, %c0_i32_0 : i32, i32
  }
  func.func @transform_13(%arg0: i32) -> (i32, i32) {
    %c0_i32 = arith.constant 0 : i32
    %c0_i32_0 = arith.constant 0 : i32
    %c0_i32_1 = arith.constant 0 : i32
    return %c0_i32, %c0_i32_0 : i32, i32
  }
  func.func @transform_14(%arg0: i32) -> (i32, i32, i32) {
    %c0_i32 = arith.constant 0 : i32
    %c0_i32_0 = arith.constant 0 : i32
    %c0_i32_1 = arith.constant 0 : i32
    return %arg0, %c0_i32, %c0_i32_0 : i32, i32, i32
  }
}

module attributes {stable_mosaic.version = 11 : i64} {
  func.func @_head_tail_logits_kernel(%arg0: i32, %arg1: memref<1x8x64xf32, #tpu.memory_space<vmem>>, %arg2: memref<1x64xf32, #tpu.memory_space<vmem>>, %arg3: memref<1x64xf32, #tpu.memory_space<vmem>>, %arg4: memref<64x64xbf16, #tpu.memory_space<vmem>>, %arg5: memref<1x64xf32, #tpu.memory_space<vmem>>, %arg6: memref<2x64x128xbf16, #tpu.memory_space<vmem>>, %arg7: memref<2x1x128xf32, #tpu.memory_space<vmem>>, %arg8: memref<2x128x128xbf16, #tpu.memory_space<vmem>>, %arg9: memref<2x1x128xf32, #tpu.memory_space<vmem>>, %arg10: memref<2x128x64xbf16, #tpu.memory_space<vmem>>, %arg11: memref<2x1x64xf32, #tpu.memory_space<vmem>>, %arg12: memref<2x1x64xf32, #tpu.memory_space<vmem>>, %arg13: memref<2x1x64xf32, #tpu.memory_space<vmem>>, %arg14: memref<1x8x8xf32, #tpu.memory_space<vmem>>) attributes {dimension_semantics = [#tpu.dimension_semantics<parallel>], iteration_bounds = array<i64: 2>, scalar_prefetch = 0 : i64, scratch_operands = 0 : i64, tpu.core_type = #tpu.core_type<tc>, window_params = [{transform_indices = @transform_0, window_bounds = array<i64: 1, 8, 64>}, {pipeline_mode = #tpu.pipeline_mode<synchronous>, transform_indices = @transform_1, window_bounds = array<i64: 1, 64>}, {pipeline_mode = #tpu.pipeline_mode<synchronous>, transform_indices = @transform_2, window_bounds = array<i64: 1, 64>}, {pipeline_mode = #tpu.pipeline_mode<synchronous>, transform_indices = @transform_3, window_bounds = array<i64: 64, 64>}, {pipeline_mode = #tpu.pipeline_mode<synchronous>, transform_indices = @transform_4, window_bounds = array<i64: 1, 64>}, {pipeline_mode = #tpu.pipeline_mode<synchronous>, transform_indices = @transform_5, window_bounds = array<i64: 2, 64, 128>}, {pipeline_mode = #tpu.pipeline_mode<synchronous>, transform_indices = @transform_6, window_bounds = array<i64: 2, 1, 128>}, {pipeline_mode = #tpu.pipeline_mode<synchronous>, transform_indices = @transform_7, window_bounds = array<i64: 2, 128, 128>}, {pipeline_mode = #tpu.pipeline_mode<synchronous>, transform_indices = @transform_8, window_bounds = array<i64: 2, 1, 128>}, {pipeline_mode = #tpu.pipeline_mode<synchronous>, transform_indices = @transform_9, window_bounds = array<i64: 2, 128, 64>}, {pipeline_mode = #tpu.pipeline_mode<synchronous>, transform_indices = @transform_10, window_bounds = array<i64: 2, 1, 64>}, {pipeline_mode = #tpu.pipeline_mode<synchronous>, transform_indices = @transform_11, window_bounds = array<i64: 2, 1, 64>}, {pipeline_mode = #tpu.pipeline_mode<synchronous>, transform_indices = @transform_12, window_bounds = array<i64: 2, 1, 64>}, {transform_indices = @transform_13, window_bounds = array<i64: 1, 8, 8>}]} {
    %c0 = arith.constant 0 : index
    %c0_0 = arith.constant 0 : index
    %c0_1 = arith.constant 0 : index
    %0 = vector.load %arg1[%c0, %c0_0, %c0_1] : memref<1x8x64xf32, #tpu.memory_space<vmem>>, vector<1x8x64xf32>
    %1 = vector.shape_cast %0 : vector<1x8x64xf32> to vector<8x64xf32>
    %c0_2 = arith.constant 0 : index
    %c0_3 = arith.constant 0 : index
    %2 = vector.load %arg2[%c0_2, %c0_3] : memref<1x64xf32, #tpu.memory_space<vmem>>, vector<1x64xf32>
    %c0_4 = arith.constant 0 : index
    %c0_5 = arith.constant 0 : index
    %3 = vector.load %arg3[%c0_4, %c0_5] : memref<1x64xf32, #tpu.memory_space<vmem>>, vector<1x64xf32>
    %cst = arith.constant dense<0.000000e+00> : vector<8xf32>
    %4 = vector.multi_reduction <add>, %1, %cst [1] : vector<8x64xf32> to vector<8xf32>
    %5 = vector.shape_cast %4 : vector<8xf32> to vector<8x1xf32>
    %cst_6 = arith.constant 6.400000e+01 : f32
    %6 = vector.broadcast %cst_6 : f32 to vector<8x1xf32>
    %7 = arith.divf %5, %6 : vector<8x1xf32>
    %8 = vector.broadcast %7 : vector<8x1xf32> to vector<8x64xf32>
    %9 = arith.subf %1, %8 : vector<8x64xf32>
    %10 = arith.mulf %9, %9 : vector<8x64xf32>
    %cst_7 = arith.constant dense<0.000000e+00> : vector<8xf32>
    %11 = vector.multi_reduction <add>, %10, %cst_7 [1] : vector<8x64xf32> to vector<8xf32>
    %12 = vector.shape_cast %11 : vector<8xf32> to vector<8x1xf32>
    %cst_8 = arith.constant 6.400000e+01 : f32
    %13 = vector.broadcast %cst_8 : f32 to vector<8x1xf32>
    %14 = arith.divf %12, %13 : vector<8x1xf32>
    %cst_9 = arith.constant 9.99999974E-6 : f32
    %15 = vector.broadcast %cst_9 : f32 to vector<8x1xf32>
    %16 = arith.addf %14, %15 : vector<8x1xf32>
    %17 = math.rsqrt %16 : vector<8x1xf32>
    %18 = vector.broadcast %17 : vector<8x1xf32> to vector<8x64xf32>
    %19 = arith.mulf %9, %18 : vector<8x64xf32>
    %20 = vector.broadcast %2 : vector<1x64xf32> to vector<8x64xf32>
    %21 = arith.mulf %19, %20 : vector<8x64xf32>
    %22 = vector.broadcast %3 : vector<1x64xf32> to vector<8x64xf32>
    %23 = arith.addf %21, %22 : vector<8x64xf32>
    %24 = arith.truncf %23 : vector<8x64xf32> to vector<8x64xbf16>
    %c0_10 = arith.constant 0 : index
    %c0_11 = arith.constant 0 : index
    %25 = vector.load %arg4[%c0_10, %c0_11] : memref<64x64xbf16, #tpu.memory_space<vmem>>, vector<64x64xbf16>
    %cst_12 = arith.constant dense<0.000000e+00> : vector<8x64xf32>
    %26 = tpu.matmul %24, %25, %cst_12 {dimension_numbers = #tpu.dot_dimension_numbers<[1], [0], [0], [1], [0, 0, 1, 1], [], []>} : vector<8x64xbf16>, vector<64x64xbf16>, vector<8x64xf32> -> vector<8x64xf32>
    %c0_13 = arith.constant 0 : index
    %c0_14 = arith.constant 0 : index
    %27 = vector.load %arg5[%c0_13, %c0_14] : memref<1x64xf32, #tpu.memory_space<vmem>>, vector<1x64xf32>
    %28 = vector.broadcast %27 : vector<1x64xf32> to vector<8x64xf32>
    %29 = arith.addf %26, %28 : vector<8x64xf32>
    %30 = arith.truncf %29 : vector<8x64xf32> to vector<8x64xbf16>
    %c0_15 = arith.constant 0 : index
    %c0_16 = arith.constant 0 : index
    %c0_17 = arith.constant 0 : index
    %31 = vector.load %arg6[%c0_15, %c0_16, %c0_17] : memref<2x64x128xbf16, #tpu.memory_space<vmem>>, vector<1x64x128xbf16>
    %32 = vector.shape_cast %31 : vector<1x64x128xbf16> to vector<64x128xbf16>
    %cst_18 = arith.constant dense<0.000000e+00> : vector<8x128xf32>
    %33 = tpu.matmul %30, %32, %cst_18 {dimension_numbers = #tpu.dot_dimension_numbers<[1], [0], [0], [1], [0, 0, 1, 1], [], []>} : vector<8x64xbf16>, vector<64x128xbf16>, vector<8x128xf32> -> vector<8x128xf32>
    %c0_19 = arith.constant 0 : index
    %c0_20 = arith.constant 0 : index
    %c0_21 = arith.constant 0 : index
    %34 = vector.load %arg7[%c0_19, %c0_20, %c0_21] : memref<2x1x128xf32, #tpu.memory_space<vmem>>, vector<1x1x128xf32>
    %35 = vector.shape_cast %34 : vector<1x1x128xf32> to vector<1x128xf32>
    %36 = vector.broadcast %35 : vector<1x128xf32> to vector<8x128xf32>
    %37 = arith.addf %33, %36 : vector<8x128xf32>
    %38 = arith.truncf %37 : vector<8x128xf32> to vector<8x128xbf16>
    %c0_22 = arith.constant 0 : index
    %c0_23 = arith.constant 0 : index
    %c0_24 = arith.constant 0 : index
    %39 = vector.load %arg8[%c0_22, %c0_23, %c0_24] : memref<2x128x128xbf16, #tpu.memory_space<vmem>>, vector<1x128x128xbf16>
    %40 = vector.shape_cast %39 : vector<1x128x128xbf16> to vector<128x128xbf16>
    %cst_25 = arith.constant dense<0.000000e+00> : vector<8x128xf32>
    %41 = tpu.matmul %38, %40, %cst_25 {dimension_numbers = #tpu.dot_dimension_numbers<[1], [0], [0], [1], [0, 0, 1, 1], [], []>} : vector<8x128xbf16>, vector<128x128xbf16>, vector<8x128xf32> -> vector<8x128xf32>
    %c0_26 = arith.constant 0 : index
    %c0_27 = arith.constant 0 : index
    %c0_28 = arith.constant 0 : index
    %42 = vector.load %arg9[%c0_26, %c0_27, %c0_28] : memref<2x1x128xf32, #tpu.memory_space<vmem>>, vector<1x1x128xf32>
    %43 = vector.shape_cast %42 : vector<1x1x128xf32> to vector<1x128xf32>
    %44 = vector.broadcast %43 : vector<1x128xf32> to vector<8x128xf32>
    %45 = arith.addf %41, %44 : vector<8x128xf32>
    %46 = arith.truncf %45 : vector<8x128xf32> to vector<8x128xbf16>
    %c0_29 = arith.constant 0 : index
    %c0_30 = arith.constant 0 : index
    %c0_31 = arith.constant 0 : index
    %47 = vector.load %arg10[%c0_29, %c0_30, %c0_31] : memref<2x128x64xbf16, #tpu.memory_space<vmem>>, vector<1x128x64xbf16>
    %48 = vector.shape_cast %47 : vector<1x128x64xbf16> to vector<128x64xbf16>
    %cst_32 = arith.constant dense<0.000000e+00> : vector<8x64xf32>
    %49 = tpu.matmul %46, %48, %cst_32 {dimension_numbers = #tpu.dot_dimension_numbers<[1], [0], [0], [1], [0, 0, 1, 1], [], []>} : vector<8x128xbf16>, vector<128x64xbf16>, vector<8x64xf32> -> vector<8x64xf32>
    %c0_33 = arith.constant 0 : index
    %c0_34 = arith.constant 0 : index
    %c0_35 = arith.constant 0 : index
    %50 = vector.load %arg11[%c0_33, %c0_34, %c0_35] : memref<2x1x64xf32, #tpu.memory_space<vmem>>, vector<1x1x64xf32>
    %51 = vector.shape_cast %50 : vector<1x1x64xf32> to vector<1x64xf32>
    %52 = vector.broadcast %51 : vector<1x64xf32> to vector<8x64xf32>
    %53 = arith.addf %49, %52 : vector<8x64xf32>
    %c0_36 = arith.constant 0 : index
    %c0_37 = arith.constant 0 : index
    %c0_38 = arith.constant 0 : index
    %54 = vector.load %arg12[%c0_36, %c0_37, %c0_38] : memref<2x1x64xf32, #tpu.memory_space<vmem>>, vector<1x1x64xf32>
    %55 = vector.shape_cast %54 : vector<1x1x64xf32> to vector<1x64xf32>
    %c0_39 = arith.constant 0 : index
    %c0_40 = arith.constant 0 : index
    %c0_41 = arith.constant 0 : index
    %56 = vector.load %arg13[%c0_39, %c0_40, %c0_41] : memref<2x1x64xf32, #tpu.memory_space<vmem>>, vector<1x1x64xf32>
    %57 = vector.shape_cast %56 : vector<1x1x64xf32> to vector<1x64xf32>
    %cst_42 = arith.constant dense<0.000000e+00> : vector<8xf32>
    %58 = vector.multi_reduction <add>, %53, %cst_42 [1] : vector<8x64xf32> to vector<8xf32>
    %59 = vector.shape_cast %58 : vector<8xf32> to vector<8x1xf32>
    %cst_43 = arith.constant 6.400000e+01 : f32
    %60 = vector.broadcast %cst_43 : f32 to vector<8x1xf32>
    %61 = arith.divf %59, %60 : vector<8x1xf32>
    %62 = vector.broadcast %61 : vector<8x1xf32> to vector<8x64xf32>
    %63 = arith.subf %53, %62 : vector<8x64xf32>
    %64 = arith.mulf %63, %63 : vector<8x64xf32>
    %cst_44 = arith.constant dense<0.000000e+00> : vector<8xf32>
    %65 = vector.multi_reduction <add>, %64, %cst_44 [1] : vector<8x64xf32> to vector<8xf32>
    %66 = vector.shape_cast %65 : vector<8xf32> to vector<8x1xf32>
    %cst_45 = arith.constant 6.400000e+01 : f32
    %67 = vector.broadcast %cst_45 : f32 to vector<8x1xf32>
    %68 = arith.divf %66, %67 : vector<8x1xf32>
    %cst_46 = arith.constant 9.99999974E-6 : f32
    %69 = vector.broadcast %cst_46 : f32 to vector<8x1xf32>
    %70 = arith.addf %68, %69 : vector<8x1xf32>
    %71 = math.rsqrt %70 : vector<8x1xf32>
    %72 = vector.broadcast %71 : vector<8x1xf32> to vector<8x64xf32>
    %73 = arith.mulf %63, %72 : vector<8x64xf32>
    %74 = vector.broadcast %55 : vector<1x64xf32> to vector<8x64xf32>
    %75 = arith.mulf %73, %74 : vector<8x64xf32>
    %76 = vector.broadcast %57 : vector<1x64xf32> to vector<8x64xf32>
    %77 = arith.addf %75, %76 : vector<8x64xf32>
    %78 = arith.truncf %77 : vector<8x64xf32> to vector<8x64xbf16>
    %c1 = arith.constant 1 : index
    %c0_47 = arith.constant 0 : index
    %c0_48 = arith.constant 0 : index
    %79 = vector.load %arg6[%c1, %c0_47, %c0_48] : memref<2x64x128xbf16, #tpu.memory_space<vmem>>, vector<1x64x128xbf16>
    %80 = vector.shape_cast %79 : vector<1x64x128xbf16> to vector<64x128xbf16>
    %cst_49 = arith.constant dense<0.000000e+00> : vector<8x128xf32>
    %81 = tpu.matmul %30, %80, %cst_49 {dimension_numbers = #tpu.dot_dimension_numbers<[1], [0], [0], [1], [0, 0, 1, 1], [], []>} : vector<8x64xbf16>, vector<64x128xbf16>, vector<8x128xf32> -> vector<8x128xf32>
    %c1_50 = arith.constant 1 : index
    %c0_51 = arith.constant 0 : index
    %c0_52 = arith.constant 0 : index
    %82 = vector.load %arg7[%c1_50, %c0_51, %c0_52] : memref<2x1x128xf32, #tpu.memory_space<vmem>>, vector<1x1x128xf32>
    %83 = vector.shape_cast %82 : vector<1x1x128xf32> to vector<1x128xf32>
    %84 = vector.broadcast %83 : vector<1x128xf32> to vector<8x128xf32>
    %85 = arith.addf %81, %84 : vector<8x128xf32>
    %86 = arith.truncf %85 : vector<8x128xf32> to vector<8x128xbf16>
    %c1_53 = arith.constant 1 : index
    %c0_54 = arith.constant 0 : index
    %c0_55 = arith.constant 0 : index
    %87 = vector.load %arg8[%c1_53, %c0_54, %c0_55] : memref<2x128x128xbf16, #tpu.memory_space<vmem>>, vector<1x128x128xbf16>
    %88 = vector.shape_cast %87 : vector<1x128x128xbf16> to vector<128x128xbf16>
    %cst_56 = arith.constant dense<0.000000e+00> : vector<8x128xf32>
    %89 = tpu.matmul %86, %88, %cst_56 {dimension_numbers = #tpu.dot_dimension_numbers<[1], [0], [0], [1], [0, 0, 1, 1], [], []>} : vector<8x128xbf16>, vector<128x128xbf16>, vector<8x128xf32> -> vector<8x128xf32>
    %c1_57 = arith.constant 1 : index
    %c0_58 = arith.constant 0 : index
    %c0_59 = arith.constant 0 : index
    %90 = vector.load %arg9[%c1_57, %c0_58, %c0_59] : memref<2x1x128xf32, #tpu.memory_space<vmem>>, vector<1x1x128xf32>
    %91 = vector.shape_cast %90 : vector<1x1x128xf32> to vector<1x128xf32>
    %92 = vector.broadcast %91 : vector<1x128xf32> to vector<8x128xf32>
    %93 = arith.addf %89, %92 : vector<8x128xf32>
    %94 = arith.truncf %93 : vector<8x128xf32> to vector<8x128xbf16>
    %c1_60 = arith.constant 1 : index
    %c0_61 = arith.constant 0 : index
    %c0_62 = arith.constant 0 : index
    %95 = vector.load %arg10[%c1_60, %c0_61, %c0_62] : memref<2x128x64xbf16, #tpu.memory_space<vmem>>, vector<1x128x64xbf16>
    %96 = vector.shape_cast %95 : vector<1x128x64xbf16> to vector<128x64xbf16>
    %cst_63 = arith.constant dense<0.000000e+00> : vector<8x64xf32>
    %97 = tpu.matmul %94, %96, %cst_63 {dimension_numbers = #tpu.dot_dimension_numbers<[1], [0], [0], [1], [0, 0, 1, 1], [], []>} : vector<8x128xbf16>, vector<128x64xbf16>, vector<8x64xf32> -> vector<8x64xf32>
    %c1_64 = arith.constant 1 : index
    %c0_65 = arith.constant 0 : index
    %c0_66 = arith.constant 0 : index
    %98 = vector.load %arg11[%c1_64, %c0_65, %c0_66] : memref<2x1x64xf32, #tpu.memory_space<vmem>>, vector<1x1x64xf32>
    %99 = vector.shape_cast %98 : vector<1x1x64xf32> to vector<1x64xf32>
    %100 = vector.broadcast %99 : vector<1x64xf32> to vector<8x64xf32>
    %101 = arith.addf %97, %100 : vector<8x64xf32>
    %c1_67 = arith.constant 1 : index
    %c0_68 = arith.constant 0 : index
    %c0_69 = arith.constant 0 : index
    %102 = vector.load %arg12[%c1_67, %c0_68, %c0_69] : memref<2x1x64xf32, #tpu.memory_space<vmem>>, vector<1x1x64xf32>
    %103 = vector.shape_cast %102 : vector<1x1x64xf32> to vector<1x64xf32>
    %c1_70 = arith.constant 1 : index
    %c0_71 = arith.constant 0 : index
    %c0_72 = arith.constant 0 : index
    %104 = vector.load %arg13[%c1_70, %c0_71, %c0_72] : memref<2x1x64xf32, #tpu.memory_space<vmem>>, vector<1x1x64xf32>
    %105 = vector.shape_cast %104 : vector<1x1x64xf32> to vector<1x64xf32>
    %cst_73 = arith.constant dense<0.000000e+00> : vector<8xf32>
    %106 = vector.multi_reduction <add>, %101, %cst_73 [1] : vector<8x64xf32> to vector<8xf32>
    %107 = vector.shape_cast %106 : vector<8xf32> to vector<8x1xf32>
    %cst_74 = arith.constant 6.400000e+01 : f32
    %108 = vector.broadcast %cst_74 : f32 to vector<8x1xf32>
    %109 = arith.divf %107, %108 : vector<8x1xf32>
    %110 = vector.broadcast %109 : vector<8x1xf32> to vector<8x64xf32>
    %111 = arith.subf %101, %110 : vector<8x64xf32>
    %112 = arith.mulf %111, %111 : vector<8x64xf32>
    %cst_75 = arith.constant dense<0.000000e+00> : vector<8xf32>
    %113 = vector.multi_reduction <add>, %112, %cst_75 [1] : vector<8x64xf32> to vector<8xf32>
    %114 = vector.shape_cast %113 : vector<8xf32> to vector<8x1xf32>
    %cst_76 = arith.constant 6.400000e+01 : f32
    %115 = vector.broadcast %cst_76 : f32 to vector<8x1xf32>
    %116 = arith.divf %114, %115 : vector<8x1xf32>
    %cst_77 = arith.constant 9.99999974E-6 : f32
    %117 = vector.broadcast %cst_77 : f32 to vector<8x1xf32>
    %118 = arith.addf %116, %117 : vector<8x1xf32>
    %119 = math.rsqrt %118 : vector<8x1xf32>
    %120 = vector.broadcast %119 : vector<8x1xf32> to vector<8x64xf32>
    %121 = arith.mulf %111, %120 : vector<8x64xf32>
    %122 = vector.broadcast %103 : vector<1x64xf32> to vector<8x64xf32>
    %123 = arith.mulf %121, %122 : vector<8x64xf32>
    %124 = vector.broadcast %105 : vector<1x64xf32> to vector<8x64xf32>
    %125 = arith.addf %123, %124 : vector<8x64xf32>
    %126 = arith.truncf %125 : vector<8x64xf32> to vector<8x64xbf16>
    %cst_78 = arith.constant dense<0.000000e+00> : vector<8x8xf32>
    %127 = tpu.matmul %78, %126, %cst_78 {dimension_numbers = #tpu.dot_dimension_numbers<[1], [1], [0], [0], [0, 0, 1, 0], [], []>} : vector<8x64xbf16>, vector<8x64xbf16>, vector<8x8xf32> -> vector<8x8xf32>
    %c0_79 = arith.constant 0 : index
    %c0_80 = arith.constant 0 : index
    %c0_81 = arith.constant 0 : index
    %128 = vector.load %arg14[%c0_79, %c0_80, %c0_81] : memref<1x8x8xf32, #tpu.memory_space<vmem>>, vector<1x8x8xf32>
    %129 = vector.shape_cast %128 : vector<1x8x8xf32> to vector<8x8xf32>
    %130 = vector.shape_cast %127 : vector<8x8xf32> to vector<1x8x8xf32>
    tpu.vector_store %arg14[%c0_79, %c0_80, %c0_81], %130 {strides = array<i32>} : memref<1x8x8xf32, #tpu.memory_space<vmem>>, vector<1x8x8xf32>,
    return
  }
  func.func @transform_0(%arg0: i32) -> (i32, i32, i32) {
    %c0_i32 = arith.constant 0 : i32
    %c0_i32_0 = arith.constant 0 : i32
    %c0_i32_1 = arith.constant 0 : i32
    return %arg0, %c0_i32, %c0_i32_0 : i32, i32, i32
  }
  func.func @transform_1(%arg0: i32) -> (i32, i32) {
    %c0_i32 = arith.constant 0 : i32
    %c0_i32_0 = arith.constant 0 : i32
    %c0_i32_1 = arith.constant 0 : i32
    return %c0_i32, %c0_i32_0 : i32, i32
  }
  func.func @transform_2(%arg0: i32) -> (i32, i32) {
    %c0_i32 = arith.constant 0 : i32
    %c0_i32_0 = arith.constant 0 : i32
    %c0_i32_1 = arith.constant 0 : i32
    return %c0_i32, %c0_i32_0 : i32, i32
  }
  func.func @transform_3(%arg0: i32) -> (i32, i32) {
    %c0_i32 = arith.constant 0 : i32
    %c0_i32_0 = arith.constant 0 : i32
    %c0_i32_1 = arith.constant 0 : i32
    return %c0_i32, %c0_i32_0 : i32, i32
  }
  func.func @transform_4(%arg0: i32) -> (i32, i32) {
    %c0_i32 = arith.constant 0 : i32
    %c0_i32_0 = arith.constant 0 : i32
    %c0_i32_1 = arith.constant 0 : i32
    return %c0_i32, %c0_i32_0 : i32, i32
  }
  func.func @transform_5(%arg0: i32) -> (i32, i32, i32) {
    %c0_i32 = arith.constant 0 : i32
    %c0_i32_0 = arith.constant 0 : i32
    %c0_i32_1 = arith.constant 0 : i32
    %c0_i32_2 = arith.constant 0 : i32
    return %c0_i32, %c0_i32_0, %c0_i32_1 : i32, i32, i32
  }
  func.func @transform_6(%arg0: i32) -> (i32, i32, i32) {
    %c0_i32 = arith.constant 0 : i32
    %c0_i32_0 = arith.constant 0 : i32
    %c0_i32_1 = arith.constant 0 : i32
    %c0_i32_2 = arith.constant 0 : i32
    return %c0_i32, %c0_i32_0, %c0_i32_1 : i32, i32, i32
  }
  func.func @transform_7(%arg0: i32) -> (i32, i32, i32) {
    %c0_i32 = arith.constant 0 : i32
    %c0_i32_0 = arith.constant 0 : i32
    %c0_i32_1 = arith.constant 0 : i32
    %c0_i32_2 = arith.constant 0 : i32
    return %c0_i32, %c0_i32_0, %c0_i32_1 : i32, i32, i32
  }
  func.func @transform_8(%arg0: i32) -> (i32, i32, i32) {
    %c0_i32 = arith.constant 0 : i32
    %c0_i32_0 = arith.constant 0 : i32
    %c0_i32_1 = arith.constant 0 : i32
    %c0_i32_2 = arith.constant 0 : i32
    return %c0_i32, %c0_i32_0, %c0_i32_1 : i32, i32, i32
  }
  func.func @transform_9(%arg0: i32) -> (i32, i32, i32) {
    %c0_i32 = arith.constant 0 : i32
    %c0_i32_0 = arith.constant 0 : i32
    %c0_i32_1 = arith.constant 0 : i32
    %c0_i32_2 = arith.constant 0 : i32
    return %c0_i32, %c0_i32_0, %c0_i32_1 : i32, i32, i32
  }
  func.func @transform_10(%arg0: i32) -> (i32, i32, i32) {
    %c0_i32 = arith.constant 0 : i32
    %c0_i32_0 = arith.constant 0 : i32
    %c0_i32_1 = arith.constant 0 : i32
    %c0_i32_2 = arith.constant 0 : i32
    return %c0_i32, %c0_i32_0, %c0_i32_1 : i32, i32, i32
  }
  func.func @transform_11(%arg0: i32) -> (i32, i32, i32) {
    %c0_i32 = arith.constant 0 : i32
    %c0_i32_0 = arith.constant 0 : i32
    %c0_i32_1 = arith.constant 0 : i32
    %c0_i32_2 = arith.constant 0 : i32
    return %c0_i32, %c0_i32_0, %c0_i32_1 : i32, i32, i32
  }
  func.func @transform_12(%arg0: i32) -> (i32, i32, i32) {
    %c0_i32 = arith.constant 0 : i32
    %c0_i32_0 = arith.constant 0 : i32
    %c0_i32_1 = arith.constant 0 : i32
    %c0_i32_2 = arith.constant 0 : i32
    return %c0_i32, %c0_i32_0, %c0_i32_1 : i32, i32, i32
  }
  func.func @transform_13(%arg0: i32) -> (i32, i32, i32) {
    %c0_i32 = arith.constant 0 : i32
    %c0_i32_0 = arith.constant 0 : i32
    %c0_i32_1 = arith.constant 0 : i32
    return %arg0, %c0_i32, %c0_i32_0 : i32, i32, i32
  }
}

module attributes {stable_mosaic.version = 11 : i64} {
  func.func @_joints_proj_kernel(%arg0: i32, %arg1: memref<1x8x64xf32, #tpu.memory_space<vmem>>, %arg2: memref<64x64xbf16, #tpu.memory_space<vmem>>, %arg3: memref<1x64xf32, #tpu.memory_space<vmem>>, %arg4: memref<1x8x64xf32, #tpu.memory_space<vmem>>) attributes {dimension_semantics = [#tpu.dimension_semantics<parallel>], iteration_bounds = array<i64: 2>, scalar_prefetch = 0 : i64, scratch_operands = 0 : i64, tpu.core_type = #tpu.core_type<tc>, window_params = [{transform_indices = @transform_0, window_bounds = array<i64: 1, 8, 64>}, {pipeline_mode = #tpu.pipeline_mode<synchronous>, transform_indices = @transform_1, window_bounds = array<i64: 64, 64>}, {pipeline_mode = #tpu.pipeline_mode<synchronous>, transform_indices = @transform_2, window_bounds = array<i64: 1, 64>}, {transform_indices = @transform_3, window_bounds = array<i64: 1, 8, 64>}]} {
    %c0 = arith.constant 0 : index
    %c0_0 = arith.constant 0 : index
    %c0_1 = arith.constant 0 : index
    %0 = vector.load %arg1[%c0, %c0_0, %c0_1] : memref<1x8x64xf32, #tpu.memory_space<vmem>>, vector<1x8x64xf32>
    %1 = vector.shape_cast %0 : vector<1x8x64xf32> to vector<8x64xf32>
    %2 = arith.truncf %1 : vector<8x64xf32> to vector<8x64xbf16>
    %c0_2 = arith.constant 0 : index
    %c0_3 = arith.constant 0 : index
    %3 = vector.load %arg2[%c0_2, %c0_3] : memref<64x64xbf16, #tpu.memory_space<vmem>>, vector<64x64xbf16>
    %cst = arith.constant dense<0.000000e+00> : vector<8x64xf32>
    %4 = tpu.matmul %2, %3, %cst {dimension_numbers = #tpu.dot_dimension_numbers<[1], [0], [0], [1], [0, 0, 1, 1], [], []>} : vector<8x64xbf16>, vector<64x64xbf16>, vector<8x64xf32> -> vector<8x64xf32>
    %c0_4 = arith.constant 0 : index
    %c0_5 = arith.constant 0 : index
    %5 = vector.load %arg3[%c0_4, %c0_5] : memref<1x64xf32, #tpu.memory_space<vmem>>, vector<1x64xf32>
    %6 = vector.broadcast %5 : vector<1x64xf32> to vector<8x64xf32>
    %7 = arith.addf %4, %6 : vector<8x64xf32>
    %c0_6 = arith.constant 0 : index
    %c0_7 = arith.constant 0 : index
    %c0_8 = arith.constant 0 : index
    %8 = vector.load %arg4[%c0_6, %c0_7, %c0_8] : memref<1x8x64xf32, #tpu.memory_space<vmem>>, vector<1x8x64xf32>
    %9 = vector.shape_cast %8 : vector<1x8x64xf32> to vector<8x64xf32>
    %10 = vector.shape_cast %7 : vector<8x64xf32> to vector<1x8x64xf32>
    tpu.vector_store %arg4[%c0_6, %c0_7, %c0_8], %10 {strides = array<i32>} : memref<1x8x64xf32, #tpu.memory_space<vmem>>, vector<1x8x64xf32>,
    return
  }
  func.func @transform_0(%arg0: i32) -> (i32, i32, i32) {
    %c0_i32 = arith.constant 0 : i32
    %c0_i32_0 = arith.constant 0 : i32
    %c0_i32_1 = arith.constant 0 : i32
    return %arg0, %c0_i32, %c0_i32_0 : i32, i32, i32
  }
  func.func @transform_1(%arg0: i32) -> (i32, i32) {
    %c0_i32 = arith.constant 0 : i32
    %c0_i32_0 = arith.constant 0 : i32
    %c0_i32_1 = arith.constant 0 : i32
    return %c0_i32, %c0_i32_0 : i32, i32
  }
  func.func @transform_2(%arg0: i32) -> (i32, i32) {
    %c0_i32 = arith.constant 0 : i32
    %c0_i32_0 = arith.constant 0 : i32
    %c0_i32_1 = arith.constant 0 : i32
    return %c0_i32, %c0_i32_0 : i32, i32
  }
  func.func @transform_3(%arg0: i32) -> (i32, i32, i32) {
    %c0_i32 = arith.constant 0 : i32
    %c0_i32_0 = arith.constant 0 : i32
    %c0_i32_1 = arith.constant 0 : i32
    return %arg0, %c0_i32, %c0_i32_0 : i32, i32, i32
  }
}

module attributes {stable_mosaic.version = 11 : i64} {
  func.func @_head_tail_logits_kernel(%arg0: i32, %arg1: memref<1x8x64xf32, #tpu.memory_space<vmem>>, %arg2: memref<1x64xf32, #tpu.memory_space<vmem>>, %arg3: memref<1x64xf32, #tpu.memory_space<vmem>>, %arg4: memref<64x64xbf16, #tpu.memory_space<vmem>>, %arg5: memref<1x64xf32, #tpu.memory_space<vmem>>, %arg6: memref<2x64x128xbf16, #tpu.memory_space<vmem>>, %arg7: memref<2x1x128xf32, #tpu.memory_space<vmem>>, %arg8: memref<2x128x128xbf16, #tpu.memory_space<vmem>>, %arg9: memref<2x1x128xf32, #tpu.memory_space<vmem>>, %arg10: memref<2x128x64xbf16, #tpu.memory_space<vmem>>, %arg11: memref<2x1x64xf32, #tpu.memory_space<vmem>>, %arg12: memref<2x1x64xf32, #tpu.memory_space<vmem>>, %arg13: memref<2x1x64xf32, #tpu.memory_space<vmem>>, %arg14: memref<1x8x8xf32, #tpu.memory_space<vmem>>) attributes {dimension_semantics = [#tpu.dimension_semantics<parallel>], iteration_bounds = array<i64: 2>, scalar_prefetch = 0 : i64, scratch_operands = 0 : i64, tpu.core_type = #tpu.core_type<tc>, window_params = [{transform_indices = @transform_0, window_bounds = array<i64: 1, 8, 64>}, {pipeline_mode = #tpu.pipeline_mode<synchronous>, transform_indices = @transform_1, window_bounds = array<i64: 1, 64>}, {pipeline_mode = #tpu.pipeline_mode<synchronous>, transform_indices = @transform_2, window_bounds = array<i64: 1, 64>}, {pipeline_mode = #tpu.pipeline_mode<synchronous>, transform_indices = @transform_3, window_bounds = array<i64: 64, 64>}, {pipeline_mode = #tpu.pipeline_mode<synchronous>, transform_indices = @transform_4, window_bounds = array<i64: 1, 64>}, {pipeline_mode = #tpu.pipeline_mode<synchronous>, transform_indices = @transform_5, window_bounds = array<i64: 2, 64, 128>}, {pipeline_mode = #tpu.pipeline_mode<synchronous>, transform_indices = @transform_6, window_bounds = array<i64: 2, 1, 128>}, {pipeline_mode = #tpu.pipeline_mode<synchronous>, transform_indices = @transform_7, window_bounds = array<i64: 2, 128, 128>}, {pipeline_mode = #tpu.pipeline_mode<synchronous>, transform_indices = @transform_8, window_bounds = array<i64: 2, 1, 128>}, {pipeline_mode = #tpu.pipeline_mode<synchronous>, transform_indices = @transform_9, window_bounds = array<i64: 2, 128, 64>}, {pipeline_mode = #tpu.pipeline_mode<synchronous>, transform_indices = @transform_10, window_bounds = array<i64: 2, 1, 64>}, {pipeline_mode = #tpu.pipeline_mode<synchronous>, transform_indices = @transform_11, window_bounds = array<i64: 2, 1, 64>}, {pipeline_mode = #tpu.pipeline_mode<synchronous>, transform_indices = @transform_12, window_bounds = array<i64: 2, 1, 64>}, {transform_indices = @transform_13, window_bounds = array<i64: 1, 8, 8>}]} {
    %c0 = arith.constant 0 : index
    %c0_0 = arith.constant 0 : index
    %c0_1 = arith.constant 0 : index
    %0 = vector.load %arg1[%c0, %c0_0, %c0_1] : memref<1x8x64xf32, #tpu.memory_space<vmem>>, vector<1x8x64xf32>
    %1 = vector.shape_cast %0 : vector<1x8x64xf32> to vector<8x64xf32>
    %c0_2 = arith.constant 0 : index
    %c0_3 = arith.constant 0 : index
    %2 = vector.load %arg2[%c0_2, %c0_3] : memref<1x64xf32, #tpu.memory_space<vmem>>, vector<1x64xf32>
    %c0_4 = arith.constant 0 : index
    %c0_5 = arith.constant 0 : index
    %3 = vector.load %arg3[%c0_4, %c0_5] : memref<1x64xf32, #tpu.memory_space<vmem>>, vector<1x64xf32>
    %cst = arith.constant dense<0.000000e+00> : vector<8xf32>
    %4 = vector.multi_reduction <add>, %1, %cst [1] : vector<8x64xf32> to vector<8xf32>
    %5 = vector.shape_cast %4 : vector<8xf32> to vector<8x1xf32>
    %cst_6 = arith.constant 6.400000e+01 : f32
    %6 = vector.broadcast %cst_6 : f32 to vector<8x1xf32>
    %7 = arith.divf %5, %6 : vector<8x1xf32>
    %8 = vector.broadcast %7 : vector<8x1xf32> to vector<8x64xf32>
    %9 = arith.subf %1, %8 : vector<8x64xf32>
    %10 = arith.mulf %9, %9 : vector<8x64xf32>
    %cst_7 = arith.constant dense<0.000000e+00> : vector<8xf32>
    %11 = vector.multi_reduction <add>, %10, %cst_7 [1] : vector<8x64xf32> to vector<8xf32>
    %12 = vector.shape_cast %11 : vector<8xf32> to vector<8x1xf32>
    %cst_8 = arith.constant 6.400000e+01 : f32
    %13 = vector.broadcast %cst_8 : f32 to vector<8x1xf32>
    %14 = arith.divf %12, %13 : vector<8x1xf32>
    %cst_9 = arith.constant 9.99999974E-6 : f32
    %15 = vector.broadcast %cst_9 : f32 to vector<8x1xf32>
    %16 = arith.addf %14, %15 : vector<8x1xf32>
    %17 = math.rsqrt %16 : vector<8x1xf32>
    %18 = vector.broadcast %17 : vector<8x1xf32> to vector<8x64xf32>
    %19 = arith.mulf %9, %18 : vector<8x64xf32>
    %20 = vector.broadcast %2 : vector<1x64xf32> to vector<8x64xf32>
    %21 = arith.mulf %19, %20 : vector<8x64xf32>
    %22 = vector.broadcast %3 : vector<1x64xf32> to vector<8x64xf32>
    %23 = arith.addf %21, %22 : vector<8x64xf32>
    %24 = arith.truncf %23 : vector<8x64xf32> to vector<8x64xbf16>
    %c0_10 = arith.constant 0 : index
    %c0_11 = arith.constant 0 : index
    %25 = vector.load %arg4[%c0_10, %c0_11] : memref<64x64xbf16, #tpu.memory_space<vmem>>, vector<64x64xbf16>
    %cst_12 = arith.constant dense<0.000000e+00> : vector<8x64xf32>
    %26 = tpu.matmul %24, %25, %cst_12 {dimension_numbers = #tpu.dot_dimension_numbers<[1], [0], [0], [1], [0, 0, 1, 1], [], []>} : vector<8x64xbf16>, vector<64x64xbf16>, vector<8x64xf32> -> vector<8x64xf32>
    %c0_13 = arith.constant 0 : index
    %c0_14 = arith.constant 0 : index
    %27 = vector.load %arg5[%c0_13, %c0_14] : memref<1x64xf32, #tpu.memory_space<vmem>>, vector<1x64xf32>
    %28 = vector.broadcast %27 : vector<1x64xf32> to vector<8x64xf32>
    %29 = arith.addf %26, %28 : vector<8x64xf32>
    %30 = arith.truncf %29 : vector<8x64xf32> to vector<8x64xbf16>
    %c0_15 = arith.constant 0 : index
    %c0_16 = arith.constant 0 : index
    %c0_17 = arith.constant 0 : index
    %31 = vector.load %arg6[%c0_15, %c0_16, %c0_17] : memref<2x64x128xbf16, #tpu.memory_space<vmem>>, vector<1x64x128xbf16>
    %32 = vector.shape_cast %31 : vector<1x64x128xbf16> to vector<64x128xbf16>
    %cst_18 = arith.constant dense<0.000000e+00> : vector<8x128xf32>
    %33 = tpu.matmul %30, %32, %cst_18 {dimension_numbers = #tpu.dot_dimension_numbers<[1], [0], [0], [1], [0, 0, 1, 1], [], []>} : vector<8x64xbf16>, vector<64x128xbf16>, vector<8x128xf32> -> vector<8x128xf32>
    %c0_19 = arith.constant 0 : index
    %c0_20 = arith.constant 0 : index
    %c0_21 = arith.constant 0 : index
    %34 = vector.load %arg7[%c0_19, %c0_20, %c0_21] : memref<2x1x128xf32, #tpu.memory_space<vmem>>, vector<1x1x128xf32>
    %35 = vector.shape_cast %34 : vector<1x1x128xf32> to vector<1x128xf32>
    %36 = vector.broadcast %35 : vector<1x128xf32> to vector<8x128xf32>
    %37 = arith.addf %33, %36 : vector<8x128xf32>
    %38 = arith.truncf %37 : vector<8x128xf32> to vector<8x128xbf16>
    %c0_22 = arith.constant 0 : index
    %c0_23 = arith.constant 0 : index
    %c0_24 = arith.constant 0 : index
    %39 = vector.load %arg8[%c0_22, %c0_23, %c0_24] : memref<2x128x128xbf16, #tpu.memory_space<vmem>>, vector<1x128x128xbf16>
    %40 = vector.shape_cast %39 : vector<1x128x128xbf16> to vector<128x128xbf16>
    %cst_25 = arith.constant dense<0.000000e+00> : vector<8x128xf32>
    %41 = tpu.matmul %38, %40, %cst_25 {dimension_numbers = #tpu.dot_dimension_numbers<[1], [0], [0], [1], [0, 0, 1, 1], [], []>} : vector<8x128xbf16>, vector<128x128xbf16>, vector<8x128xf32> -> vector<8x128xf32>
    %c0_26 = arith.constant 0 : index
    %c0_27 = arith.constant 0 : index
    %c0_28 = arith.constant 0 : index
    %42 = vector.load %arg9[%c0_26, %c0_27, %c0_28] : memref<2x1x128xf32, #tpu.memory_space<vmem>>, vector<1x1x128xf32>
    %43 = vector.shape_cast %42 : vector<1x1x128xf32> to vector<1x128xf32>
    %44 = vector.broadcast %43 : vector<1x128xf32> to vector<8x128xf32>
    %45 = arith.addf %41, %44 : vector<8x128xf32>
    %46 = arith.truncf %45 : vector<8x128xf32> to vector<8x128xbf16>
    %c0_29 = arith.constant 0 : index
    %c0_30 = arith.constant 0 : index
    %c0_31 = arith.constant 0 : index
    %47 = vector.load %arg10[%c0_29, %c0_30, %c0_31] : memref<2x128x64xbf16, #tpu.memory_space<vmem>>, vector<1x128x64xbf16>
    %48 = vector.shape_cast %47 : vector<1x128x64xbf16> to vector<128x64xbf16>
    %cst_32 = arith.constant dense<0.000000e+00> : vector<8x64xf32>
    %49 = tpu.matmul %46, %48, %cst_32 {dimension_numbers = #tpu.dot_dimension_numbers<[1], [0], [0], [1], [0, 0, 1, 1], [], []>} : vector<8x128xbf16>, vector<128x64xbf16>, vector<8x64xf32> -> vector<8x64xf32>
    %c0_33 = arith.constant 0 : index
    %c0_34 = arith.constant 0 : index
    %c0_35 = arith.constant 0 : index
    %50 = vector.load %arg11[%c0_33, %c0_34, %c0_35] : memref<2x1x64xf32, #tpu.memory_space<vmem>>, vector<1x1x64xf32>
    %51 = vector.shape_cast %50 : vector<1x1x64xf32> to vector<1x64xf32>
    %52 = vector.broadcast %51 : vector<1x64xf32> to vector<8x64xf32>
    %53 = arith.addf %49, %52 : vector<8x64xf32>
    %c0_36 = arith.constant 0 : index
    %c0_37 = arith.constant 0 : index
    %c0_38 = arith.constant 0 : index
    %54 = vector.load %arg12[%c0_36, %c0_37, %c0_38] : memref<2x1x64xf32, #tpu.memory_space<vmem>>, vector<1x1x64xf32>
    %55 = vector.shape_cast %54 : vector<1x1x64xf32> to vector<1x64xf32>
    %c0_39 = arith.constant 0 : index
    %c0_40 = arith.constant 0 : index
    %c0_41 = arith.constant 0 : index
    %56 = vector.load %arg13[%c0_39, %c0_40, %c0_41] : memref<2x1x64xf32, #tpu.memory_space<vmem>>, vector<1x1x64xf32>
    %57 = vector.shape_cast %56 : vector<1x1x64xf32> to vector<1x64xf32>
    %cst_42 = arith.constant dense<0.000000e+00> : vector<8xf32>
    %58 = vector.multi_reduction <add>, %53, %cst_42 [1] : vector<8x64xf32> to vector<8xf32>
    %59 = vector.shape_cast %58 : vector<8xf32> to vector<8x1xf32>
    %cst_43 = arith.constant 6.400000e+01 : f32
    %60 = vector.broadcast %cst_43 : f32 to vector<8x1xf32>
    %61 = arith.divf %59, %60 : vector<8x1xf32>
    %62 = vector.broadcast %61 : vector<8x1xf32> to vector<8x64xf32>
    %63 = arith.subf %53, %62 : vector<8x64xf32>
    %64 = arith.mulf %63, %63 : vector<8x64xf32>
    %cst_44 = arith.constant dense<0.000000e+00> : vector<8xf32>
    %65 = vector.multi_reduction <add>, %64, %cst_44 [1] : vector<8x64xf32> to vector<8xf32>
    %66 = vector.shape_cast %65 : vector<8xf32> to vector<8x1xf32>
    %cst_45 = arith.constant 6.400000e+01 : f32
    %67 = vector.broadcast %cst_45 : f32 to vector<8x1xf32>
    %68 = arith.divf %66, %67 : vector<8x1xf32>
    %cst_46 = arith.constant 9.99999974E-6 : f32
    %69 = vector.broadcast %cst_46 : f32 to vector<8x1xf32>
    %70 = arith.addf %68, %69 : vector<8x1xf32>
    %71 = math.rsqrt %70 : vector<8x1xf32>
    %72 = vector.broadcast %71 : vector<8x1xf32> to vector<8x64xf32>
    %73 = arith.mulf %63, %72 : vector<8x64xf32>
    %74 = vector.broadcast %55 : vector<1x64xf32> to vector<8x64xf32>
    %75 = arith.mulf %73, %74 : vector<8x64xf32>
    %76 = vector.broadcast %57 : vector<1x64xf32> to vector<8x64xf32>
    %77 = arith.addf %75, %76 : vector<8x64xf32>
    %78 = arith.truncf %77 : vector<8x64xf32> to vector<8x64xbf16>
    %c1 = arith.constant 1 : index
    %c0_47 = arith.constant 0 : index
    %c0_48 = arith.constant 0 : index
    %79 = vector.load %arg6[%c1, %c0_47, %c0_48] : memref<2x64x128xbf16, #tpu.memory_space<vmem>>, vector<1x64x128xbf16>
    %80 = vector.shape_cast %79 : vector<1x64x128xbf16> to vector<64x128xbf16>
    %cst_49 = arith.constant dense<0.000000e+00> : vector<8x128xf32>
    %81 = tpu.matmul %30, %80, %cst_49 {dimension_numbers = #tpu.dot_dimension_numbers<[1], [0], [0], [1], [0, 0, 1, 1], [], []>} : vector<8x64xbf16>, vector<64x128xbf16>, vector<8x128xf32> -> vector<8x128xf32>
    %c1_50 = arith.constant 1 : index
    %c0_51 = arith.constant 0 : index
    %c0_52 = arith.constant 0 : index
    %82 = vector.load %arg7[%c1_50, %c0_51, %c0_52] : memref<2x1x128xf32, #tpu.memory_space<vmem>>, vector<1x1x128xf32>
    %83 = vector.shape_cast %82 : vector<1x1x128xf32> to vector<1x128xf32>
    %84 = vector.broadcast %83 : vector<1x128xf32> to vector<8x128xf32>
    %85 = arith.addf %81, %84 : vector<8x128xf32>
    %86 = arith.truncf %85 : vector<8x128xf32> to vector<8x128xbf16>
    %c1_53 = arith.constant 1 : index
    %c0_54 = arith.constant 0 : index
    %c0_55 = arith.constant 0 : index
    %87 = vector.load %arg8[%c1_53, %c0_54, %c0_55] : memref<2x128x128xbf16, #tpu.memory_space<vmem>>, vector<1x128x128xbf16>
    %88 = vector.shape_cast %87 : vector<1x128x128xbf16> to vector<128x128xbf16>
    %cst_56 = arith.constant dense<0.000000e+00> : vector<8x128xf32>
    %89 = tpu.matmul %86, %88, %cst_56 {dimension_numbers = #tpu.dot_dimension_numbers<[1], [0], [0], [1], [0, 0, 1, 1], [], []>} : vector<8x128xbf16>, vector<128x128xbf16>, vector<8x128xf32> -> vector<8x128xf32>
    %c1_57 = arith.constant 1 : index
    %c0_58 = arith.constant 0 : index
    %c0_59 = arith.constant 0 : index
    %90 = vector.load %arg9[%c1_57, %c0_58, %c0_59] : memref<2x1x128xf32, #tpu.memory_space<vmem>>, vector<1x1x128xf32>
    %91 = vector.shape_cast %90 : vector<1x1x128xf32> to vector<1x128xf32>
    %92 = vector.broadcast %91 : vector<1x128xf32> to vector<8x128xf32>
    %93 = arith.addf %89, %92 : vector<8x128xf32>
    %94 = arith.truncf %93 : vector<8x128xf32> to vector<8x128xbf16>
    %c1_60 = arith.constant 1 : index
    %c0_61 = arith.constant 0 : index
    %c0_62 = arith.constant 0 : index
    %95 = vector.load %arg10[%c1_60, %c0_61, %c0_62] : memref<2x128x64xbf16, #tpu.memory_space<vmem>>, vector<1x128x64xbf16>
    %96 = vector.shape_cast %95 : vector<1x128x64xbf16> to vector<128x64xbf16>
    %cst_63 = arith.constant dense<0.000000e+00> : vector<8x64xf32>
    %97 = tpu.matmul %94, %96, %cst_63 {dimension_numbers = #tpu.dot_dimension_numbers<[1], [0], [0], [1], [0, 0, 1, 1], [], []>} : vector<8x128xbf16>, vector<128x64xbf16>, vector<8x64xf32> -> vector<8x64xf32>
    %c1_64 = arith.constant 1 : index
    %c0_65 = arith.constant 0 : index
    %c0_66 = arith.constant 0 : index
    %98 = vector.load %arg11[%c1_64, %c0_65, %c0_66] : memref<2x1x64xf32, #tpu.memory_space<vmem>>, vector<1x1x64xf32>
    %99 = vector.shape_cast %98 : vector<1x1x64xf32> to vector<1x64xf32>
    %100 = vector.broadcast %99 : vector<1x64xf32> to vector<8x64xf32>
    %101 = arith.addf %97, %100 : vector<8x64xf32>
    %c1_67 = arith.constant 1 : index
    %c0_68 = arith.constant 0 : index
    %c0_69 = arith.constant 0 : index
    %102 = vector.load %arg12[%c1_67, %c0_68, %c0_69] : memref<2x1x64xf32, #tpu.memory_space<vmem>>, vector<1x1x64xf32>
    %103 = vector.shape_cast %102 : vector<1x1x64xf32> to vector<1x64xf32>
    %c1_70 = arith.constant 1 : index
    %c0_71 = arith.constant 0 : index
    %c0_72 = arith.constant 0 : index
    %104 = vector.load %arg13[%c1_70, %c0_71, %c0_72] : memref<2x1x64xf32, #tpu.memory_space<vmem>>, vector<1x1x64xf32>
    %105 = vector.shape_cast %104 : vector<1x1x64xf32> to vector<1x64xf32>
    %cst_73 = arith.constant dense<0.000000e+00> : vector<8xf32>
    %106 = vector.multi_reduction <add>, %101, %cst_73 [1] : vector<8x64xf32> to vector<8xf32>
    %107 = vector.shape_cast %106 : vector<8xf32> to vector<8x1xf32>
    %cst_74 = arith.constant 6.400000e+01 : f32
    %108 = vector.broadcast %cst_74 : f32 to vector<8x1xf32>
    %109 = arith.divf %107, %108 : vector<8x1xf32>
    %110 = vector.broadcast %109 : vector<8x1xf32> to vector<8x64xf32>
    %111 = arith.subf %101, %110 : vector<8x64xf32>
    %112 = arith.mulf %111, %111 : vector<8x64xf32>
    %cst_75 = arith.constant dense<0.000000e+00> : vector<8xf32>
    %113 = vector.multi_reduction <add>, %112, %cst_75 [1] : vector<8x64xf32> to vector<8xf32>
    %114 = vector.shape_cast %113 : vector<8xf32> to vector<8x1xf32>
    %cst_76 = arith.constant 6.400000e+01 : f32
    %115 = vector.broadcast %cst_76 : f32 to vector<8x1xf32>
    %116 = arith.divf %114, %115 : vector<8x1xf32>
    %cst_77 = arith.constant 9.99999974E-6 : f32
    %117 = vector.broadcast %cst_77 : f32 to vector<8x1xf32>
    %118 = arith.addf %116, %117 : vector<8x1xf32>
    %119 = math.rsqrt %118 : vector<8x1xf32>
    %120 = vector.broadcast %119 : vector<8x1xf32> to vector<8x64xf32>
    %121 = arith.mulf %111, %120 : vector<8x64xf32>
    %122 = vector.broadcast %103 : vector<1x64xf32> to vector<8x64xf32>
    %123 = arith.mulf %121, %122 : vector<8x64xf32>
    %124 = vector.broadcast %105 : vector<1x64xf32> to vector<8x64xf32>
    %125 = arith.addf %123, %124 : vector<8x64xf32>
    %126 = arith.truncf %125 : vector<8x64xf32> to vector<8x64xbf16>
    %cst_78 = arith.constant dense<0.000000e+00> : vector<8x8xf32>
    %127 = tpu.matmul %78, %126, %cst_78 {dimension_numbers = #tpu.dot_dimension_numbers<[1], [1], [0], [0], [0, 0, 1, 0], [], []>} : vector<8x64xbf16>, vector<8x64xbf16>, vector<8x8xf32> -> vector<8x8xf32>
    %c0_79 = arith.constant 0 : index
    %c0_80 = arith.constant 0 : index
    %c0_81 = arith.constant 0 : index
    %128 = vector.load %arg14[%c0_79, %c0_80, %c0_81] : memref<1x8x8xf32, #tpu.memory_space<vmem>>, vector<1x8x8xf32>
    %129 = vector.shape_cast %128 : vector<1x8x8xf32> to vector<8x8xf32>
    %130 = vector.shape_cast %127 : vector<8x8xf32> to vector<1x8x8xf32>
    tpu.vector_store %arg14[%c0_79, %c0_80, %c0_81], %130 {strides = array<i32>} : memref<1x8x8xf32, #tpu.memory_space<vmem>>, vector<1x8x8xf32>,
    return
  }
  func.func @transform_0(%arg0: i32) -> (i32, i32, i32) {
    %c0_i32 = arith.constant 0 : i32
    %c0_i32_0 = arith.constant 0 : i32
    %c0_i32_1 = arith.constant 0 : i32
    return %arg0, %c0_i32, %c0_i32_0 : i32, i32, i32
  }
  func.func @transform_1(%arg0: i32) -> (i32, i32) {
    %c0_i32 = arith.constant 0 : i32
    %c0_i32_0 = arith.constant 0 : i32
    %c0_i32_1 = arith.constant 0 : i32
    return %c0_i32, %c0_i32_0 : i32, i32
  }
  func.func @transform_2(%arg0: i32) -> (i32, i32) {
    %c0_i32 = arith.constant 0 : i32
    %c0_i32_0 = arith.constant 0 : i32
    %c0_i32_1 = arith.constant 0 : i32
    return %c0_i32, %c0_i32_0 : i32, i32
  }
  func.func @transform_3(%arg0: i32) -> (i32, i32) {
    %c0_i32 = arith.constant 0 : i32
    %c0_i32_0 = arith.constant 0 : i32
    %c0_i32_1 = arith.constant 0 : i32
    return %c0_i32, %c0_i32_0 : i32, i32
  }
  func.func @transform_4(%arg0: i32) -> (i32, i32) {
    %c0_i32 = arith.constant 0 : i32
    %c0_i32_0 = arith.constant 0 : i32
    %c0_i32_1 = arith.constant 0 : i32
    return %c0_i32, %c0_i32_0 : i32, i32
  }
  func.func @transform_5(%arg0: i32) -> (i32, i32, i32) {
    %c0_i32 = arith.constant 0 : i32
    %c0_i32_0 = arith.constant 0 : i32
    %c0_i32_1 = arith.constant 0 : i32
    %c0_i32_2 = arith.constant 0 : i32
    return %c0_i32, %c0_i32_0, %c0_i32_1 : i32, i32, i32
  }
  func.func @transform_6(%arg0: i32) -> (i32, i32, i32) {
    %c0_i32 = arith.constant 0 : i32
    %c0_i32_0 = arith.constant 0 : i32
    %c0_i32_1 = arith.constant 0 : i32
    %c0_i32_2 = arith.constant 0 : i32
    return %c0_i32, %c0_i32_0, %c0_i32_1 : i32, i32, i32
  }
  func.func @transform_7(%arg0: i32) -> (i32, i32, i32) {
    %c0_i32 = arith.constant 0 : i32
    %c0_i32_0 = arith.constant 0 : i32
    %c0_i32_1 = arith.constant 0 : i32
    %c0_i32_2 = arith.constant 0 : i32
    return %c0_i32, %c0_i32_0, %c0_i32_1 : i32, i32, i32
  }
  func.func @transform_8(%arg0: i32) -> (i32, i32, i32) {
    %c0_i32 = arith.constant 0 : i32
    %c0_i32_0 = arith.constant 0 : i32
    %c0_i32_1 = arith.constant 0 : i32
    %c0_i32_2 = arith.constant 0 : i32
    return %c0_i32, %c0_i32_0, %c0_i32_1 : i32, i32, i32
  }
  func.func @transform_9(%arg0: i32) -> (i32, i32, i32) {
    %c0_i32 = arith.constant 0 : i32
    %c0_i32_0 = arith.constant 0 : i32
    %c0_i32_1 = arith.constant 0 : i32
    %c0_i32_2 = arith.constant 0 : i32
    return %c0_i32, %c0_i32_0, %c0_i32_1 : i32, i32, i32
  }
  func.func @transform_10(%arg0: i32) -> (i32, i32, i32) {
    %c0_i32 = arith.constant 0 : i32
    %c0_i32_0 = arith.constant 0 : i32
    %c0_i32_1 = arith.constant 0 : i32
    %c0_i32_2 = arith.constant 0 : i32
    return %c0_i32, %c0_i32_0, %c0_i32_1 : i32, i32, i32
  }
  func.func @transform_11(%arg0: i32) -> (i32, i32, i32) {
    %c0_i32 = arith.constant 0 : i32
    %c0_i32_0 = arith.constant 0 : i32
    %c0_i32_1 = arith.constant 0 : i32
    %c0_i32_2 = arith.constant 0 : i32
    return %c0_i32, %c0_i32_0, %c0_i32_1 : i32, i32, i32
  }
  func.func @transform_12(%arg0: i32) -> (i32, i32, i32) {
    %c0_i32 = arith.constant 0 : i32
    %c0_i32_0 = arith.constant 0 : i32
    %c0_i32_1 = arith.constant 0 : i32
    %c0_i32_2 = arith.constant 0 : i32
    return %c0_i32, %c0_i32_0, %c0_i32_1 : i32, i32, i32
  }
  func.func @transform_13(%arg0: i32) -> (i32, i32, i32) {
    %c0_i32 = arith.constant 0 : i32
    %c0_i32_0 = arith.constant 0 : i32
    %c0_i32_1 = arith.constant 0 : i32
    return %arg0, %c0_i32, %c0_i32_0 : i32, i32, i32
  }
}

module attributes {stable_mosaic.version = 11 : i64} {
  func.func @_layer_kernel(%arg0: i32, %arg1: memref<1x24x64xf32, #tpu.memory_space<vmem>>, %arg2: memref<1x1x24xf32, #tpu.memory_space<vmem>>, %arg3: memref<1x64xf32, #tpu.memory_space<vmem>>, %arg4: memref<1x64xf32, #tpu.memory_space<vmem>>, %arg5: memref<64x192xbf16, #tpu.memory_space<vmem>>, %arg6: memref<1x192xf32, #tpu.memory_space<vmem>>, %arg7: memref<64x64xbf16, #tpu.memory_space<vmem>>, %arg8: memref<1x64xf32, #tpu.memory_space<vmem>>, %arg9: memref<1x64xf32, #tpu.memory_space<vmem>>, %arg10: memref<1x64xf32, #tpu.memory_space<vmem>>, %arg11: memref<64x256xbf16, #tpu.memory_space<vmem>>, %arg12: memref<1x256xf32, #tpu.memory_space<vmem>>, %arg13: memref<256x64xbf16, #tpu.memory_space<vmem>>, %arg14: memref<1x64xf32, #tpu.memory_space<vmem>>, %arg15: memref<1x24x64xf32, #tpu.memory_space<vmem>>) attributes {dimension_semantics = [#tpu.dimension_semantics<parallel>], iteration_bounds = array<i64: 2>, scalar_prefetch = 0 : i64, scratch_operands = 0 : i64, tpu.core_type = #tpu.core_type<tc>, window_params = [{transform_indices = @transform_0, window_bounds = array<i64: 1, 24, 64>}, {transform_indices = @transform_1, window_bounds = array<i64: 1, 1, 24>}, {pipeline_mode = #tpu.pipeline_mode<synchronous>, transform_indices = @transform_2, window_bounds = array<i64: 1, 64>}, {pipeline_mode = #tpu.pipeline_mode<synchronous>, transform_indices = @transform_3, window_bounds = array<i64: 1, 64>}, {pipeline_mode = #tpu.pipeline_mode<synchronous>, transform_indices = @transform_4, window_bounds = array<i64: 64, 192>}, {pipeline_mode = #tpu.pipeline_mode<synchronous>, transform_indices = @transform_5, window_bounds = array<i64: 1, 192>}, {pipeline_mode = #tpu.pipeline_mode<synchronous>, transform_indices = @transform_6, window_bounds = array<i64: 64, 64>}, {pipeline_mode = #tpu.pipeline_mode<synchronous>, transform_indices = @transform_7, window_bounds = array<i64: 1, 64>}, {pipeline_mode = #tpu.pipeline_mode<synchronous>, transform_indices = @transform_8, window_bounds = array<i64: 1, 64>}, {pipeline_mode = #tpu.pipeline_mode<synchronous>, transform_indices = @transform_9, window_bounds = array<i64: 1, 64>}, {pipeline_mode = #tpu.pipeline_mode<synchronous>, transform_indices = @transform_10, window_bounds = array<i64: 64, 256>}, {pipeline_mode = #tpu.pipeline_mode<synchronous>, transform_indices = @transform_11, window_bounds = array<i64: 1, 256>}, {pipeline_mode = #tpu.pipeline_mode<synchronous>, transform_indices = @transform_12, window_bounds = array<i64: 256, 64>}, {pipeline_mode = #tpu.pipeline_mode<synchronous>, transform_indices = @transform_13, window_bounds = array<i64: 1, 64>}, {transform_indices = @transform_14, window_bounds = array<i64: 1, 24, 64>}]} {
    %c0 = arith.constant 0 : index
    %c0_0 = arith.constant 0 : index
    %c0_1 = arith.constant 0 : index
    %0 = vector.load %arg1[%c0, %c0_0, %c0_1] : memref<1x24x64xf32, #tpu.memory_space<vmem>>, vector<1x24x64xf32>
    %1 = vector.shape_cast %0 : vector<1x24x64xf32> to vector<24x64xf32>
    %c0_2 = arith.constant 0 : index
    %c0_3 = arith.constant 0 : index
    %2 = vector.load %arg3[%c0_2, %c0_3] : memref<1x64xf32, #tpu.memory_space<vmem>>, vector<1x64xf32>
    %c0_4 = arith.constant 0 : index
    %c0_5 = arith.constant 0 : index
    %3 = vector.load %arg4[%c0_4, %c0_5] : memref<1x64xf32, #tpu.memory_space<vmem>>, vector<1x64xf32>
    %cst = arith.constant dense<0.000000e+00> : vector<24xf32>
    %4 = vector.multi_reduction <add>, %1, %cst [1] : vector<24x64xf32> to vector<24xf32>
    %5 = vector.shape_cast %4 : vector<24xf32> to vector<24x1xf32>
    %cst_6 = arith.constant 6.400000e+01 : f32
    %6 = vector.broadcast %cst_6 : f32 to vector<24x1xf32>
    %7 = arith.divf %5, %6 : vector<24x1xf32>
    %8 = vector.broadcast %7 : vector<24x1xf32> to vector<24x64xf32>
    %9 = arith.subf %1, %8 : vector<24x64xf32>
    %10 = arith.mulf %9, %9 : vector<24x64xf32>
    %cst_7 = arith.constant dense<0.000000e+00> : vector<24xf32>
    %11 = vector.multi_reduction <add>, %10, %cst_7 [1] : vector<24x64xf32> to vector<24xf32>
    %12 = vector.shape_cast %11 : vector<24xf32> to vector<24x1xf32>
    %cst_8 = arith.constant 6.400000e+01 : f32
    %13 = vector.broadcast %cst_8 : f32 to vector<24x1xf32>
    %14 = arith.divf %12, %13 : vector<24x1xf32>
    %cst_9 = arith.constant 9.99999974E-6 : f32
    %15 = vector.broadcast %cst_9 : f32 to vector<24x1xf32>
    %16 = arith.addf %14, %15 : vector<24x1xf32>
    %17 = math.rsqrt %16 : vector<24x1xf32>
    %18 = vector.broadcast %17 : vector<24x1xf32> to vector<24x64xf32>
    %19 = arith.mulf %9, %18 : vector<24x64xf32>
    %20 = vector.broadcast %2 : vector<1x64xf32> to vector<24x64xf32>
    %21 = arith.mulf %19, %20 : vector<24x64xf32>
    %22 = vector.broadcast %3 : vector<1x64xf32> to vector<24x64xf32>
    %23 = arith.addf %21, %22 : vector<24x64xf32>
    %24 = arith.truncf %23 : vector<24x64xf32> to vector<24x64xbf16>
    %c0_10 = arith.constant 0 : index
    %c0_11 = arith.constant 0 : index
    %25 = vector.load %arg5[%c0_10, %c0_11] : memref<64x192xbf16, #tpu.memory_space<vmem>>, vector<64x192xbf16>
    %cst_12 = arith.constant dense<0.000000e+00> : vector<24x192xf32>
    %26 = tpu.matmul %24, %25, %cst_12 {dimension_numbers = #tpu.dot_dimension_numbers<[1], [0], [0], [1], [0, 0, 1, 1], [], []>} : vector<24x64xbf16>, vector<64x192xbf16>, vector<24x192xf32> -> vector<24x192xf32>
    %c0_13 = arith.constant 0 : index
    %c0_14 = arith.constant 0 : index
    %27 = vector.load %arg6[%c0_13, %c0_14] : memref<1x192xf32, #tpu.memory_space<vmem>>, vector<1x192xf32>
    %28 = vector.broadcast %27 : vector<1x192xf32> to vector<24x192xf32>
    %29 = arith.addf %26, %28 : vector<24x192xf32>
    %c0_15 = arith.constant 0 : index
    %c0_16 = arith.constant 0 : index
    %c0_17 = arith.constant 0 : index
    %30 = vector.load %arg2[%c0_15, %c0_16, %c0_17] : memref<1x1x24xf32, #tpu.memory_space<vmem>>, vector<1x1x24xf32>
    %31 = vector.shape_cast %30 : vector<1x1x24xf32> to vector<1x24xf32>
    %cst_18 = arith.constant 0.000000e+00 : f32
    %32 = vector.broadcast %cst_18 : f32 to vector<1x24xf32>
    %33 = arith.cmpf oeq, %31, %32 : vector<1x24xf32>
    %cst_19 = arith.constant -1.000000e+30 : f32
    %cst_20 = arith.constant 0.000000e+00 : f32
    %34 = vector.broadcast %cst_19 : f32 to vector<1x24xf32>
    %35 = vector.broadcast %cst_20 : f32 to vector<1x24xf32>
    %36 = arith.select %33, %34, %35 : vector<1x24xi1>, vector<1x24xf32>
    %cst_21 = arith.constant 0.000000e+00 : f32
    %37 = vector.broadcast %cst_21 : f32 to vector<24x64xf32>
    %38 = vector.extract_strided_slice %29 {offsets = [0, 0], sizes = [24, 16], strides = [1, 1]} : vector<24x192xf32> to vector<24x16xf32>
    %39 = arith.truncf %38 : vector<24x16xf32> to vector<24x16xbf16>
    %40 = vector.extract_strided_slice %29 {offsets = [0, 64], sizes = [24, 16], strides = [1, 1]} : vector<24x192xf32> to vector<24x16xf32>
    %41 = arith.truncf %40 : vector<24x16xf32> to vector<24x16xbf16>
    %42 = vector.extract_strided_slice %29 {offsets = [0, 128], sizes = [24, 16], strides = [1, 1]} : vector<24x192xf32> to vector<24x16xf32>
    %43 = arith.truncf %42 : vector<24x16xf32> to vector<24x16xbf16>
    %cst_22 = arith.constant dense<0.000000e+00> : vector<24x24xf32>
    %44 = tpu.matmul %39, %41, %cst_22 {dimension_numbers = #tpu.dot_dimension_numbers<[1], [1], [0], [0], [0, 0, 1, 0], [], []>} : vector<24x16xbf16>, vector<24x16xbf16>, vector<24x24xf32> -> vector<24x24xf32>
    %45 = vector.broadcast %36 : vector<1x24xf32> to vector<24x24xf32>
    %46 = arith.addf %44, %45 : vector<24x24xf32>
    %cst_23 = arith.constant dense<0xFF800000> : vector<24xf32>
    %47 = vector.multi_reduction <maximumf>, %46, %cst_23 [1] : vector<24x24xf32> to vector<24xf32>
    %48 = vector.shape_cast %47 : vector<24xf32> to vector<24x1xf32>
    %49 = vector.broadcast %48 : vector<24x1xf32> to vector<24x24xf32>
    %50 = arith.subf %46, %49 : vector<24x24xf32>
    %51 = math.exp %50 : vector<24x24xf32>
    %cst_24 = arith.constant dense<0.000000e+00> : vector<24xf32>
    %52 = vector.multi_reduction <add>, %51, %cst_24 [1] : vector<24x24xf32> to vector<24xf32>
    %53 = vector.shape_cast %52 : vector<24xf32> to vector<24x1xf32>
    %54 = tpu.reciprocal %53 {approx = true} : vector<24x1xf32> -> vector<24x1xf32>
    %55 = vector.broadcast %54 : vector<24x1xf32> to vector<24x24xf32>
    %56 = arith.mulf %51, %55 : vector<24x24xf32>
    %57 = arith.truncf %56 : vector<24x24xf32> to vector<24x24xbf16>
    %cst_25 = arith.constant dense<0.000000e+00> : vector<24x16xf32>
    %58 = tpu.matmul %57, %43, %cst_25 {dimension_numbers = #tpu.dot_dimension_numbers<[1], [0], [0], [1], [0, 0, 1, 1], [], []>} : vector<24x24xbf16>, vector<24x16xbf16>, vector<24x16xf32> -> vector<24x16xf32>
    %59 = arith.truncf %58 : vector<24x16xf32> to vector<24x16xbf16>
    %c0_26 = arith.constant 0 : index
    %c0_27 = arith.constant 0 : index
    %60 = vector.load %arg7[%c0_26, %c0_27] : memref<64x64xbf16, #tpu.memory_space<vmem>>, vector<16x64xbf16>
    %cst_28 = arith.constant dense<0.000000e+00> : vector<24x64xf32>
    %61 = tpu.matmul %59, %60, %cst_28 {dimension_numbers = #tpu.dot_dimension_numbers<[1], [0], [0], [1], [0, 0, 1, 1], [], []>} : vector<24x16xbf16>, vector<16x64xbf16>, vector<24x64xf32> -> vector<24x64xf32>
    %62 = arith.addf %37, %61 : vector<24x64xf32>
    %63 = vector.extract_strided_slice %29 {offsets = [0, 16], sizes = [24, 16], strides = [1, 1]} : vector<24x192xf32> to vector<24x16xf32>
    %64 = arith.truncf %63 : vector<24x16xf32> to vector<24x16xbf16>
    %65 = vector.extract_strided_slice %29 {offsets = [0, 80], sizes = [24, 16], strides = [1, 1]} : vector<24x192xf32> to vector<24x16xf32>
    %66 = arith.truncf %65 : vector<24x16xf32> to vector<24x16xbf16>
    %67 = vector.extract_strided_slice %29 {offsets = [0, 144], sizes = [24, 16], strides = [1, 1]} : vector<24x192xf32> to vector<24x16xf32>
    %68 = arith.truncf %67 : vector<24x16xf32> to vector<24x16xbf16>
    %cst_29 = arith.constant dense<0.000000e+00> : vector<24x24xf32>
    %69 = tpu.matmul %64, %66, %cst_29 {dimension_numbers = #tpu.dot_dimension_numbers<[1], [1], [0], [0], [0, 0, 1, 0], [], []>} : vector<24x16xbf16>, vector<24x16xbf16>, vector<24x24xf32> -> vector<24x24xf32>
    %70 = vector.broadcast %36 : vector<1x24xf32> to vector<24x24xf32>
    %71 = arith.addf %69, %70 : vector<24x24xf32>
    %cst_30 = arith.constant dense<0xFF800000> : vector<24xf32>
    %72 = vector.multi_reduction <maximumf>, %71, %cst_30 [1] : vector<24x24xf32> to vector<24xf32>
    %73 = vector.shape_cast %72 : vector<24xf32> to vector<24x1xf32>
    %74 = vector.broadcast %73 : vector<24x1xf32> to vector<24x24xf32>
    %75 = arith.subf %71, %74 : vector<24x24xf32>
    %76 = math.exp %75 : vector<24x24xf32>
    %cst_31 = arith.constant dense<0.000000e+00> : vector<24xf32>
    %77 = vector.multi_reduction <add>, %76, %cst_31 [1] : vector<24x24xf32> to vector<24xf32>
    %78 = vector.shape_cast %77 : vector<24xf32> to vector<24x1xf32>
    %79 = tpu.reciprocal %78 {approx = true} : vector<24x1xf32> -> vector<24x1xf32>
    %80 = vector.broadcast %79 : vector<24x1xf32> to vector<24x24xf32>
    %81 = arith.mulf %76, %80 : vector<24x24xf32>
    %82 = arith.truncf %81 : vector<24x24xf32> to vector<24x24xbf16>
    %cst_32 = arith.constant dense<0.000000e+00> : vector<24x16xf32>
    %83 = tpu.matmul %82, %68, %cst_32 {dimension_numbers = #tpu.dot_dimension_numbers<[1], [0], [0], [1], [0, 0, 1, 1], [], []>} : vector<24x24xbf16>, vector<24x16xbf16>, vector<24x16xf32> -> vector<24x16xf32>
    %84 = arith.truncf %83 : vector<24x16xf32> to vector<24x16xbf16>
    %c16 = arith.constant 16 : index
    %c0_33 = arith.constant 0 : index
    %85 = vector.load %arg7[%c16, %c0_33] : memref<64x64xbf16, #tpu.memory_space<vmem>>, vector<16x64xbf16>
    %cst_34 = arith.constant dense<0.000000e+00> : vector<24x64xf32>
    %86 = tpu.matmul %84, %85, %cst_34 {dimension_numbers = #tpu.dot_dimension_numbers<[1], [0], [0], [1], [0, 0, 1, 1], [], []>} : vector<24x16xbf16>, vector<16x64xbf16>, vector<24x64xf32> -> vector<24x64xf32>
    %87 = arith.addf %62, %86 : vector<24x64xf32>
    %88 = vector.extract_strided_slice %29 {offsets = [0, 32], sizes = [24, 16], strides = [1, 1]} : vector<24x192xf32> to vector<24x16xf32>
    %89 = arith.truncf %88 : vector<24x16xf32> to vector<24x16xbf16>
    %90 = vector.extract_strided_slice %29 {offsets = [0, 96], sizes = [24, 16], strides = [1, 1]} : vector<24x192xf32> to vector<24x16xf32>
    %91 = arith.truncf %90 : vector<24x16xf32> to vector<24x16xbf16>
    %92 = vector.extract_strided_slice %29 {offsets = [0, 160], sizes = [24, 16], strides = [1, 1]} : vector<24x192xf32> to vector<24x16xf32>
    %93 = arith.truncf %92 : vector<24x16xf32> to vector<24x16xbf16>
    %cst_35 = arith.constant dense<0.000000e+00> : vector<24x24xf32>
    %94 = tpu.matmul %89, %91, %cst_35 {dimension_numbers = #tpu.dot_dimension_numbers<[1], [1], [0], [0], [0, 0, 1, 0], [], []>} : vector<24x16xbf16>, vector<24x16xbf16>, vector<24x24xf32> -> vector<24x24xf32>
    %95 = vector.broadcast %36 : vector<1x24xf32> to vector<24x24xf32>
    %96 = arith.addf %94, %95 : vector<24x24xf32>
    %cst_36 = arith.constant dense<0xFF800000> : vector<24xf32>
    %97 = vector.multi_reduction <maximumf>, %96, %cst_36 [1] : vector<24x24xf32> to vector<24xf32>
    %98 = vector.shape_cast %97 : vector<24xf32> to vector<24x1xf32>
    %99 = vector.broadcast %98 : vector<24x1xf32> to vector<24x24xf32>
    %100 = arith.subf %96, %99 : vector<24x24xf32>
    %101 = math.exp %100 : vector<24x24xf32>
    %cst_37 = arith.constant dense<0.000000e+00> : vector<24xf32>
    %102 = vector.multi_reduction <add>, %101, %cst_37 [1] : vector<24x24xf32> to vector<24xf32>
    %103 = vector.shape_cast %102 : vector<24xf32> to vector<24x1xf32>
    %104 = tpu.reciprocal %103 {approx = true} : vector<24x1xf32> -> vector<24x1xf32>
    %105 = vector.broadcast %104 : vector<24x1xf32> to vector<24x24xf32>
    %106 = arith.mulf %101, %105 : vector<24x24xf32>
    %107 = arith.truncf %106 : vector<24x24xf32> to vector<24x24xbf16>
    %cst_38 = arith.constant dense<0.000000e+00> : vector<24x16xf32>
    %108 = tpu.matmul %107, %93, %cst_38 {dimension_numbers = #tpu.dot_dimension_numbers<[1], [0], [0], [1], [0, 0, 1, 1], [], []>} : vector<24x24xbf16>, vector<24x16xbf16>, vector<24x16xf32> -> vector<24x16xf32>
    %109 = arith.truncf %108 : vector<24x16xf32> to vector<24x16xbf16>
    %c32 = arith.constant 32 : index
    %c0_39 = arith.constant 0 : index
    %110 = vector.load %arg7[%c32, %c0_39] : memref<64x64xbf16, #tpu.memory_space<vmem>>, vector<16x64xbf16>
    %cst_40 = arith.constant dense<0.000000e+00> : vector<24x64xf32>
    %111 = tpu.matmul %109, %110, %cst_40 {dimension_numbers = #tpu.dot_dimension_numbers<[1], [0], [0], [1], [0, 0, 1, 1], [], []>} : vector<24x16xbf16>, vector<16x64xbf16>, vector<24x64xf32> -> vector<24x64xf32>
    %112 = arith.addf %87, %111 : vector<24x64xf32>
    %113 = vector.extract_strided_slice %29 {offsets = [0, 48], sizes = [24, 16], strides = [1, 1]} : vector<24x192xf32> to vector<24x16xf32>
    %114 = arith.truncf %113 : vector<24x16xf32> to vector<24x16xbf16>
    %115 = vector.extract_strided_slice %29 {offsets = [0, 112], sizes = [24, 16], strides = [1, 1]} : vector<24x192xf32> to vector<24x16xf32>
    %116 = arith.truncf %115 : vector<24x16xf32> to vector<24x16xbf16>
    %117 = vector.extract_strided_slice %29 {offsets = [0, 176], sizes = [24, 16], strides = [1, 1]} : vector<24x192xf32> to vector<24x16xf32>
    %118 = arith.truncf %117 : vector<24x16xf32> to vector<24x16xbf16>
    %cst_41 = arith.constant dense<0.000000e+00> : vector<24x24xf32>
    %119 = tpu.matmul %114, %116, %cst_41 {dimension_numbers = #tpu.dot_dimension_numbers<[1], [1], [0], [0], [0, 0, 1, 0], [], []>} : vector<24x16xbf16>, vector<24x16xbf16>, vector<24x24xf32> -> vector<24x24xf32>
    %120 = vector.broadcast %36 : vector<1x24xf32> to vector<24x24xf32>
    %121 = arith.addf %119, %120 : vector<24x24xf32>
    %cst_42 = arith.constant dense<0xFF800000> : vector<24xf32>
    %122 = vector.multi_reduction <maximumf>, %121, %cst_42 [1] : vector<24x24xf32> to vector<24xf32>
    %123 = vector.shape_cast %122 : vector<24xf32> to vector<24x1xf32>
    %124 = vector.broadcast %123 : vector<24x1xf32> to vector<24x24xf32>
    %125 = arith.subf %121, %124 : vector<24x24xf32>
    %126 = math.exp %125 : vector<24x24xf32>
    %cst_43 = arith.constant dense<0.000000e+00> : vector<24xf32>
    %127 = vector.multi_reduction <add>, %126, %cst_43 [1] : vector<24x24xf32> to vector<24xf32>
    %128 = vector.shape_cast %127 : vector<24xf32> to vector<24x1xf32>
    %129 = tpu.reciprocal %128 {approx = true} : vector<24x1xf32> -> vector<24x1xf32>
    %130 = vector.broadcast %129 : vector<24x1xf32> to vector<24x24xf32>
    %131 = arith.mulf %126, %130 : vector<24x24xf32>
    %132 = arith.truncf %131 : vector<24x24xf32> to vector<24x24xbf16>
    %cst_44 = arith.constant dense<0.000000e+00> : vector<24x16xf32>
    %133 = tpu.matmul %132, %118, %cst_44 {dimension_numbers = #tpu.dot_dimension_numbers<[1], [0], [0], [1], [0, 0, 1, 1], [], []>} : vector<24x24xbf16>, vector<24x16xbf16>, vector<24x16xf32> -> vector<24x16xf32>
    %134 = arith.truncf %133 : vector<24x16xf32> to vector<24x16xbf16>
    %c48 = arith.constant 48 : index
    %c0_45 = arith.constant 0 : index
    %135 = vector.load %arg7[%c48, %c0_45] : memref<64x64xbf16, #tpu.memory_space<vmem>>, vector<16x64xbf16>
    %cst_46 = arith.constant dense<0.000000e+00> : vector<24x64xf32>
    %136 = tpu.matmul %134, %135, %cst_46 {dimension_numbers = #tpu.dot_dimension_numbers<[1], [0], [0], [1], [0, 0, 1, 1], [], []>} : vector<24x16xbf16>, vector<16x64xbf16>, vector<24x64xf32> -> vector<24x64xf32>
    %137 = arith.addf %112, %136 : vector<24x64xf32>
    %138 = arith.addf %1, %137 : vector<24x64xf32>
    %c0_47 = arith.constant 0 : index
    %c0_48 = arith.constant 0 : index
    %139 = vector.load %arg8[%c0_47, %c0_48] : memref<1x64xf32, #tpu.memory_space<vmem>>, vector<1x64xf32>
    %140 = vector.broadcast %139 : vector<1x64xf32> to vector<24x64xf32>
    %141 = arith.addf %138, %140 : vector<24x64xf32>
    %c0_49 = arith.constant 0 : index
    %c0_50 = arith.constant 0 : index
    %142 = vector.load %arg9[%c0_49, %c0_50] : memref<1x64xf32, #tpu.memory_space<vmem>>, vector<1x64xf32>
    %c0_51 = arith.constant 0 : index
    %c0_52 = arith.constant 0 : index
    %143 = vector.load %arg10[%c0_51, %c0_52] : memref<1x64xf32, #tpu.memory_space<vmem>>, vector<1x64xf32>
    %cst_53 = arith.constant dense<0.000000e+00> : vector<24xf32>
    %144 = vector.multi_reduction <add>, %141, %cst_53 [1] : vector<24x64xf32> to vector<24xf32>
    %145 = vector.shape_cast %144 : vector<24xf32> to vector<24x1xf32>
    %cst_54 = arith.constant 6.400000e+01 : f32
    %146 = vector.broadcast %cst_54 : f32 to vector<24x1xf32>
    %147 = arith.divf %145, %146 : vector<24x1xf32>
    %148 = vector.broadcast %147 : vector<24x1xf32> to vector<24x64xf32>
    %149 = arith.subf %141, %148 : vector<24x64xf32>
    %150 = arith.mulf %149, %149 : vector<24x64xf32>
    %cst_55 = arith.constant dense<0.000000e+00> : vector<24xf32>
    %151 = vector.multi_reduction <add>, %150, %cst_55 [1] : vector<24x64xf32> to vector<24xf32>
    %152 = vector.shape_cast %151 : vector<24xf32> to vector<24x1xf32>
    %cst_56 = arith.constant 6.400000e+01 : f32
    %153 = vector.broadcast %cst_56 : f32 to vector<24x1xf32>
    %154 = arith.divf %152, %153 : vector<24x1xf32>
    %cst_57 = arith.constant 9.99999974E-6 : f32
    %155 = vector.broadcast %cst_57 : f32 to vector<24x1xf32>
    %156 = arith.addf %154, %155 : vector<24x1xf32>
    %157 = math.rsqrt %156 : vector<24x1xf32>
    %158 = vector.broadcast %157 : vector<24x1xf32> to vector<24x64xf32>
    %159 = arith.mulf %149, %158 : vector<24x64xf32>
    %160 = vector.broadcast %142 : vector<1x64xf32> to vector<24x64xf32>
    %161 = arith.mulf %159, %160 : vector<24x64xf32>
    %162 = vector.broadcast %143 : vector<1x64xf32> to vector<24x64xf32>
    %163 = arith.addf %161, %162 : vector<24x64xf32>
    %164 = arith.truncf %163 : vector<24x64xf32> to vector<24x64xbf16>
    %c0_58 = arith.constant 0 : index
    %c0_59 = arith.constant 0 : index
    %165 = vector.load %arg11[%c0_58, %c0_59] : memref<64x256xbf16, #tpu.memory_space<vmem>>, vector<64x256xbf16>
    %cst_60 = arith.constant dense<0.000000e+00> : vector<24x256xf32>
    %166 = tpu.matmul %164, %165, %cst_60 {dimension_numbers = #tpu.dot_dimension_numbers<[1], [0], [0], [1], [0, 0, 1, 1], [], []>} : vector<24x64xbf16>, vector<64x256xbf16>, vector<24x256xf32> -> vector<24x256xf32>
    %c0_61 = arith.constant 0 : index
    %c0_62 = arith.constant 0 : index
    %167 = vector.load %arg12[%c0_61, %c0_62] : memref<1x256xf32, #tpu.memory_space<vmem>>, vector<1x256xf32>
    %168 = vector.broadcast %167 : vector<1x256xf32> to vector<24x256xf32>
    %169 = arith.addf %166, %168 : vector<24x256xf32>
    %cst_63 = arith.constant 5.000000e-01 : f32
    %170 = vector.broadcast %cst_63 : f32 to vector<24x256xf32>
    %171 = arith.mulf %170, %169 : vector<24x256xf32>
    %cst_64 = arith.constant 4.471500e-02 : f32
    %172 = vector.broadcast %cst_64 : f32 to vector<24x256xf32>
    %173 = arith.mulf %172, %169 : vector<24x256xf32>
    %174 = arith.mulf %173, %169 : vector<24x256xf32>
    %175 = arith.mulf %174, %169 : vector<24x256xf32>
    %176 = arith.addf %169, %175 : vector<24x256xf32>
    %cst_65 = arith.constant 0.797884583 : f32
    %177 = vector.broadcast %cst_65 : f32 to vector<24x256xf32>
    %178 = arith.mulf %177, %176 : vector<24x256xf32>
    %179 = math.tanh %178 : vector<24x256xf32>
    %cst_66 = arith.constant 1.000000e+00 : f32
    %180 = vector.broadcast %cst_66 : f32 to vector<24x256xf32>
    %181 = arith.addf %180, %179 : vector<24x256xf32>
    %182 = arith.mulf %171, %181 : vector<24x256xf32>
    %183 = arith.truncf %182 : vector<24x256xf32> to vector<24x256xbf16>
    %c0_67 = arith.constant 0 : index
    %c0_68 = arith.constant 0 : index
    %184 = vector.load %arg13[%c0_67, %c0_68] : memref<256x64xbf16, #tpu.memory_space<vmem>>, vector<256x64xbf16>
    %cst_69 = arith.constant dense<0.000000e+00> : vector<24x64xf32>
    %185 = tpu.matmul %183, %184, %cst_69 {dimension_numbers = #tpu.dot_dimension_numbers<[1], [0], [0], [1], [0, 0, 1, 1], [], []>} : vector<24x256xbf16>, vector<256x64xbf16>, vector<24x64xf32> -> vector<24x64xf32>
    %c0_70 = arith.constant 0 : index
    %c0_71 = arith.constant 0 : index
    %186 = vector.load %arg14[%c0_70, %c0_71] : memref<1x64xf32, #tpu.memory_space<vmem>>, vector<1x64xf32>
    %187 = vector.broadcast %186 : vector<1x64xf32> to vector<24x64xf32>
    %188 = arith.addf %185, %187 : vector<24x64xf32>
    %189 = arith.addf %141, %188 : vector<24x64xf32>
    %c0_72 = arith.constant 0 : index
    %c0_73 = arith.constant 0 : index
    %c0_74 = arith.constant 0 : index
    %190 = vector.load %arg15[%c0_72, %c0_73, %c0_74] : memref<1x24x64xf32, #tpu.memory_space<vmem>>, vector<1x24x64xf32>
    %191 = vector.shape_cast %190 : vector<1x24x64xf32> to vector<24x64xf32>
    %192 = vector.shape_cast %189 : vector<24x64xf32> to vector<1x24x64xf32>
    tpu.vector_store %arg15[%c0_72, %c0_73, %c0_74], %192 {strides = array<i32>} : memref<1x24x64xf32, #tpu.memory_space<vmem>>, vector<1x24x64xf32>,
    return
  }
  func.func @transform_0(%arg0: i32) -> (i32, i32, i32) {
    %c0_i32 = arith.constant 0 : i32
    %c0_i32_0 = arith.constant 0 : i32
    %c0_i32_1 = arith.constant 0 : i32
    return %arg0, %c0_i32, %c0_i32_0 : i32, i32, i32
  }
  func.func @transform_1(%arg0: i32) -> (i32, i32, i32) {
    %c0_i32 = arith.constant 0 : i32
    %c0_i32_0 = arith.constant 0 : i32
    %c0_i32_1 = arith.constant 0 : i32
    return %arg0, %c0_i32, %c0_i32_0 : i32, i32, i32
  }
  func.func @transform_2(%arg0: i32) -> (i32, i32) {
    %c0_i32 = arith.constant 0 : i32
    %c0_i32_0 = arith.constant 0 : i32
    %c0_i32_1 = arith.constant 0 : i32
    return %c0_i32, %c0_i32_0 : i32, i32
  }
  func.func @transform_3(%arg0: i32) -> (i32, i32) {
    %c0_i32 = arith.constant 0 : i32
    %c0_i32_0 = arith.constant 0 : i32
    %c0_i32_1 = arith.constant 0 : i32
    return %c0_i32, %c0_i32_0 : i32, i32
  }
  func.func @transform_4(%arg0: i32) -> (i32, i32) {
    %c0_i32 = arith.constant 0 : i32
    %c0_i32_0 = arith.constant 0 : i32
    %c0_i32_1 = arith.constant 0 : i32
    return %c0_i32, %c0_i32_0 : i32, i32
  }
  func.func @transform_5(%arg0: i32) -> (i32, i32) {
    %c0_i32 = arith.constant 0 : i32
    %c0_i32_0 = arith.constant 0 : i32
    %c0_i32_1 = arith.constant 0 : i32
    return %c0_i32, %c0_i32_0 : i32, i32
  }
  func.func @transform_6(%arg0: i32) -> (i32, i32) {
    %c0_i32 = arith.constant 0 : i32
    %c0_i32_0 = arith.constant 0 : i32
    %c0_i32_1 = arith.constant 0 : i32
    return %c0_i32, %c0_i32_0 : i32, i32
  }
  func.func @transform_7(%arg0: i32) -> (i32, i32) {
    %c0_i32 = arith.constant 0 : i32
    %c0_i32_0 = arith.constant 0 : i32
    %c0_i32_1 = arith.constant 0 : i32
    return %c0_i32, %c0_i32_0 : i32, i32
  }
  func.func @transform_8(%arg0: i32) -> (i32, i32) {
    %c0_i32 = arith.constant 0 : i32
    %c0_i32_0 = arith.constant 0 : i32
    %c0_i32_1 = arith.constant 0 : i32
    return %c0_i32, %c0_i32_0 : i32, i32
  }
  func.func @transform_9(%arg0: i32) -> (i32, i32) {
    %c0_i32 = arith.constant 0 : i32
    %c0_i32_0 = arith.constant 0 : i32
    %c0_i32_1 = arith.constant 0 : i32
    return %c0_i32, %c0_i32_0 : i32, i32
  }
  func.func @transform_10(%arg0: i32) -> (i32, i32) {
    %c0_i32 = arith.constant 0 : i32
    %c0_i32_0 = arith.constant 0 : i32
    %c0_i32_1 = arith.constant 0 : i32
    return %c0_i32, %c0_i32_0 : i32, i32
  }
  func.func @transform_11(%arg0: i32) -> (i32, i32) {
    %c0_i32 = arith.constant 0 : i32
    %c0_i32_0 = arith.constant 0 : i32
    %c0_i32_1 = arith.constant 0 : i32
    return %c0_i32, %c0_i32_0 : i32, i32
  }
  func.func @transform_12(%arg0: i32) -> (i32, i32) {
    %c0_i32 = arith.constant 0 : i32
    %c0_i32_0 = arith.constant 0 : i32
    %c0_i32_1 = arith.constant 0 : i32
    return %c0_i32, %c0_i32_0 : i32, i32
  }
  func.func @transform_13(%arg0: i32) -> (i32, i32) {
    %c0_i32 = arith.constant 0 : i32
    %c0_i32_0 = arith.constant 0 : i32
    %c0_i32_1 = arith.constant 0 : i32
    return %c0_i32, %c0_i32_0 : i32, i32
  }
  func.func @transform_14(%arg0: i32) -> (i32, i32, i32) {
    %c0_i32 = arith.constant 0 : i32
    %c0_i32_0 = arith.constant 0 : i32
    %c0_i32_1 = arith.constant 0 : i32
    return %arg0, %c0_i32, %c0_i32_0 : i32, i32, i32
  }
}

</mosaic_0001>

<bundles_post_ra>
// kernel: attend_decoder_forward.4
= control target key start
LH: loop header
LB: loop body
LE: loop exit
PB: predicated region body
PF: predicated region fallthrough
CT: control target
= control target key end

     0   :  { %s343_s12 = smov 0   ;;  %s375_s0 = inlined_call_operand.vmem [shape: f32[2,8,64], index: 0, kind: input, shape index: {}]   ;;  %s376_s1 = inlined_call_operand.vmem [shape: bf16[64,64], index: 1, kind: input, shape index: {}]   ;;  %s377_s2 = inlined_call_operand.vmem [shape: f32[1,64], index: 2, kind: input, shape index: {}]   ;;  %s378_s3 = inlined_call_operand.vmem [shape: f32[2,8,64], index: 3, kind: output, shape index: {}]  }
   0x1 LB: > { %s276_s13 = sadd.s32 4294967295, %s321_s12   ;;  %p280_p0 = scmp.ge.s32.totalorder %s321_s12, 1  ;;  %s321_s12 = sphi %s343_s12, %s13_s12  }
   0x2   : > { %p136_p1 = scmp.lt.s32.totalorder %s321_s12, 3 }
   0x4   : > { %p137_p2 = pnand %p280_p0, %p136_p1 }
   0x5   : > { %p158_p3 = scmp.lt.s32.totalorder (!%p137_p2), %s276_s13, 1 }
   0x6   : > { %140 = sbr.rel (%p137_p2) target bundleno = 161 (0xa1), region = 32 }
   0xb   : > { %v305_v0 = vld [vmem:[%s376_s1 + $0x18] sm:$0xff]  ;;  %v304_v1 = vld [vmem:[%s376_s1 + $0x10] sm:$0xff]  ;;  %s380_s13 = smov (!%p158_p3, %s276_s13), 1  ;;  %v303_v2 = vld [vmem:[%s376_s1 + $0x8] sm:$0xff]  ;;  %vm205_vm0 = vcmask 523264  }
   0xc   : > { %213 = vmatpush.bf16.msra.mxu0 %v305_v0  ;;  %s281_s18 = sshll.u32 %s380_s13, 3  ;;  %v302_v3 = vld [vmem:[%s376_s1] sm:$0xff] }
   0xd   : > { %s161_s23 = scalar_lea.vmem %s375_s0, %s281_s18  ;;  %v314_v6 = vld [vmem:[%s377_s2] ss:$0 sm:$0xff]  ;;  %s165_s30 = scalar_lea.vmem %s378_s3, %s281_s18 }
   0xe   : > { %v167_v4 = vld [vmem:[%s161_s23] sm:$0xff] }
   0xf   : > { %v168_v5 = vpack.c.bf16 %v167_v4, %v167_v4 }
  0x10   : > { %214 = vmatpush.bf16.msra.mxu0 %v304_v1 }
  0x14   : > { %215 = vmatpush.bf16.msra.mxu0 %v303_v2 }
  0x18   : > { %216 = vmatpush.bf16.msra.mxu0 %v302_v3 }
  0x1b   : > { %299 = vmatmul.msk.bf16.vlgmr.msra.gmra.mxu0 %vm205_vm0, %v168_v5 }
  0x98   : > { %v218_v7 = vpop.f32.mrf.mxu0 }
  0x99   : > { %v219_v8 = vadd.f32 %v314_v6, %v218_v7 }
  0x9b   : > { %222 = vst.msk [vmem:[%s165_s30] sm:$0xff] %vm205_vm0, %v219_v8 }
  0xa0   : > { %v220_v9 = vpop.f32.mrf.mxu0 }
  0xa1 PF: > { %s13_s12 = sadd.s32 1, %s321_s12  }
  0xa2   : > { %p10_p4 = scmp.ge.s32.totalorder %s13_s12, 4  }
  0xa4   :  { %12 = sbr.rel (!%p10_p4) target bundleno = 1 (0x1), region = 62 }

// kernel: attend_decoder_forward.7
= control target key start
LH: loop header
LB: loop body
LE: loop exit
PB: predicated region body
PF: predicated region fallthrough
CT: control target
= control target key end

     0   :  { %s1881_s0 = inlined_call_operand.vmem [shape: f32[2,8,64], index: 0, kind: input, shape index: {}]   ;;  %s1882_s1 = inlined_call_operand.vmem [shape: f32[1,64], index: 1, kind: input, shape index: {}]   ;;  %s1883_s2 = inlined_call_operand.vmem [shape: f32[1,64], index: 2, kind: input, shape index: {}]   ;;  %s1884_s3 = inlined_call_operand.vmem [shape: bf16[64,64], index: 3, kind: input, shape index: {}]   ;;  %s1885_s4 = inlined_call_operand.vmem [shape: f32[1,64], index: 4, kind: input, shape index: {}]   ;;  %s1886_s5 = inlined_call_operand.vmem [shape: bf16[2,64,128], index: 5, kind: input, shape index: {}]   ;;  %s1887_s6 = inlined_call_operand.vmem [shape: f32[2,1,128], index: 6, kind: input, shape index: {}]   ;;  %s1888_s7 = inlined_call_operand.vmem [shape: bf16[2,128,128], index: 7, kind: input, shape index: {}]   ;;  %s1889_s8 = inlined_call_operand.vmem [shape: f32[2,1,128], index: 8, kind: input, shape index: {}]   ;;  %s1890_s9 = inlined_call_operand.vmem [shape: bf16[2,128,64], index: 9, kind: input, shape index: {}]   ;;  %s1891_s10 = inlined_call_operand.vmem [shape: f32[2,1,64], index: 10, kind: input, shape index: {}]   ;;  %s1892_s11 = inlined_call_operand.vmem [shape: f32[2,1,64], index: 11, kind: input, shape index: {}]   ;;  %s1893_s12 = inlined_call_operand.vmem [shape: f32[2,1,64], index: 12, kind: input, shape index: {}]   ;;  %s1894_s13 = inlined_call_operand.hbm [shape: f32[2,8,8], index: 13, kind: output, shape index: {}]  }
   0x1   :  { %1895 = sst [smem:[#allocation6_spill]] %s1881_s0 }
   0x2   :  { %1896 = sst [smem:[#allocation7_spill]] %s1882_s1 }
   0x3   :  { %1897 = sst [smem:[#allocation8_spill]] %s1883_s2 }
   0x4   :  { %1898 = sst [smem:[#allocation9_spill]] %s1884_s3 }
   0x5   :  { %18 = vsyncpa [#allocation3], 0 }
   0x6   :  { %20 = vsyncpa [#allocation3 + $0x1], 0  ;;  %s1606_s25 = smov 0   ;;  %s1608_s26 = smov 0  }
   0x7   :  { %s1610_s27 = smov 0   ;;  %s1612_s28 = smov 0  }
   0x8 LB: > { %s1627_s29 = sadd.s32 4294967295, %s1533_s28   ;;  %s1131_s30 = sadd.s32 4294967294, %s1533_s28   ;;  %s1533_s28 = sphi %s1612_s28, %s1910_s28   ;;  %s1529_s27 = sphi %s1610_s27, %s1909_s27   ;;  %s1525_s26 = sphi %s1608_s26, %s1908_s26   ;;  %s1521_s25 = sphi %s1606_s25, %s1907_s25  }
   0x9   : > { %s1631_s14 = sadd.s32 1, %s1533_s28   ;;  %s311_s15 = sadd.s32 1, %s1529_s27 }
   0xa   : > { %s308_s16 = ssub.s32 %s1533_s28, %s1631_s14  ;;  %p321_p0 = scmp.ne.s32.totalorder %s1529_s27, %s1525_s26 }
   0xb   : > { %p309_p1 = scmp.eq.s32.totalorder %s308_s16, 0  ;;  %p322_p2 = scmp.eq.s32.totalorder %s1627_s29, 1 }
   0xc   : > { %p327_p3 = scmp.ne.s32.totalorder %s1525_s26, %s1521_s25  ;;  %p328_p4 = scmp.eq.s32.totalorder %s1131_s30, 1 }
   0xd   : > { %s1642_s17 = scalar_select %p309_p1, %s1529_s27, %s311_s15  }
   0xe   : > { %p1644_p5 = por %p322_p2, %p321_p0  ;;  %p1648_p6 = por %p328_p4, %p327_p3 }
   0xf   : > { %1899 = sst [smem:[#allocation5_spill]] %s1642_s17  ;;  %p1134_p7 = scmp.ge.s32.totalorder %s1533_s28, 1 }
  0x10   : > { %p389_p8 = scmp.lt.s32.totalorder %s1533_s28, 3 }
  0x12   : > { %p390_p9 = pnand %p1134_p7, %p389_p8 }
  0x13   : > { %p432_p10 = scmp.lt.s32.totalorder (!%p390_p9), %s1627_s29, 1  ;;  %s1902_s0 = sld [smem:[#allocation6_spill]] (!%p390_p9) }
  0x14   : > { %393 = sbr.rel (%p390_p9) target bundleno = 1246 (0x4de), region = 72  ;;  %s1903_s3 = sld [smem:[#allocation9_spill]] (!%p390_p9) }
  0x15   : > { %s1904_s1 = sld [smem:[#allocation7_spill]] (!%p390_p9)  ;;  %s1363_s22 = sshll.u32 (!%p390_p9), %s1627_s29, 3 }
  0x16   : > { %s1905_s2 = sld [smem:[#allocation8_spill]] (!%p390_p9) }
  0x19   : > { %s433_s20 = scalar_select %p432_p10, %s1627_s29, 1  ;;  %vm440_vm0 = vcmask 523264   ;;  %v1535_v2 = vmov 64.0   ;;  %v1373_v18 = vld [vmem:[%s1886_s5 + $0x18] sm:$0xff]  ;;  %v1372_v22 = vld [vmem:[%s1886_s5 + $0x10] sm:$0xff]  ;;  %v1371_v25 = vld [vmem:[%s1886_s5 + $0x8] sm:$0xff] }
  0x1a   : > { %1463 = vrcp.f32 %v1535_v2  ;;  %v1369_v14 = vld [vmem:[%s1903_s3 + $0x18] sm:$0xff]  ;;  %v1368_v15 = vld [vmem:[%s1903_s3 + $0x10] sm:$0xff]  ;;  %v1367_v16 = vld [vmem:[%s1903_s3 + $0x8] sm:$0xff]  ;;  %575 = vmatpush.bf16.msra.mxu1 %v1373_v18  ;;  %vm1054_vm11 = vcmask 64512  }
  0x1b   : > { %s1136_s21 = sshll.u32 %s433_s20, 3  ;;  %522 = vmatpush.bf16.msra.mxu3 %v1369_v14  ;;  %v1366_v17 = vld [vmem:[%s1903_s3] sm:$0xff]  ;;  %v1393_v19 = vld [vmem:[%s1886_s5 + $0x38] sm:$0xff]  ;;  %v1392_v23 = vld [vmem:[%s1886_s5 + $0x30] sm:$0xff] }
  0x1c   : > { %s435_s24 = scalar_lea.vmem %s1902_s0, %s1136_s21  ;;  %823 = vmatpush.bf16.msra.mxu0 %v1393_v19  ;;  %v1391_v26 = vld [vmem:[%s1886_s5 + $0x28] sm:$0xff]  ;;  %v1450_v33 = vld [vmem:[%s1904_s1] ss:$0 sm:$0xff]  ;;  %v1381_v42 = vld [vmem:[%s1888_s7 + $0x38] sm:$0xff]  ;;  %s429_s21 = sand.u32 1, %s1525_s26  }
  0x1d   : > { %v437_v0 = vld [vmem:[%s435_s24] sm:$0xff]  ;;  %v1401_v43 = vld [vmem:[%s1888_s7 + $0x78] sm:$0xff]  ;;  %653 = vmatpush.bf16.msra.mxu2 %v1381_v42  ;;  %v1380_v44 = vld [vmem:[%s1888_s7 + $0x30] sm:$0xff]  ;;  %s1135_s0 = sshll.u32 %s429_s21, 3  ;;  %s1067_s24 = scalar_lea.hbm %s1894_s13, %s1363_s22 }
  0x1e   : > { %v441_v1 = vsel %vm440_vm0, %v437_v0, 0.0  ;;  %576 = vmatpush.bf16.msra.mxu1 %v1372_v22  ;;  %v1451_v36 = vld [vmem:[%s1905_s2] ss:$0 sm:$0xff]  ;;  %v1400_v45 = vld [vmem:[%s1888_s7 + $0x70] sm:$0xff]  ;;  %v1379_v46 = vld [vmem:[%s1888_s7 + $0x28] sm:$0xff]  ;;  %s431_s30 = scalar_lea.vmem [#allocation2], %s1135_s0 }
  0x1f   : > { %442 = vadd.xlane.f32.xlu0 %v441_v1  ;;  %523 = vmatpush.bf16.msra.mxu3 %v1368_v15  ;;  %v1370_v40 = vld [vmem:[%s1886_s5] sm:$0xff]  ;;  %v1399_v47 = vld [vmem:[%s1888_s7 + $0x68] sm:$0xff]  ;;  %v1377_v50 = vld [vmem:[%s1888_s7 + $0x18] sm:$0xff]  ;;  %s1069_s15 = sshll.u32 %s431_s30, 4  ;;  %s1071_s1 = sshll.u32 %s1067_s24, 4  ;;  %s1070_s15 = int_to_ptr.vmem [resolvable:$true] %s1069_s15  ;;  %s1072_s1 = int_to_ptr.hbm [resolvable:$true] %s1071_s1 }
  0x20   : > { %v1464_v3 = vpop.eup %1463  ;;  %824 = vmatpush.bf16.msra.mxu0 %v1392_v23  ;;  %v1390_v41 = vld [vmem:[%s1886_s5 + $0x20] sm:$0xff]  ;;  %v1397_v51 = vld [vmem:[%s1888_s7 + $0x58] sm:$0xff]  ;;  %v1376_v52 = vld [vmem:[%s1888_s7 + $0x10] sm:$0xff]  ;;  %s1057_s16 = scalar_lea.sflag [#allocation3], %s429_s21  ;;  %s1485_s20 = sshra.s32 %s1072_s1, 4  ;;  %s1486_s20 = int_to_ptr.hbm [resolvable:$true] %s1485_s20 }
  0x21   : > { %v445_v4 = vmul.f32 64.0, %v1464_v3  ;;  %vm449_vm1 = vweird.f32 %v1464_v3  ;;  %654 = vmatpush.bf16.msra.mxu2 %v1380_v44  ;;  %v1378_v48 = vld [vmem:[%s1888_s7 + $0x20] sm:$0xff]  ;;  %v1396_v53 = vld [vmem:[%s1888_s7 + $0x50] sm:$0xff]  ;;  %v1375_v55 = vld [vmem:[%s1888_s7 + $0x8] sm:$0xff]  ;;  %s1487_s2 = scalar_lea.hbm %s1486_s20, 8  ;;  %s1491_s22 = scalar_lea.hbm %s1894_s13, 16 }
  0x22   : > { %577 = vmatpush.bf16.msra.mxu1 %v1371_v25  ;;  %v1398_v49 = vld [vmem:[%s1888_s7 + $0x60] sm:$0xff]  ;;  %v1395_v56 = vld [vmem:[%s1888_s7 + $0x48] sm:$0xff]  ;;  %v1409_v63 = vld [vmem:[%s1890_s9 + $0x78] sm:$0xff]  ;;  %p1488_p11 = scmp.ne.s32.totalorder %s1486_s20, %s1487_s2  ;;  %p1492_p0 = scmp.lt.s32.totalorder %s1486_s20, %s1894_s13 }
  0x23   : > { %v446_v5 = vsub.f32 1.0, %v445_v4  ;;  %524 = vmatpush.bf16.msra.mxu3 %v1367_v16  ;;  %v1452_v54 = vld [vmem:[%s1885_s4] ss:$0 sm:$0xff]  ;;  %v1408_v1 = vld [vmem:[%s1890_s9 + $0x70] sm:$0xff]  ;;  %v1387_v4 = vld [vmem:[%s1890_s9 + $0x28] sm:$0xff]  ;;  %p1493_p1 = scmp.lt.s32.totalorder %s1491_s22, %s1487_s2 }
  0x24   : > { %825 = vmatpush.bf16.msra.mxu0 %v1391_v26  ;;  %v1374_v61 = vld [vmem:[%s1888_s7] sm:$0xff]  ;;  %v1388_v2 = vld [vmem:[%s1890_s9 + $0x30] sm:$0xff]  ;;  %v1403_v14 = vld [vmem:[%s1890_s9 + $0x48] sm:$0xff]  ;;  %p1489_p12 = pnand %p1488_p11, %p1644_p5 }
  0x25   : > { %v447_v6 = vmul.f32 %v1464_v3, %v446_v5  ;;  %655 = vmatpush.bf16.msra.mxu2 %v1379_v46  ;;  %v1394_v62 = vld [vmem:[%s1888_s7 + $0x40] sm:$0xff]  ;;  %p1494_p2 = por %p1493_p1, %p1492_p0 }
  0x26   : > { %578 = vmatpush.bf16.msra.mxu1 %v1370_v40  ;;  %v1406_v5 = vld [vmem:[%s1890_s9 + $0x60] sm:$0xff]  ;;  %p1490_p13 = pneg %p1489_p12 }
  0x27   : > { %v448_v7 = vadd.f32 %v1464_v3, %v447_v6  ;;  %525 = vmatpush.bf16.msra.mxu3 %v1366_v17  ;;  %v1386_v6 = vld [vmem:[%s1890_s9 + $0x20] sm:$0xff] }
  0x28   : > { %826 = vmatpush.bf16.msra.mxu0 %v1390_v41  ;;  %v1402_v23 = vld [vmem:[%s1890_s9 + $0x40] sm:$0xff]  ;;  %p1495_p3 = pnand %p1494_p2, %p1490_p13 }
  0x29   : > { %v1660_v8 = vsel %vm449_vm1, %v1464_v3, %v448_v7  ;;  %656 = vmatpush.bf16.msra.mxu2 %v1378_v48  ;;  %v1407_v3 = vld [vmem:[%s1890_s9 + $0x68] sm:$0xff]  ;;  %v1405_v7 = vld [vmem:[%s1890_s9 + $0x58] sm:$0xff]  ;;  %v1382_v25 = vld [vmem:[%s1890_s9] sm:$0xff] }
  0x2a   : > { %903 = vmatpush.bf16.msrb.mxu1 %v1401_v43  ;;  %v1455_v26 = vld [vmem:[%s1889_s8 + $0x1] ss:$0 sm:$0xff]  ;;  %v1458_v41 = vld [vmem:[%s1891_s10] ss:$0 sm:$0xff] }
  0x2c   : > { %987 = vmatpush.bf16.msrb.mxu0 %v1409_v63 }
  0x2d   : > { %657 = vmatpush.bf16.msra.mxu2 %v1377_v50 }
  0x2e   : > { %904 = vmatpush.bf16.msrb.mxu1 %v1400_v45 }
  0x30   : > { %988 = vmatpush.bf16.msrb.mxu0 %v1408_v1 }
  0x31   : > { %658 = vmatpush.bf16.msra.mxu2 %v1376_v52 }
  0x32   : > { %905 = vmatpush.bf16.msrb.mxu1 %v1399_v47 }
  0x34   : > { %989 = vmatpush.bf16.msrb.mxu0 %v1407_v3 }
  0x35   : > { %659 = vmatpush.bf16.msra.mxu2 %v1375_v55 }
  0x36   : > { %906 = vmatpush.bf16.msrb.mxu1 %v1398_v49 }
  0x38   : > { %990 = vmatpush.bf16.msrb.mxu0 %v1406_v5 }
  0x39   : > { %660 = vmatpush.bf16.msra.mxu2 %v1374_v61 }
  0x3a   : > { %907 = vmatpush.bf16.msrb.mxu1 %v1397_v51 }
  0x3c   : > { %991 = vmatpush.bf16.msrb.mxu0 %v1405_v7 }
  0x3e   : > { %908 = vmatpush.bf16.msrb.mxu1 %v1396_v53 }
  0x42   : > { %909 = vmatpush.bf16.msrb.mxu1 %v1395_v56 }
  0x46   : > { %910 = vmatpush.bf16.msrb.mxu1 %v1394_v62 }
  0x92   : > { %v443_v9 = vpop.xlane.xlu0 %442 }
  0x93   : > { %v451_v10 = vmul.f32 %v1660_v8, %v443_v9  ;;  %v1385_v9 = vld [vmem:[%s1890_s9 + $0x18] sm:$0xff] }
  0x95   : > { %v452_v11 = vsub.f32 %v437_v0, %v451_v10  ;;  %v1389_v0 = vld [vmem:[%s1890_s9 + $0x38] sm:$0xff]  ;;  %v1404_v10 = vld [vmem:[%s1890_s9 + $0x50] sm:$0xff] }
  0x96   : > { %735 = vmatpush.bf16.msrb.mxu3 %v1389_v0  ;;  %992 = vmatpush.bf16.msrb.mxu0 %v1404_v10 }
  0x97   : > { %v453_v12 = vmul.f32 %v452_v11, %v452_v11 }
  0x99   : > { %v454_v13 = vsel %vm440_vm0, %v453_v12, 0.0  ;;  %v1453_v12 = vld [vmem:[%s1887_s6] ss:$0 sm:$0xff] }
  0x9a   : > { %455 = vadd.xlane.f32.xlu0 %v454_v13  ;;  %736 = vmatpush.bf16.msrb.mxu3 %v1388_v2  ;;  %v1454_v13 = vld [vmem:[%s1887_s6 + $0x1] ss:$0 sm:$0xff] }
  0x9b   : > { %993 = vmatpush.bf16.msrb.mxu0 %v1403_v14 }
  0x9e   : > { %737 = vmatpush.bf16.msrb.mxu3 %v1387_v4  ;;  %v1459_v4 = vld [vmem:[%s1892_s11 + $0x1] ss:$0 sm:$0xff] }
  0x9f   : > { %994 = vmatpush.bf16.msrb.mxu0 %v1402_v23 }
  0xa2   : > { %738 = vmatpush.bf16.msrb.mxu3 %v1386_v6 }
  0xa6   : > { %739 = vmatpush.bf16.msrb.mxu3 %v1385_v9 }
 0x10d   : > { %v456_v20 = vpop.xlane.xlu0 %455 }
 0x10e   : > { %v457_v21 = vmul.f32 %v456_v20, %v1660_v8 }
 0x110   : > { %v458_v24 = vadd.f32 1e-05, %v457_v21 }
 0x112   : > { %1465 = vrsqrt.f32 %v458_v24  ;;  %vm465_vm3 = vweird.f32 %v458_v24 }
 0x118   : > { %v1466_v27 = vpop.eup %1465 }
 0x119   : > { %v460_v28 = vmul.f32 %v1466_v27, %v458_v24  ;;  %vm466_vm2 = vweird.f32 %v1466_v27  ;;  %v1383_v24 = vld [vmem:[%s1890_s9 + $0x8] sm:$0xff] }
 0x11a   : > { %vm467_vm4 = vmor %vm465_vm3, %vm466_vm2 }
 0x11b   : > { %v461_v29 = vmul.f32 %v1466_v27, %v460_v28 }
 0x11d   : > { %v462_v30 = vmul.f32 0.5, %v461_v29 }
 0x11f   : > { %v463_v31 = vsub.f32 1.5, %v462_v30  ;;  %v1456_v30 = vld [vmem:[%s1889_s8] ss:$0 sm:$0xff] }
 0x121   : > { %v464_v32 = vmul.f32 %v1466_v27, %v463_v31 }
 0x123   : > { %v468_v34 = vsel %vm467_vm4, %v1466_v27, %v464_v32 }
 0x124   : > { %v469_v35 = vmul.f32 %v468_v34, %v452_v11  ;;  %v1384_v11 = vld [vmem:[%s1890_s9 + $0x10] sm:$0xff] }
 0x125   : > { %740 = vmatpush.bf16.msrb.mxu3 %v1384_v11 }
 0x126   : > { %v473_v37 = vmul.f32 %v1450_v33, %v469_v35 }
 0x128   : > { %v477_v38 = vadd.f32 %v1451_v36, %v473_v37  ;;  %v1457_v36 = vld [vmem:[%s1891_s10 + $0x1] ss:$0 sm:$0xff] }
 0x129   : > { %741 = vmatpush.bf16.msrb.mxu3 %v1383_v24 }
 0x12a   : > { %v478_v39 = vpack.c.bf16 %v477_v38, %v477_v38 }
 0x12c   : > { %1153 = vmatmul.msk.bf16.vlgmr.msra.gmra.mxu3 %vm440_vm0, %v478_v39 }
 0x12d   : > { %742 = vmatpush.bf16.msrb.mxu3 %v1382_v25 }
 0x1af   : > { %v527_v57 = vpop.f32.mrf.mxu3 }
 0x1b0   : > { %v528_v58 = vadd.f32 %v1452_v54, %v527_v57 }
 0x1b2   : > { %v531_v59 = vpack.c.bf16 %v528_v58, %v528_v58 }
 0x1b4   : > { %1170 = vmatmul.msk.bf16.vlgmr.msra.gmra.mxu1 %vm440_vm0, %v531_v59  ;;  %1260 = vmatmul.msk.bf16.vlgmr.msra.gmra.mxu0 %vm440_vm0, %v531_v59 }
 0x1b7   : > { %v529_v60 = vpop.f32.mrf.mxu3 }
 0x231   : > { %v580_v15 = vpop.f32.mrf.mxu1  ;;  %v828_v16 = vpop.f32.mrf.mxu0 }
 0x232   : > { %v581_v17 = vadd.f32 %v1453_v12, %v580_v15  ;;  %v829_v18 = vadd.f32 %v1454_v13, %v828_v16 }
 0x234   : > { %v584_v19 = vpack.c.bf16 %v581_v17, %v581_v17  ;;  %v832_v20 = vpack.c.bf16 %v829_v18, %v829_v18  ;;  %v1461_v18 = vld [vmem:[%s1892_s11] ss:$0 sm:$0xff] }
 0x236   : > { %661 = vmatmul.bf16.vlgmr.msra.gmra.mxu2 %v584_v19  ;;  %911 = vmatmul.bf16.vlgmr.msrb.gmra.mxu1 %v832_v20 }
 0x239   : > { %v582_v21 = vpop.f32.mrf.mxu1  ;;  %v830_v22 = vpop.f32.mrf.mxu0 }
 0x23a   : > { %v1462_v21 = vld [vmem:[%s1893_s12] ss:$0 sm:$0xff] }
 0x2b3   : > { %v912_v27 = vpop.f32.mrf.mxu1 }
 0x2b4   : > { %v913_v28 = vadd.f32 %v1455_v26, %v912_v27 }
 0x2b6   : > { %v916_v29 = vpack.c.bf16 %v913_v28, %v913_v28 }
 0x2b8   : > { %995 = vmatmul.bf16.vlgmr.msrb.gmra.mxu0 %v916_v29 }
 0x2b9   : > { %v662_v31 = vpop.f32.mrf.mxu2 }
 0x2ba   : > { %v663_v32 = vadd.f32 %v1456_v30, %v662_v31 }
 0x2bb   : > { %v914_v33 = vpop.f32.mrf.mxu1 }
 0x2bc   : > { %v666_v34 = vpack.c.bf16 %v663_v32, %v663_v32 }
 0x2be   : > { %743 = vmatmul.bf16.vlgmr.msrb.gmra.mxu3 %v666_v34 }
 0x2c1   : > { %v664_v35 = vpop.f32.mrf.mxu2 }
 0x335   : > { %v996_v37 = vpop.f32.mrf.mxu0 }
 0x336   : > { %v997_v38 = vadd.f32 %v1457_v36, %v996_v37 }
 0x338   : > { %v1004_v39 = vsel %vm440_vm0, %v997_v38, 0.0 }
 0x339   : > { %1005 = vadd.xlane.f32.xlu1 %v1004_v39 }
 0x33d   : > { %v998_v40 = vpop.f32.mrf.mxu0 }
 0x341   : > { %v744_v42 = vpop.f32.mrf.mxu3 }
 0x342   : > { %v745_v43 = vadd.f32 %v1458_v41, %v744_v42 }
 0x344   : > { %v750_v44 = vsel %vm440_vm0, %v745_v43, 0.0 }
 0x345   : > { %751 = vadd.xlane.f32.xlu1 %v750_v44 }
 0x349   : > { %v746_v45 = vpop.f32.mrf.mxu3 }
 0x3ac   : > { %v1006_v46 = vpop.xlane.xlu1 %1005 }
 0x3ad   : > { %v1007_v47 = vmul.f32 %v1006_v46, %v1660_v8 }
 0x3af   : > { %v1008_v48 = vsub.f32 %v997_v38, %v1007_v47 }
 0x3b1   : > { %v1009_v49 = vmul.f32 %v1008_v48, %v1008_v48 }
 0x3b3   : > { %v1010_v50 = vsel %vm440_vm0, %v1009_v49, 0.0 }
 0x3b4   : > { %1011 = vadd.xlane.f32.xlu2 %v1010_v50 }
 0x3b8   : > { %v752_v51 = vpop.xlane.xlu1 %751 }
 0x3b9   : > { %v753_v52 = vmul.f32 %v752_v51, %v1660_v8 }
 0x3bb   : > { %v754_v53 = vsub.f32 %v745_v43, %v753_v52 }
 0x3bd   : > { %v755_v54 = vmul.f32 %v754_v53, %v754_v53 }
 0x3bf   : > { %v756_v55 = vsel %vm440_vm0, %v755_v54, 0.0 }
 0x3c0   : > { %757 = vadd.xlane.f32.xlu2 %v756_v55 }
 0x427   : > { %v1012_v56 = vpop.xlane.xlu2 %1011 }
 0x428   : > { %v1013_v57 = vmul.f32 %v1012_v56, %v1660_v8 }
 0x42a   : > { %v1014_v58 = vadd.f32 1e-05, %v1013_v57 }
 0x42c   : > { %1467 = vrsqrt.f32 %v1014_v58  ;;  %vm1021_vm6 = vweird.f32 %v1014_v58 }
 0x432   : > { %v1468_v59 = vpop.eup %1467 }
 0x433   : > { %v1016_v60 = vmul.f32 %v1468_v59, %v1014_v58  ;;  %v758_v61 = vpop.xlane.xlu2 %757  ;;  %vm1022_vm5 = vweird.f32 %v1468_v59 }
 0x434   : > { %v759_v62 = vmul.f32 %v758_v61, %v1660_v8  ;;  %vm1023_vm7 = vmor %vm1021_vm6, %vm1022_vm5  ;;  %v1460_v8 = vld [vmem:[%s1893_s12 + $0x1] ss:$0 sm:$0xff] }
 0x435   : > { %v1017_v63 = vmul.f32 %v1468_v59, %v1016_v60 }
 0x436   : > { %v760_v0 = vadd.f32 1e-05, %v759_v62 }
 0x437   : > { %v1018_v1 = vmul.f32 0.5, %v1017_v63 }
 0x438   : > { %1469 = vrsqrt.f32 %v760_v0  ;;  %vm767_vm9 = vweird.f32 %v760_v0 }
 0x439   : > { %v1019_v2 = vsub.f32 1.5, %v1018_v1 }
 0x43b   : > { %v1020_v3 = vmul.f32 %v1468_v59, %v1019_v2 }
 0x43d   : > { %v1024_v5 = vsel %vm1023_vm7, %v1468_v59, %v1020_v3 }
 0x43e   : > { %v1470_v6 = vpop.eup %1469  ;;  %v1025_v7 = vmul.f32 %v1024_v5, %v1008_v48 }
 0x43f   : > { %v762_v9 = vmul.f32 %v1470_v6, %v760_v0  ;;  %vm768_vm8 = vweird.f32 %v1470_v6 }
 0x440   : > { %v1029_v10 = vmul.f32 %v1459_v4, %v1025_v7  ;;  %vm769_vm10 = vmor %vm767_vm9, %vm768_vm8 }
 0x441   : > { %v763_v11 = vmul.f32 %v1470_v6, %v762_v9 }
 0x442   : > { %v1033_v12 = vadd.f32 %v1460_v8, %v1029_v10 }
 0x443   : > { %v764_v13 = vmul.f32 0.5, %v763_v11 }
 0x444   : > { %v1034_v14 = vpack.c.bf16 %v1033_v12, %v1033_v12 }
 0x445   : > { %v765_v15 = vsub.f32 1.5, %v764_v13 }
 0x446   : > { %v1039_v16 = vsel %vm440_vm0, %v1034_v14, 0 }
 0x447   : > { %v766_v17 = vmul.f32 %v1470_v6, %v765_v15  ;;  %1048 = vmatpush.bf16.xpose.msrb.mxu2 %v1039_v16 }
 0x449   : > { %v770_v19 = vsel %vm769_vm10, %v1470_v6, %v766_v17 }
 0x44a   : > { %v771_v20 = vmul.f32 %v770_v19, %v754_v53 }
 0x44c   : > { %v775_v22 = vmul.f32 %v1461_v18, %v771_v20 }
 0x44e   : > { %v779_v23 = vadd.f32 %v1462_v21, %v775_v22 }
 0x450   : > { %v780_v24 = vpack.c.bf16 %v779_v23, %v779_v23 }
 0x452   : > { %1361 = vmatmul.msk.bf16.vlgmr.msrb.gmra.mxu2 %vm440_vm0, %v780_v24 }
 0x4d5   : > { %v1050_v25 = vpop.f32.mrf.mxu2 }
 0x4d6   : > { %1055 = vst.msk [vmem:[%s431_s30] sm:$0xff] %vm1054_vm11, %v1050_v25 }
 0x4d7   : > { %1498 = shalt.err (!%p1495_p3)
}
 0x4d8   : > { %1410 = dma.vmem_to_hbm [thread:$0]  (%p1644_p5), %s1070_s15, 128, %s1072_s1, %s1057_s16  }
 0x4dd   : > { %v1052_v26 = vpop.f32.mrf.mxu2 }
 0x4de PF: > { %p1416_p4 = scmp.ge.s32.totalorder %s1533_s28, 2  ;;  %s1083_s21 = sand.u32 1, %s1521_s25  }
 0x4df   : > { %s1084_s3 = scalar_lea.sflag [#allocation3], %s1083_s21 }
 0x4e0   : > { %p1413_p7 = pnand %p1416_p4, %p1648_p6 }
 0x4e2   : > { %p1414_p8 = pneg %p1413_p7 }
 0x4e4   : > { %1516 = dma.done.wait (%p1414_p8), %s1084_s3, 128  }
 0x4e5   : > { %1518 = vsyncadd (%p1414_p8), %s1084_s3, 4294967168  ;;  %s1906_s2 = sld [smem:[#allocation5_spill]]  ;;  %p23_p9 = scmp.ge.s32.totalorder %s1631_s14, 4  }
 0x4e6   : > { %s1907_s25 = smov %s1525_s26  ;;  %s1908_s26 = smov %s1529_s27 }
 0x4e7   : > { %s1910_s28 = smov %s1631_s14  ;;  %25 = sbr.rel (!%p23_p9) target bundleno = 8 (0x8), region = 115 }
 0x4eb   : > { %s1909_s27 = smov %s1906_s2 }
 0x4ec   :  { %1090 = vsyncpa [#allocation3], 1 }
 0x4ed   :  { %1092 = vsyncpa [#allocation3 + $0x1], 1 }

// kernel: attend_decoder_forward.5
= control target key start
LH: loop header
LB: loop body
LE: loop exit
PB: predicated region body
PF: predicated region fallthrough
CT: control target
= control target key end

     0   :  { %s2144_s29 = smov 0   ;;  %s2602_s0 = inlined_call_operand.vmem [shape: f32[2,24,64], index: 0, kind: input, shape index: {}, may-alias: {0,14}]   ;;  %s2603_s1 = inlined_call_operand.vmem [shape: f32[2,1,24], index: 1, kind: input, shape index: {}]   ;;  %s2604_s2 = inlined_call_operand.vmem [shape: f32[1,64], index: 2, kind: input, shape index: {}]   ;;  %s2605_s3 = inlined_call_operand.vmem [shape: f32[1,64], index: 3, kind: input, shape index: {}]   ;;  %s2606_s4 = inlined_call_operand.vmem [shape: bf16[64,192], index: 4, kind: input, shape index: {}]   ;;  %s2607_s5 = inlined_call_operand.vmem [shape: f32[1,192], index: 5, kind: input, shape index: {}]   ;;  %s2608_s6 = inlined_call_operand.vmem [shape: bf16[64,64], index: 6, kind: input, shape index: {}]   ;;  %s2609_s7 = inlined_call_operand.vmem [shape: f32[1,64], index: 7, kind: input, shape index: {}]   ;;  %s2610_s8 = inlined_call_operand.vmem [shape: f32[1,64], index: 8, kind: input, shape index: {}]   ;;  %s2611_s9 = inlined_call_operand.vmem [shape: f32[1,64], index: 9, kind: input, shape index: {}]   ;;  %s2612_s10 = inlined_call_operand.vmem [shape: bf16[64,256], index: 10, kind: input, shape index: {}]   ;;  %s2613_s11 = inlined_call_operand.vmem [shape: f32[1,256], index: 11, kind: input, shape index: {}]   ;;  %s2614_s12 = inlined_call_operand.vmem [shape: bf16[256,64], index: 12, kind: input, shape index: {}]   ;;  %s2615_s13 = inlined_call_operand.vmem [shape: f32[1,64], index: 13, kind: input, shape index: {}]   ;;  %s2616_s14 = inlined_call_operand.vmem [shape: f32[2,24,64], index: 14, kind: output, shape index: {}, may-alias: {0,14}]  }
   0x1 LB: > { %s1726_s30 = sadd.s32 4294967295, %s2058_s29   ;;  %p1730_p0 = scmp.ge.s32.totalorder %s2058_s29, 1  ;;  %s2058_s29 = sphi %s2144_s29, %s24_s29  }
   0x2   : > { %p420_p1 = scmp.lt.s32.totalorder %s2058_s29, 3 }
   0x4   : > { %p421_p2 = pnand %p1730_p0, %p420_p1 }
   0x5   : > { %p469_p3 = scmp.lt.s32.totalorder (!%p421_p2), %s1726_s30, 1  ;;  %s2061_s21 = smov (!%p421_p2), 64  }
   0x6   : > { %424 = sbr.rel (%p421_p2) target bundleno = 2419 (0x973), region = 76  ;;  %s2063_s25 = smov (!%p421_p2), 112  }
   0x7   : > { %s2064_s26 = smov (!%p421_p2), 32   ;;  %s2065_s27 = smov (!%p421_p2), 48  }
   0x8   : > { %s2066_s28 = smov (!%p421_p2), 96   ;;  %s2067_s16 = smov (!%p421_p2), 16  }
   0x9   : > { %s2068_s17 = smov (!%p421_p2), 80  }
   0xb   : > { %s2618_s30 = smov (!%p469_p3, %s1726_s30), 1  ;;  %vm488_vm0 = vcmask 523264   ;;  %v2060_v6 = vmov 64.0   ;;  %v1759_v28 = vld [vmem:[%s2606_s4 + $0x30] sm:$0xf]  ;;  %vm761_vm11 = vcmask 1043456  }
   0xc   : > { %s1953_s15 = smul.u32 24, %s2618_s30  ;;  %1977 = vrcp.f32 %v2060_v6  ;;  %v1918_v29 = vld [vmem:[%s2606_s4 + $0x34] sm:$0xf0]  ;;  %v1751_v31 = vld [vmem:[%s2606_s4 + $0x20] sm:$0xf]  ;;  %vm688_vm12 = vcmask 130048   ;;  %s476_s24 = scalar_lea.vmem %s2603_s1, %s2618_s30 }
   0xd   : > { %v1760_v30 = vor.u32 %v1918_v29, %v1759_v28  ;;  %v1916_v32 = vld [vmem:[%s2606_s4 + $0x24] sm:$0xf0]  ;;  %v1743_v34 = vld [vmem:[%s2606_s4 + $0x10] sm:$0xf]  ;;  %v1914_v35 = vld [vmem:[%s2606_s4 + $0x14] sm:$0xf0] }
   0xe   : > { %s2160_s18 = scalar_lea.vmem %s2602_s0, %s1953_s15  ;;  %v1752_v33 = vor.u32 %v1916_v32, %v1751_v31  ;;  %v1744_v36 = vor.u32 %v1914_v35, %v1743_v34  ;;  %v1735_v39 = vld [vmem:[%s2606_s4] sm:$0xf]  ;;  %v1912_v40 = vld [vmem:[%s2606_s4 + $0x4] sm:$0xf0]  ;;  %v1917_v48 = vld [vmem:[%s2606_s4 + $0x34] sm:$0xf] }
   0xf   : > { %v2163_v0 = vld [vmem:[%s2160_s18] sm:$0xff]  ;;  %v485_v1 = vld [vmem:[%s2160_s18 + $0x10] sm:$0xff]  ;;  %v2170_v4 = vld [vmem:[%s2160_s18 + $0x8] sm:$0xff]  ;;  %640 = vmatpush.bf16.msra.mxu0 %v1760_v30  ;;  %1947 = vmatpush.bf16.msra.mxu1 %v1760_v30  ;;  %v1736_v41 = vor.u32 %v1912_v40, %v1735_v39  ;;  %vm719_vm14 = vcmask 195584  }
  0x10   : > { %v489_v2 = vsel %vm488_vm0, %v2163_v0, 0.0  ;;  %v495_v3 = vsel %vm488_vm0, %v485_v1, 0.0  ;;  %v492_v5 = vsel %vm488_vm0, %v2170_v4, 0.0  ;;  %v1761_v49 = vld [vmem:[%s2606_s4 + $0x38] sm:$0xf0] }
  0x11   : > { %490 = vadd.xlane.f32.xlu0 %v489_v2  ;;  %496 = vadd.xlane.f32.xlu1 %v495_v3  ;;  %v1764_v51 = vor.u32 %v1917_v48, %v1761_v49  ;;  %v1915_v52 = vld [vmem:[%s2606_s4 + $0x24] sm:$0xf]  ;;  %v1753_v53 = vld [vmem:[%s2606_s4 + $0x28] sm:$0xf0]  ;;  %v1913_v58 = vld [vmem:[%s2606_s4 + $0x14] sm:$0xf] }
  0x12   : > { %v1978_v7 = vpop.eup %1977  ;;  %v1756_v56 = vor.u32 %v1915_v52, %v1753_v53  ;;  %v1745_v59 = vld [vmem:[%s2606_s4 + $0x18] sm:$0xf0]  ;;  %v1911_v3 = vld [vmem:[%s2606_s4 + $0x4] sm:$0xf] }
  0x13   : > { %v499_v8 = vmul.f32 64.0, %v1978_v7  ;;  %vm503_vm1 = vweird.f32 %v1978_v7  ;;  %641 = vmatpush.bf16.msra.mxu0 %v1752_v33  ;;  %1948 = vmatpush.bf16.msra.mxu1 %v1752_v33  ;;  %v1748_v2 = vor.u32 %v1913_v58, %v1745_v59 }
  0x15   : > { %v500_v9 = vsub.f32 1.0, %v499_v8 }
  0x17   : > { %v501_v10 = vmul.f32 %v1978_v7, %v500_v9  ;;  %642 = vmatpush.bf16.msra.mxu0 %v1744_v36  ;;  %1949 = vmatpush.bf16.msra.mxu1 %v1744_v36  ;;  %v584_v36 = vld [vmem:[%s2607_s5] sm:$0x3] }
  0x19   : > { %493 = vadd.xlane.f32.xlu0 %v492_v5  ;;  %v502_v11 = vadd.f32 %v1978_v7, %v501_v10  ;;  %v1737_v5 = vld [vmem:[%s2606_s4 + $0x8] sm:$0xf0] }
  0x1a   : > { %v1740_v9 = vor.u32 %v1911_v3, %v1737_v5 }
  0x1b   : > { %v2174_v12 = vsel %vm503_vm1, %v1978_v7, %v502_v11  ;;  %643 = vmatpush.bf16.msra.mxu0 %v1736_v41  ;;  %1950 = vmatpush.bf16.msra.mxu1 %v1736_v41 }
  0x1f   : > { %658 = vmatpush.bf16.msrb.mxu1 %v1764_v51 }
  0x23   : > { %659 = vmatpush.bf16.msrb.mxu1 %v1756_v56 }
  0x27   : > { %660 = vmatpush.bf16.msrb.mxu1 %v1748_v2 }
  0x2b   : > { %661 = vmatpush.bf16.msrb.mxu1 %v1740_v9 }
  0x84   : > { %v491_v13 = vpop.xlane.xlu0 %490  ;;  %v497_v17 = vpop.xlane.xlu1 %496 }
  0x85   : > { %v505_v14 = vmul.f32 %v2174_v12, %v491_v13  ;;  %v507_v21 = vmul.f32 %v2174_v12, %v497_v17 }
  0x87   : > { %v2178_v15 = vsub.f32 %v2163_v0, %v505_v14  ;;  %v2188_v23 = vsub.f32 %v485_v1, %v507_v21  ;;  %v1971_v14 = vld [vmem:[%s2604_s2] ss:$0 sm:$0xff] }
  0x89   : > { %v511_v16 = vmul.f32 %v2178_v15, %v2178_v15  ;;  %v513_v26 = vmul.f32 %v2188_v23, %v2188_v23 }
  0x8b   : > { %v514_v18 = vsel %vm488_vm0, %v511_v16, 0.0  ;;  %v520_v27 = vsel %vm488_vm0, %v513_v26, 0.0 }
  0x8c   : > { %515 = vadd.xlane.f32.xlu1 %v514_v18  ;;  %v494_v19 = vpop.xlane.xlu0 %493 }
  0x8d   : > { %v506_v20 = vmul.f32 %v2174_v12, %v494_v19 }
  0x8f   : > { %v2186_v22 = vsub.f32 %v2170_v4, %v506_v20 }
  0x91   : > { %v512_v24 = vmul.f32 %v2186_v22, %v2186_v22 }
  0x93   : > { %v517_v25 = vsel %vm488_vm0, %v512_v24, 0.0  ;;  %v1972_v24 = vld [vmem:[%s2605_s3] ss:$0 sm:$0xff] }
  0x94   : > { %518 = vadd.xlane.f32.xlu2 %v517_v25 }
  0x9c   : > { %521 = vadd.xlane.f32.xlu2 %v520_v27 }
  0xff   : > { %v516_v37 = vpop.xlane.xlu1 %515 }
 0x100   : > { %v523_v38 = vmul.f32 %v516_v37, %v2174_v12  ;;  %v586_v37 = vperm.slane %v584_v36, 0 }
 0x102   : > { %v526_v42 = vadd.f32 1e-05, %v523_v38 }
 0x104   : > { %1979 = vrsqrt.f32 %v526_v42  ;;  %vm535_vm3 = vweird.f32 %v526_v42 }
 0x107   : > { %v519_v43 = vpop.xlane.xlu2 %518 }
 0x108   : > { %v524_v44 = vmul.f32 %v519_v43, %v2174_v12 }
 0x10a   : > { %v1980_v45 = vpop.eup %1979  ;;  %v527_v46 = vadd.f32 1e-05, %v524_v44 }
 0x10b   : > { %v530_v47 = vmul.f32 %v1980_v45, %v526_v42  ;;  %vm536_vm2 = vweird.f32 %v1980_v45 }
 0x10c   : > { %1981 = vrsqrt.f32 %v527_v46  ;;  %vm537_vm4 = vmor %vm535_vm3, %vm536_vm2  ;;  %vm545_vm6 = vweird.f32 %v527_v46 }
 0x10d   : > { %v531_v50 = vmul.f32 %v1980_v45, %v530_v47  ;;  %v587_v47 = vperm.slane %v584_v36, 1 }
 0x10f   : > { %v532_v54 = vmul.f32 0.5, %v531_v50  ;;  %v522_v55 = vpop.xlane.xlu2 %521 }
 0x110   : > { %v525_v57 = vmul.f32 %v522_v55, %v2174_v12 }
 0x111   : > { %v533_v60 = vsub.f32 1.5, %v532_v54 }
 0x112   : > { %v1982_v61 = vpop.eup %1981  ;;  %v528_v62 = vadd.f32 1e-05, %v525_v57 }
 0x113   : > { %v534_v63 = vmul.f32 %v1980_v45, %v533_v60  ;;  %v540_v1 = vmul.f32 %v1982_v61, %v527_v46  ;;  %vm546_vm5 = vweird.f32 %v1982_v61  ;;  %v672_v60 = vld [vmem:[%s476_s24] sm:$0x1] }
 0x114   : > { %1983 = vrsqrt.f32 %v528_v62  ;;  %vm547_vm7 = vmor %vm545_vm6, %vm546_vm5  ;;  %vm555_vm9 = vweird.f32 %v528_v62  ;;  %vm673_vm13 = vcmp.eq.f32.partialorder %v672_v60, 0.0 }
 0x115   : > { %v541_v6 = vmul.f32 %v1982_v61, %v540_v1  ;;  %v538_v7 = vsel %vm537_vm4, %v1980_v45, %v534_v63 }
 0x116   : > { %v559_v13 = vmul.f32 %v538_v7, %v2178_v15 }
 0x117   : > { %v542_v8 = vmul.f32 0.5, %v541_v6 }
 0x118   : > { %v565_v21 = vmul.f32 %v1971_v14, %v559_v13 }
 0x119   : > { %v543_v10 = vsub.f32 1.5, %v542_v8 }
 0x11a   : > { %v1984_v11 = vpop.eup %1983  ;;  %v571_v27 = vadd.f32 %v1972_v24, %v565_v21 }
 0x11b   : > { %v544_v16 = vmul.f32 %v1982_v61, %v543_v10  ;;  %v550_v17 = vmul.f32 %v1984_v11, %v528_v62  ;;  %vm556_vm8 = vweird.f32 %v1984_v11 }
 0x11c   : > { %vm557_vm10 = vmor %vm555_vm9, %vm556_vm8 }
 0x11d   : > { %v548_v18 = vsel %vm547_vm7, %v1982_v61, %v544_v16  ;;  %v551_v19 = vmul.f32 %v1984_v11, %v550_v17  ;;  %v2062_v61 = vmov 0.0  }
 0x11e   : > { %v560_v20 = vmul.f32 %v548_v18, %v2186_v22  ;;  %v674_v62 = vsel %vm673_vm13, -1e+30, %v2062_v61 }
 0x11f   : > { %v552_v25 = vmul.f32 0.5, %v551_v19  ;;  %v2287_v63 = vperm.slane %v674_v62, 0 }
 0x120   : > { %v566_v15 = vmul.f32 %v1971_v14, %v560_v20 }
 0x121   : > { %v553_v26 = vsub.f32 1.5, %v552_v25 }
 0x122   : > { %v572_v28 = vadd.f32 %v1972_v24, %v566_v15 }
 0x123   : > { %v554_v29 = vmul.f32 %v1984_v11, %v553_v26 }
 0x124   : > { %v574_v30 = vpack.c.bf16 %v572_v28, %v571_v27 }
 0x125   : > { %v558_v31 = vsel %vm557_vm10, %v1984_v11, %v554_v29 }
 0x126   : > { %1765 = vmatmul.msk.bf16.vlgmr.msra.gmra.mxu0 %vm488_vm0, %v574_v30  ;;  %v561_v22 = vmul.f32 %v558_v31, %v2188_v23 }
 0x128   : > { %v567_v32 = vmul.f32 %v1971_v14, %v561_v22 }
 0x12a   : > { %v573_v33 = vadd.f32 %v1972_v24, %v567_v32 }
 0x12c   : > { %v575_v34 = vpack.c.bf16 %v573_v33, %v573_v33 }
 0x12e   : > { %1766 = vmatmul.msk.bf16.vlgmr.msra.gmra.mxu1 %vm488_vm0, %v575_v34 }
 0x13e   : > { %1767 = vmatmul.msk.bf16.vlgmr.msrb.gmra.mxu1 %vm488_vm0, %v574_v30  ;;  %v1919_v30 = vld [vmem:[%s2608_s6] sm:$0xff] }
 0x14e   : > { %1768 = vmatmul.msk.bf16.gmra.mxu1 %vm488_vm0, %v575_v34 }
 0x1a3   : > { %v645_v35 = vpop.f32.mrf.mxu0 }
 0x1a4   : > { %v646_v40 = vadd.f32 %v645_v35, %v586_v37 }
 0x1ab   : > { %v647_v38 = vpop.f32.mrf.mxu0  ;;  %v650_v39 = vpop.f32.mrf.mxu1 }
 0x1ac   : > { %v648_v41 = vadd.f32 %v647_v38, %v586_v37  ;;  %v651_v23 = vadd.f32 %v650_v39, %v586_v37 }
 0x1ae   : > { %v2263_v42 = vpack.c.bf16 %v648_v41, %v646_v40  ;;  %v2265_v43 = vpack.c.bf16 %v651_v23, %v651_v23 }
 0x1b0   : > { %684 = vrot.lane.b32.xlu1 %v2263_v42, %s2061_s21  ;;  %686 = vrot.lane.b32.xlu0 %v2265_v43, %s2061_s21 }
 0x1b3   : > { %v652_v44 = vpop.f32.mrf.mxu1 }
 0x1bb   : > { %v663_v45 = vpop.f32.mrf.mxu1 }
 0x1bc   : > { %v664_v53 = vadd.f32 %v663_v45, %v587_v47 }
 0x1c3   : > { %v665_v46 = vpop.f32.mrf.mxu1 }
 0x1c4   : > { %v666_v51 = vadd.f32 %v665_v46, %v587_v47 }
 0x1c6   : > { %v2273_v54 = vpack.c.bf16 %v666_v51, %v664_v53 }
 0x1cb   : > { %v668_v48 = vpop.f32.mrf.mxu1 }
 0x1cc   : > { %v669_v49 = vadd.f32 %v668_v48, %v587_v47 }
 0x1ce   : > { %v2269_v50 = vpack.c.bf16 %v669_v49, %v669_v49 }
 0x1d0   : > { %v763_v52 = vsel %vm761_vm11, %v2269_v50, 0 }
 0x1d1   : > { %1951 = vmatpush.bf16.msra.mxu3 %v763_v52 }
 0x1d3   : > { %v670_v55 = vpop.f32.mrf.mxu1 }
 0x1d5   : > { %1952 = vmatpush.bf16.msra.mxu3 %v2273_v54 }
 0x222   : > { %v687_v56 = vpop.permute.xlu0 %686  ;;  %v685_v58 = vpop.permute.xlu1 %684 }
 0x223   : > { %v699_v57 = vsel %vm688_vm12, %v687_v56, 0  ;;  %v696_v59 = vsel %vm688_vm12, %v685_v58, 0 }
 0x224   : > { %707 = vmatpush.bf16.xpose.msra.mxu2 %v699_v57 }
 0x22c   : > { %708 = vmatpush.bf16.xpose.msra.mxu2 %v696_v59 }
 0x233   : > { %1769 = vmatmul.msk.bf16.vlgmr.msra.gmra.mxu2 %vm688_vm12, %v2263_v42 }
 0x234   : > { %771 = vmatpush.bf16.msrb.mxu2 %v763_v52 }
 0x238   : > { %772 = vmatpush.bf16.msrb.mxu2 %v2273_v54 }
 0x23c   : > { %947 = vmatpush.bf16.msra.mxu2 %v1919_v30 }
 0x243   : > { %1770 = vmatmul.msk.bf16.gmra.mxu2 %vm688_vm12, %v2265_v43 }
 0x2b6   : > { %v710_v1 = vpop.f32.mrf.mxu2 }
 0x2b7   : > { %v711_v2 = vadd.f32 %v710_v1, %v2287_v63 }
 0x2b9   : > { %v720_v3 = vsel %vm719_vm14, %v711_v2, -inf }
 0x2ba   : > { %721 = vmax.xlane.f32.xlu2 %v720_v3 }
 0x2be   : > { %v712_v5 = vpop.f32.mrf.mxu2 }
 0x2bf   : > { %v713_v6 = vadd.f32 %v712_v5, %v2287_v63 }
 0x2c1   : > { %v723_v7 = vsel %vm719_vm14, %v713_v6, -inf }
 0x2c2   : > { %724 = vmax.xlane.f32.xlu2 %v723_v7 }
 0x2c6   : > { %v715_v8 = vpop.f32.mrf.mxu2 }
 0x2c7   : > { %v716_v9 = vadd.f32 %v715_v8, %v2287_v63 }
 0x2c9   : > { %v726_v10 = vsel %vm719_vm14, %v716_v9, -inf }
 0x2ca   : > { %727 = vmax.xlane.f32.xlu2 %v726_v10 }
 0x2ce   : > { %v717_v11 = vpop.f32.mrf.mxu2 }
 0x32d   : > { %v722_v13 = vpop.xlane.xlu2 %721 }
 0x32e   : > { %v729_v14 = vsub.f32 %v711_v2, %v722_v13 }
 0x330   : > { %v732_v16 = vmul.f32 1.442695, %v729_v14 }
 0x332   : > { %1985 = vpow2.f32 %v732_v16 }
 0x335   : > { %v725_v17 = vpop.xlane.xlu2 %724 }
 0x336   : > { %v730_v18 = vsub.f32 %v713_v6, %v725_v17 }
 0x338   : > { %v1986_v19 = vpop.eup %1985  ;;  %v734_v20 = vmul.f32 1.442695, %v730_v18 }
 0x339   : > { %v738_v21 = vsel %vm719_vm14, %v1986_v19, 0.0 }
 0x33a   : > { %1987 = vpow2.f32 %v734_v20  ;;  %739 = vadd.xlane.f32.xlu0 %v738_v21 }
 0x33d   : > { %v728_v24 = vpop.xlane.xlu2 %727 }
 0x33e   : > { %v731_v25 = vsub.f32 %v716_v9, %v728_v24 }
 0x340   : > { %v1988_v15 = vpop.eup %1987  ;;  %v736_v26 = vmul.f32 1.442695, %v731_v25 }
 0x341   : > { %v741_v27 = vsel %vm719_vm14, %v1988_v15, 0.0 }
 0x342   : > { %1989 = vpow2.f32 %v736_v26  ;;  %742 = vadd.xlane.f32.xlu2 %v741_v27 }
 0x348   : > { %v1990_v28 = vpop.eup %1989 }
 0x349   : > { %v744_v29 = vsel %vm719_vm14, %v1990_v28, 0.0 }
 0x34a   : > { %745 = vadd.xlane.f32.xlu1 %v744_v29 }
 0x34e   : > { %787 = vrot.lane.b32.xlu0 %v2263_v42, %s2063_s25 }
 0x356   : > { %962 = vrot.lane.b32.xlu0 %v2263_v42, %s2064_s26 }
 0x35a   : > { %793 = vrot.lane.b32.xlu2 %v2265_v43, %s2065_s27 }
 0x35e   : > { %958 = vrot.lane.b32.xlu0 %v2263_v42, %s2066_s28 }
 0x362   : > { %791 = vrot.lane.b32.xlu2 %v2263_v42, %s2065_s27 }
 0x363   : > { %789 = vrot.lane.b32.xlu1 %v2265_v43, %s2063_s25 }
 0x36a   : > { %1106 = vrot.lane.b32.xlu2 %v2265_v43, %s2067_s16 }
 0x36b   : > { %1102 = vrot.lane.b32.xlu1 %v2265_v43, %s2068_s17 }
 0x372   : > { %964 = vrot.lane.b32.xlu2 %v2265_v43, %s2064_s26 }
 0x37a   : > { %1104 = vrot.lane.b32.xlu2 %v2263_v42, %s2067_s16 }
 0x382   : > { %1100 = vrot.lane.b32.xlu2 %v2263_v42, %s2068_s17 }
 0x38a   : > { %960 = vrot.lane.b32.xlu2 %v2265_v43, %s2066_s28 }
 0x3ad   : > { %v740_v31 = vpop.xlane.xlu0 %739 }
 0x3ae   : > { %1991 = vrcp.f32 %v740_v31 }
 0x3b4   : > { %v1992_v32 = vpop.eup %1991 }
 0x3b5   : > { %v743_v22 = vpop.xlane.xlu2 %742  ;;  %v750_v34 = vmul.f32 %v1992_v32, %v1986_v19 }
 0x3b6   : > { %1993 = vrcp.f32 %v743_v22 }
 0x3bc   : > { %v1994_v33 = vpop.eup %1993 }
 0x3bd   : > { %v751_v35 = vmul.f32 %v1994_v33, %v1988_v15  ;;  %v746_v36 = vpop.xlane.xlu1 %745  ;;  %v794_v37 = vpop.permute.xlu2 %793 }
 0x3be   : > { %1995 = vrcp.f32 %v746_v36  ;;  %v805_v38 = vsel %vm688_vm12, %v794_v37, 0 }
 0x3bf   : > { %813 = vmatpush.bf16.xpose.msrb.mxu3 %v805_v38  ;;  %v753_v39 = vpack.c.bf16 %v751_v35, %v750_v34 }
 0x3c0   : > { %v788_v46 = vpop.permute.xlu0 %787 }
 0x3c1   : > { %1771 = vmatmul.msk.bf16.vlgmr.msrb.gmra.mxu2 %vm719_vm14, %v753_v39 }
 0x3c4   : > { %v1996_v40 = vpop.eup %1995 }
 0x3c5   : > { %v792_v41 = vpop.permute.xlu2 %791  ;;  %v752_v23 = vmul.f32 %v1996_v40, %v1990_v28 }
 0x3c6   : > { %v802_v42 = vsel %vm688_vm12, %v792_v41, 0 }
 0x3c7   : > { %814 = vmatpush.bf16.xpose.msrb.mxu3 %v802_v42  ;;  %v754_v43 = vpack.c.bf16 %v752_v23, %v752_v23 }
 0x3c8   : > { %v963_v49 = vpop.permute.xlu0 %962 }
 0x3c9   : > { %1772 = vmatmul.msk.bf16.vlgmr.msra.gmra.mxu3 %vm719_vm14, %v754_v43  ;;  %v973_v52 = vsel %vm688_vm12, %v963_v49, 0 }
 0x3cd   : > { %v1107_v44 = vpop.permute.xlu2 %1106 }
 0x3ce   : > { %v1118_v45 = vsel %vm688_vm12, %v1107_v44, 0 }
 0x3cf   : > { %1126 = vmatpush.bf16.xpose.msrb.mxu2 %v1118_v45 }
 0x3d0   : > { %v959_v56 = vpop.permute.xlu0 %958 }
 0x3d5   : > { %v965_v47 = vpop.permute.xlu2 %964  ;;  %v790_v55 = vpop.permute.xlu1 %789 }
 0x3d6   : > { %v976_v48 = vsel %vm688_vm12, %v965_v47, 0 }
 0x3d7   : > { %984 = vmatpush.bf16.xpose.msra.mxu3 %v976_v48 }
 0x3d9   : > { %1773 = vmatmul.msk.bf16.vlgmr.msrb.gmra.mxu3 %vm688_vm12, %v788_v46 }
 0x3dd   : > { %v1105_v51 = vpop.permute.xlu2 %1104  ;;  %v1103_v18 = vpop.permute.xlu1 %1102 }
 0x3de   : > { %v1115_v53 = vsel %vm688_vm12, %v1105_v51, 0 }
 0x3df   : > { %985 = vmatpush.bf16.xpose.msra.mxu3 %v973_v52  ;;  %1127 = vmatpush.bf16.xpose.msrb.mxu2 %v1115_v53 }
 0x3e5   : > { %v1101_v57 = vpop.permute.xlu2 %1100 }
 0x3e9   : > { %1774 = vmatmul.msk.bf16.gmra.mxu3 %vm688_vm12, %v790_v55 }
 0x3ed   : > { %v961_v58 = vpop.permute.xlu2 %960 }
 0x3f9   : > { %1789 = vmatmul.msk.bf16.vlgmr.msra.gmra.mxu3 %vm688_vm12, %v959_v56 }
 0x409   : > { %1790 = vmatmul.msk.bf16.gmra.mxu3 %vm688_vm12, %v961_v58 }
 0x444   : > { %v774_v59 = vpop.f32.mrf.mxu2 }
 0x44c   : > { %v776_v60 = vpop.f32.mrf.mxu2  ;;  %v779_v61 = vpop.f32.mrf.mxu3 }
 0x44d   : > { %v783_v62 = vpack.c.bf16 %v776_v60, %v774_v59  ;;  %v784_v3 = vpack.c.bf16 %v779_v61, %v779_v61 }
 0x44f   : > { %1787 = vmatmul.msk.bf16.vlgmr.msra.gmra.mxu2 %vm688_vm12, %v783_v62 }
 0x454   : > { %v781_v1 = vpop.f32.mrf.mxu3 }
 0x45c   : > { %v816_v2 = vpop.f32.mrf.mxu3 }
 0x45d   : > { %v817_v5 = vadd.f32 %v816_v2, %v2287_v63 }
 0x45f   : > { %1788 = vmatmul.msk.bf16.gmra.mxu2 %vm688_vm12, %v784_v3  ;;  %v825_v6 = vsel %vm719_vm14, %v817_v5, -inf }
 0x460   : > { %826 = vmax.xlane.f32.xlu0 %v825_v6 }
 0x464   : > { %v818_v7 = vpop.f32.mrf.mxu3 }
 0x465   : > { %v819_v8 = vadd.f32 %v818_v7, %v2287_v63 }
 0x467   : > { %v828_v9 = vsel %vm719_vm14, %v819_v8, -inf }
 0x468   : > { %829 = vmax.xlane.f32.xlu1 %v828_v9 }
 0x46c   : > { %v821_v10 = vpop.f32.mrf.mxu3 }
 0x46d   : > { %v822_v11 = vadd.f32 %v821_v10, %v2287_v63 }
 0x46f   : > { %1799 = vmatmul.msk.bf16.vlgmr.msrb.gmra.mxu2 %vm688_vm12, %v1101_v57  ;;  %v831_v13 = vsel %vm719_vm14, %v822_v11, -inf }
 0x470   : > { %832 = vmax.xlane.f32.xlu2 %v831_v13 }
 0x474   : > { %v823_v14 = vpop.f32.mrf.mxu3 }
 0x47c   : > { %v987_v16 = vpop.f32.mrf.mxu3 }
 0x47d   : > { %v988_v17 = vadd.f32 %v987_v16, %v2287_v63 }
 0x47f   : > { %1800 = vmatmul.msk.bf16.gmra.mxu2 %vm688_vm12, %v1103_v18  ;;  %v996_v19 = vsel %vm719_vm14, %v988_v17, -inf }
 0x480   : > { %997 = vmax.xlane.f32.xlu2 %v996_v19 }
 0x484   : > { %v989_v20 = vpop.f32.mrf.mxu3 }
 0x485   : > { %v990_v21 = vadd.f32 %v989_v20, %v2287_v63 }
 0x487   : > { %v999_v24 = vsel %vm719_vm14, %v990_v21, -inf }
 0x488   : > { %1000 = vmax.xlane.f32.xlu0 %v999_v24 }
 0x48c   : > { %v992_v25 = vpop.f32.mrf.mxu3 }
 0x48d   : > { %v993_v58 = vadd.f32 %v992_v25, %v2287_v63 }
 0x48f   : > { %v1002_v62 = vsel %vm719_vm14, %v993_v58, -inf }
 0x494   : > { %v994_v15 = vpop.f32.mrf.mxu3 }
 0x4d2   : > { %v2345_v26 = vpop.f32.mrf.mxu2 }
 0x4d3   : > { %v827_v27 = vpop.xlane.xlu0 %826 }
 0x4d4   : > { %v834_v28 = vsub.f32 %v817_v5, %v827_v27 }
 0x4d6   : > { %v837_v29 = vmul.f32 1.442695, %v834_v28 }
 0x4d8   : > { %1997 = vpow2.f32 %v837_v29 }
 0x4da   : > { %v2347_v30 = vpop.f32.mrf.mxu2 }
 0x4db   : > { %v830_v31 = vpop.xlane.xlu1 %829 }
 0x4dc   : > { %v835_v22 = vsub.f32 %v819_v8, %v830_v31 }
 0x4de   : > { %v2349_v32 = vpop.eup %1997  ;;  %v839_v33 = vmul.f32 1.442695, %v835_v22 }
 0x4df   : > { %v843_v34 = vsel %vm719_vm14, %v2349_v32, 0.0 }
 0x4e0   : > { %1999 = vpow2.f32 %v839_v33  ;;  %844 = vadd.xlane.f32.xlu1 %v843_v34 }
 0x4e2   : > { %v2353_v35 = vpop.f32.mrf.mxu2 }
 0x4e3   : > { %v833_v36 = vpop.xlane.xlu2 %832 }
 0x4e4   : > { %v836_v37 = vsub.f32 %v822_v11, %v833_v36 }
 0x4e6   : > { %v2355_v38 = vpop.eup %1999  ;;  %v841_v39 = vmul.f32 1.442695, %v836_v37 }
 0x4e7   : > { %v846_v40 = vsel %vm719_vm14, %v2355_v38, 0.0 }
 0x4e8   : > { %2001 = vpow2.f32 %v841_v39  ;;  %847 = vadd.xlane.f32.xlu2 %v846_v40 }
 0x4ea   : > { %v956_v41 = vpop.f32.mrf.mxu2 }
 0x4ee   : > { %v2359_v23 = vpop.eup %2001 }
 0x4ef   : > { %v849_v42 = vsel %vm719_vm14, %v2359_v23, 0.0 }
 0x4f0   : > { %850 = vadd.xlane.f32.xlu2 %v849_v42 }
 0x4f2   : > { %v1129_v43 = vpop.f32.mrf.mxu2 }
 0x4f3   : > { %v1130_v44 = vadd.f32 %v1129_v43, %v2287_v63  ;;  %v998_v52 = vpop.xlane.xlu2 %997 }
 0x4f4   : > { %v1005_v53 = vsub.f32 %v988_v17, %v998_v52  ;;  %v1920_v52 = vld [vmem:[%s2608_s6 + $0x8] sm:$0xff] }
 0x4f5   : > { %v1138_v45 = vsel %vm719_vm14, %v1130_v44, -inf  ;;  %917 = vmatpush.bf16.msra.mxu1 %v1920_v52 }
 0x4f6   : > { %1139 = vmax.xlane.f32.xlu0 %v1138_v45  ;;  %v1008_v55 = vmul.f32 1.442695, %v1005_v53 }
 0x4f8   : > { %2003 = vpow2.f32 %v1008_v55 }
 0x4fa   : > { %v1131_v46 = vpop.f32.mrf.mxu2 }
 0x4fb   : > { %v1132_v47 = vadd.f32 %v1131_v46, %v2287_v63  ;;  %v1001_v56 = vpop.xlane.xlu0 %1000 }
 0x4fc   : > { %v1006_v59 = vsub.f32 %v990_v21, %v1001_v56 }
 0x4fd   : > { %v1141_v48 = vsel %vm719_vm14, %v1132_v47, -inf }
 0x4fe   : > { %1142 = vmax.xlane.f32.xlu1 %v1141_v48  ;;  %v2373_v57 = vpop.eup %2003  ;;  %v1010_v61 = vmul.f32 1.442695, %v1006_v59 }
 0x4ff   : > { %v1014_v60 = vsel %vm719_vm14, %v2373_v57, 0.0 }
 0x500   : > { %2005 = vpow2.f32 %v1010_v61 }
 0x502   : > { %v1134_v49 = vpop.f32.mrf.mxu2 }
 0x503   : > { %v1135_v1 = vadd.f32 %v1134_v49, %v2287_v63 }
 0x505   : > { %v1144_v2 = vsel %vm719_vm14, %v1135_v1, -inf }
 0x506   : > { %v2381_v3 = vpop.eup %2005 }
 0x507   : > { %v1017_v5 = vsel %vm719_vm14, %v2381_v3, 0.0 }
 0x508   : > { %1175 = vrot.lane.b32.xlu2 %v2269_v50, %s2068_s17 }
 0x50a   : > { %v1136_v51 = vpop.f32.mrf.mxu2  ;;  %864 = vrot.lane.b32.xlu0 %v2269_v50, %s2063_s25 }
 0x517   : > { %862 = vrot.lane.b32.xlu1 %v2273_v54, %s2063_s25  ;;  %s481_s25 = scalar_lea.vmem %s2616_s14, %s1953_s15 }
 0x531   : > { %1015 = vadd.xlane.f32.xlu2 %v1014_v60 }
 0x534   : > { %1003 = vmax.xlane.f32.xlu0 %v1002_v62 }
 0x539   : > { %1145 = vmax.xlane.f32.xlu2 %v1144_v2 }
 0x541   : > { %1018 = vadd.xlane.f32.xlu2 %v1017_v5 }
 0x548   : > { %1033 = vrot.lane.b32.xlu0 %v2269_v50, %s2066_s28 }
 0x553   : > { %v845_v8 = vpop.xlane.xlu1 %844 }
 0x55b   : > { %v848_v6 = vpop.xlane.xlu2 %847 }
 0x563   : > { %v851_v7 = vpop.xlane.xlu2 %850 }
 0x569   : > { %v1140_v9 = vpop.xlane.xlu0 %1139 }
 0x56a   : > { %v1147_v10 = vsub.f32 %v1130_v44, %v1140_v9 }
 0x56b   : > { %v1176_v63 = vpop.permute.xlu2 %1175 }
 0x56c   : > { %v1150_v11 = vmul.f32 1.442695, %v1147_v10  ;;  %v1185_v13 = vsel %vm761_vm11, %v1176_v63, 0 }
 0x56d   : > { %1193 = vmatpush.bf16.msrb.mxu3 %v1185_v13 }
 0x56e   : > { %2007 = vpow2.f32 %v1150_v11 }
 0x571   : > { %v1143_v14 = vpop.xlane.xlu1 %1142 }
 0x572   : > { %v1148_v16 = vsub.f32 %v1132_v47, %v1143_v14 }
 0x574   : > { %v2388_v17 = vpop.eup %2007  ;;  %v1152_v18 = vmul.f32 1.442695, %v1148_v16 }
 0x575   : > { %v1156_v19 = vsel %vm719_vm14, %v2388_v17, 0.0 }
 0x576   : > { %2009 = vpow2.f32 %v1152_v18  ;;  %1157 = vadd.xlane.f32.xlu2 %v1156_v19  ;;  %v1921_v18 = vld [vmem:[%s2608_s6 + $0x10] sm:$0xff]  ;;  %v1922_v19 = vld [vmem:[%s2608_s6 + $0x18] sm:$0xff] }
 0x577   : > { %2011 = vrcp.f32 %v848_v6  ;;  %1086 = vmatpush.bf16.msrb.mxu1 %v1921_v18  ;;  %v1929_v18 = vld [vmem:[%s2612_s10 + $0x34] sm:$0xf] }
 0x578   : > { %2013 = vrcp.f32 %v845_v8 }
 0x579   : > { %2015 = vrcp.f32 %v851_v7 }
 0x57c   : > { %v2010_v50 = vpop.eup %2009  ;;  %v865_v20 = vpop.permute.xlu0 %864 }
 0x57d   : > { %v1159_v21 = vsel %vm719_vm14, %v2010_v50, 0.0  ;;  %v874_v24 = vsel %vm761_vm11, %v865_v20, 0  ;;  %v2012_v25 = vpop.eup %2011 }
 0x57e   : > { %1160 = vadd.xlane.f32.xlu1 %v1159_v21  ;;  %882 = vmatpush.bf16.msrb.mxu0 %v874_v24  ;;  %v2014_v15 = vpop.eup %2013  ;;  %v856_v27 = vmul.f32 %v2012_v25, %v2355_v38 }
 0x57f   : > { %v855_v28 = vmul.f32 %v2014_v15, %v2349_v32  ;;  %v2016_v22 = vpop.eup %2015 }
 0x580   : > { %v857_v33 = vmul.f32 %v2016_v22, %v2359_v23 }
 0x581   : > { %v858_v31 = vpack.c.bf16 %v856_v27, %v855_v28 }
 0x582   : > { %v859_v34 = vpack.c.bf16 %v857_v33, %v857_v33 }
 0x589   : > { %v863_v29 = vpop.permute.xlu1 %862 }
 0x58a   : > { %883 = vmatpush.bf16.msrb.mxu0 %v863_v29 }
 0x58d   : > { %1775 = vmatmul.msk.bf16.vlgmr.msrb.gmra.mxu0 %vm719_vm14, %v858_v31 }
 0x58e   : > { %1031 = vrot.lane.b32.xlu2 %v2273_v54, %s2066_s28 }
 0x597   : > { %1173 = vrot.lane.b32.xlu1 %v2273_v54, %s2068_s17 }
 0x59d   : > { %1776 = vmatmul.msk.bf16.gmra.mxu0 %vm719_vm14, %v859_v34 }
 0x5a4   : > { %v1016_v36 = vpop.xlane.xlu2 %1015 }
 0x5a7   : > { %v1004_v32 = vpop.xlane.xlu0 %1003 }
 0x5a8   : > { %v1007_v37 = vsub.f32 %v993_v58, %v1004_v32 }
 0x5aa   : > { %v1012_v38 = vmul.f32 1.442695, %v1007_v37 }
 0x5ac   : > { %2017 = vpow2.f32 %v1012_v38  ;;  %v1146_v39 = vpop.xlane.xlu2 %1145 }
 0x5ad   : > { %v1149_v40 = vsub.f32 %v1135_v1, %v1146_v39 }
 0x5af   : > { %v1154_v41 = vmul.f32 1.442695, %v1149_v40 }
 0x5b1   : > { %2019 = vpow2.f32 %v1154_v41 }
 0x5b2   : > { %v2018_v42 = vpop.eup %2017 }
 0x5b3   : > { %v1020_v43 = vsel %vm719_vm14, %v2018_v42, 0.0 }
 0x5b4   : > { %1021 = vadd.xlane.f32.xlu0 %v1020_v43  ;;  %v1019_v46 = vpop.xlane.xlu2 %1018  ;;  %v1973_v43 = vld [vmem:[%s2609_s7] ss:$0 sm:$0xff] }
 0x5b5   : > { %2021 = vrcp.f32 %v1019_v46 }
 0x5b6   : > { %2023 = vrcp.f32 %v1016_v36 }
 0x5b7   : > { %v2020_v44 = vpop.eup %2019 }
 0x5b8   : > { %v1162_v54 = vsel %vm719_vm14, %v2020_v44, 0.0 }
 0x5b9   : > { %1163 = vadd.xlane.f32.xlu2 %v1162_v54 }
 0x5ba   : > { %v1034_v23 = vpop.permute.xlu0 %1033 }
 0x5bb   : > { %v1043_v45 = vsel %vm761_vm11, %v1034_v23, 0  ;;  %v2022_v48 = vpop.eup %2021 }
 0x5bc   : > { %1051 = vmatpush.bf16.msra.mxu0 %v1043_v45  ;;  %v2024_v49 = vpop.eup %2023  ;;  %v1027_v51 = vmul.f32 %v2022_v48, %v2381_v3 }
 0x5bd   : > { %v1026_v53 = vmul.f32 %v2024_v49, %v2373_v57 }
 0x5bf   : > { %v1029_v56 = vpack.c.bf16 %v1027_v51, %v1026_v53 }
 0x5e9   : > { %v1158_v47 = vpop.xlane.xlu2 %1157 }
 0x5f1   : > { %v1032_v55 = vpop.permute.xlu2 %1031  ;;  %v1161_v58 = vpop.xlane.xlu1 %1160 }
 0x5f2   : > { %1052 = vmatpush.bf16.msra.mxu0 %v1032_v55  ;;  %2025 = vrcp.f32 %v1161_v58 }
 0x5f3   : > { %2027 = vrcp.f32 %v1158_v47 }
 0x5f5   : > { %1791 = vmatmul.msk.bf16.vlgmr.msra.gmra.mxu0 %vm719_vm14, %v1029_v56 }
 0x5f6   : > { %1228 = vmatpush.bf16.msrb.mxu0 %v1922_v19 }
 0x5f8   : > { %v2026_v59 = vpop.eup %2025 }
 0x5f9   : > { %v2028_v60 = vpop.eup %2027  ;;  %v1169_v61 = vmul.f32 %v2026_v59, %v2010_v50  ;;  %v2051_v59 = vld [vmem:[%s2160_s18 + $0x10] sm:$0xff] }
 0x5fa   : > { %v1168_v62 = vmul.f32 %v2028_v60, %v2388_v17 }
 0x5fc   : > { %v1171_v3 = vpack.c.bf16 %v1169_v61, %v1168_v62 }
 0x609   : > { %v1174_v1 = vpop.permute.xlu1 %1173 }
 0x60a   : > { %v885_v2 = vpop.f32.mrf.mxu0  ;;  %1194 = vmatpush.bf16.msrb.mxu3 %v1174_v1 }
 0x60d   : > { %1801 = vmatmul.msk.bf16.vlgmr.msrb.gmra.mxu3 %vm719_vm14, %v1171_v3 }
 0x612   : > { %v887_v57 = vpop.f32.mrf.mxu0 }
 0x613   : > { %v894_v5 = vpack.c.bf16 %v887_v57, %v885_v2 }
 0x615   : > { %1781 = vmatmul.msk.bf16.vlgmr.msra.gmra.mxu1 %vm688_vm12, %v894_v5 }
 0x61a   : > { %v890_v6 = vpop.f32.mrf.mxu0 }
 0x61b   : > { %v895_v8 = vpack.c.bf16 %v890_v6, %v890_v6 }
 0x622   : > { %v892_v7 = vpop.f32.mrf.mxu0 }
 0x625   : > { %1782 = vmatmul.msk.bf16.gmra.mxu1 %vm688_vm12, %v895_v8 }
 0x627   : > { %v1022_v9 = vpop.xlane.xlu0 %1021 }
 0x628   : > { %2029 = vrcp.f32 %v1022_v9 }
 0x62c   : > { %v1164_v10 = vpop.xlane.xlu2 %1163 }
 0x62d   : > { %2031 = vrcp.f32 %v1164_v10 }
 0x62e   : > { %v2030_v63 = vpop.eup %2029 }
 0x62f   : > { %v1028_v11 = vmul.f32 %v2030_v63, %v2018_v42 }
 0x631   : > { %v1030_v13 = vpack.c.bf16 %v1028_v11, %v1028_v11 }
 0x633   : > { %v2032_v14 = vpop.eup %2031  ;;  %1792 = vmatmul.msk.bf16.gmra.mxu0 %vm719_vm14, %v1030_v13 }
 0x634   : > { %v1170_v16 = vmul.f32 %v2032_v14, %v2020_v44 }
 0x636   : > { %v1172_v17 = vpack.c.bf16 %v1170_v16, %v1170_v16  ;;  %v1835_v16 = vld [vmem:[%s2612_s10 + $0x30] sm:$0xf] }
 0x638   : > { %1802 = vmatmul.msk.bf16.gmra.mxu3 %vm719_vm14, %v1172_v17  ;;  %v1930_v17 = vld [vmem:[%s2612_s10 + $0x34] sm:$0xf0] }
 0x639   : > { %v1836_v19 = vor.u32 %v1930_v17, %v1835_v16 }
 0x63b   : > { %1398 = vmatpush.bf16.msra.mxu1 %v1836_v19 }
 0x672   : > { %v1054_v50 = vpop.f32.mrf.mxu0 }
 0x67a   : > { %v1056_v20 = vpop.f32.mrf.mxu0 }
 0x67b   : > { %v1063_v21 = vpack.c.bf16 %v1056_v20, %v1054_v50  ;;  %v1837_v50 = vld [vmem:[%s2612_s10 + $0x38] sm:$0xf0] }
 0x67c   : > { %v1840_v20 = vor.u32 %v1929_v18, %v1837_v50 }
 0x67d   : > { %1797 = vmatmul.msk.bf16.vlgmr.msrb.gmra.mxu1 %vm688_vm12, %v1063_v21  ;;  %v1827_v21 = vld [vmem:[%s2612_s10 + $0x20] sm:$0xf] }
 0x67e   : > { %1416 = vmatpush.bf16.msra.mxu2 %v1840_v20 }
 0x690   : > { %v1196_v24 = vpop.f32.mrf.mxu3 }
 0x692   : > { %v919_v25 = vpop.f32.mrf.mxu1 }
 0x693   : > { %v950_v39 = vadd.f32 %v2345_v26, %v919_v25  ;;  %v1927_v25 = vld [vmem:[%s2612_s10 + $0x24] sm:$0xf] }
 0x698   : > { %v1198_v15 = vpop.f32.mrf.mxu3 }
 0x699   : > { %v1205_v27 = vpack.c.bf16 %v1198_v15, %v1196_v24  ;;  %v1928_v24 = vld [vmem:[%s2612_s10 + $0x24] sm:$0xf0] }
 0x69a   : > { %v921_v28 = vpop.f32.mrf.mxu1  ;;  %v1828_v15 = vor.u32 %v1928_v24, %v1827_v21  ;;  %v1938_v24 = vld [vmem:[%s2614_s12 + $0x38] sm:$0xff] }
 0x69b   : > { %1807 = vmatmul.msk.bf16.vlgmr.msrb.gmra.mxu0 %vm688_vm12, %v1205_v27  ;;  %v952_v23 = vadd.f32 %v2347_v30, %v921_v28  ;;  %v1829_v27 = vld [vmem:[%s2612_s10 + $0x28] sm:$0xf0]  ;;  %1620 = vmatpush.bf16.msra.mxu3 %v1938_v24 }
 0x69c   : > { %v1832_v28 = vor.u32 %v1927_v25, %v1829_v27  ;;  %1399 = vmatpush.bf16.msra.mxu1 %v1828_v15  ;;  %v1937_v25 = vld [vmem:[%s2614_s12 + $0x30] sm:$0xff]  ;;  %v1936_v15 = vld [vmem:[%s2614_s12 + $0x28] sm:$0xff] }
 0x69d   : > { %v1945_v27 = vld [vmem:[%s2614_s12 + $0x70] sm:$0xff] }
 0x69e   : > { %1417 = vmatpush.bf16.msra.mxu2 %v1832_v28  ;;  %v1935_v28 = vld [vmem:[%s2614_s12 + $0x20] sm:$0xff] }
 0x69f   : > { %1621 = vmatpush.bf16.msra.mxu3 %v1937_v25 }
 0x6a2   : > { %v924_v29 = vpop.f32.mrf.mxu1 }
 0x6a3   : > { %v955_v30 = vadd.f32 %v2353_v35, %v924_v29  ;;  %v1819_v29 = vld [vmem:[%s2612_s10 + $0x10] sm:$0xf]  ;;  %1622 = vmatpush.bf16.msra.mxu3 %v1936_v15 }
 0x6a7   : > { %1623 = vmatpush.bf16.msra.mxu3 %v1935_v28 }
 0x6aa   : > { %v926_v31 = vpop.f32.mrf.mxu1 }
 0x6ab   : > { %v1926_v31 = vld [vmem:[%s2612_s10 + $0x14] sm:$0xf0] }
 0x6b0   : > { %v1059_v22 = vpop.f32.mrf.mxu0 }
 0x6b1   : > { %v1064_v33 = vpack.c.bf16 %v1059_v22, %v1059_v22  ;;  %v1925_v22 = vld [vmem:[%s2612_s10 + $0x14] sm:$0xf] }
 0x6b3   : > { %1798 = vmatmul.msk.bf16.gmra.mxu1 %vm688_vm12, %v1064_v33  ;;  %v1820_v33 = vor.u32 %v1926_v31, %v1819_v29  ;;  %v1944_v29 = vld [vmem:[%s2614_s12 + $0x68] sm:$0xff]  ;;  %v1934_v31 = vld [vmem:[%s2614_s12 + $0x18] sm:$0xff] }
 0x6b4   : > { %1624 = vmatpush.bf16.msra.mxu3 %v1934_v31 }
 0x6b5   : > { %1400 = vmatpush.bf16.msra.mxu1 %v1820_v33  ;;  %v1933_v33 = vld [vmem:[%s2614_s12 + $0x10] sm:$0xff] }
 0x6b8   : > { %v1061_v34 = vpop.f32.mrf.mxu0  ;;  %1625 = vmatpush.bf16.msra.mxu3 %v1933_v33 }
 0x6b9   : > { %v1821_v34 = vld [vmem:[%s2612_s10 + $0x18] sm:$0xf0] }
 0x6bb   : > { %v1201_v36 = vpop.f32.mrf.mxu3 }
 0x6bc   : > { %v1206_v32 = vpack.c.bf16 %v1201_v36, %v1201_v36  ;;  %v1824_v36 = vor.u32 %v1925_v22, %v1821_v34  ;;  %v1943_v22 = vld [vmem:[%s2614_s12 + $0x60] sm:$0xff]  ;;  %v1942_v34 = vld [vmem:[%s2614_s12 + $0x58] sm:$0xff] }
 0x6be   : > { %1808 = vmatmul.msk.bf16.gmra.mxu0 %vm688_vm12, %v1206_v32  ;;  %1418 = vmatpush.bf16.msra.mxu2 %v1824_v36  ;;  %v1932_v36 = vld [vmem:[%s2614_s12 + $0x8] sm:$0xff] }
 0x6bf   : > { %1626 = vmatpush.bf16.msra.mxu3 %v1932_v36 }
 0x6c3   : > { %v1203_v37 = vpop.f32.mrf.mxu3 }
 0x6fa   : > { %v1088_v38 = vpop.f32.mrf.mxu1 }
 0x6fb   : > { %v1097_v40 = vadd.f32 %v1088_v38, %v950_v39  ;;  %v1811_v38 = vld [vmem:[%s2612_s10] sm:$0xf]  ;;  %v1924_v39 = vld [vmem:[%s2612_s10 + $0x4] sm:$0xf0] }
 0x702   : > { %v1090_v54 = vpop.f32.mrf.mxu1 }
 0x703   : > { %v1098_v46 = vadd.f32 %v1090_v54, %v952_v23 }
 0x718   : > { %v1230_v41 = vpop.f32.mrf.mxu0 }
 0x719   : > { %v1239_v42 = vadd.f32 %v1230_v41, %v1097_v40  ;;  %v1923_v40 = vld [vmem:[%s2612_s10 + $0x4] sm:$0xf]  ;;  %v1812_v41 = vor.u32 %v1924_v39, %v1811_v38 }
 0x71a   : > { %v1931_v38 = vld [vmem:[%s2614_s12] sm:$0xff] }
 0x71b   : > { %v1242_v44 = vadd.f32 %v1239_v42, %v2163_v0  ;;  %v1813_v42 = vld [vmem:[%s2612_s10 + $0x8] sm:$0xf0]  ;;  %1401 = vmatpush.bf16.msra.mxu1 %v1812_v41  ;;  %1627 = vmatpush.bf16.msra.mxu3 %v1931_v38 }
 0x71d   : > { %v2434_v45 = vadd.f32 %v1973_v43, %v1242_v44  ;;  %v1816_v44 = vor.u32 %v1923_v40, %v1813_v42  ;;  %v1940_v40 = vld [vmem:[%s2614_s12 + $0x48] sm:$0xff] }
 0x71f   : > { %v1254_v47 = vsel %vm488_vm0, %v2434_v45, 0.0  ;;  %1419 = vmatpush.bf16.msra.mxu2 %v1816_v44 }
 0x720   : > { %1255 = vadd.xlane.f32.xlu1 %v1254_v47  ;;  %v1232_v26 = vpop.f32.mrf.mxu0 }
 0x721   : > { %v1240_v48 = vadd.f32 %v1232_v26, %v1098_v46 }
 0x723   : > { %v1243_v49 = vadd.f32 %v1240_v48, %v2170_v4 }
 0x725   : > { %v2439_v51 = vadd.f32 %v1973_v43, %v1243_v49 }
 0x727   : > { %v1257_v0 = vsel %vm488_vm0, %v2439_v51, 0.0 }
 0x728   : > { %1258 = vadd.xlane.f32.xlu2 %v1257_v0 }
 0x730   : > { %v1093_v52 = vpop.f32.mrf.mxu1 }
 0x731   : > { %v1099_v55 = vadd.f32 %v1093_v52, %v955_v30 }
 0x738   : > { %v1095_v53 = vpop.f32.mrf.mxu1 }
 0x73b   : > { %v1235_v56 = vpop.f32.mrf.mxu0 }
 0x73c   : > { %v1241_v58 = vadd.f32 %v1235_v56, %v1099_v55 }
 0x73e   : > { %v1244_v60 = vadd.f32 %v2051_v59, %v1241_v58 }
 0x740   : > { %v2445_v61 = vadd.f32 %v1973_v43, %v1244_v60  ;;  %v1974_v60 = vld [vmem:[%s2610_s8] ss:$0 sm:$0xff] }
 0x742   : > { %v1260_v4 = vsel %vm488_vm0, %v2445_v61, 0.0 }
 0x743   : > { %1261 = vadd.xlane.f32.xlu0 %v1260_v4  ;;  %v1237_v62 = vpop.f32.mrf.mxu0 }
 0x793   : > { %v1256_v1 = vpop.xlane.xlu1 %1255 }
 0x794   : > { %v1263_v2 = vmul.f32 %v1256_v1, %v2174_v12 }
 0x796   : > { %v2451_v3 = vsub.f32 %v2434_v45, %v1263_v2  ;;  %v1975_v2 = vld [vmem:[%s2611_s9] ss:$0 sm:$0xff] }
 0x798   : > { %v1269_v35 = vmul.f32 %v2451_v3, %v2451_v3 }
 0x79a   : > { %v1272_v57 = vsel %vm488_vm0, %v1269_v35, 0.0 }
 0x79b   : > { %1273 = vadd.xlane.f32.xlu2 %v1272_v57  ;;  %v1259_v5 = vpop.xlane.xlu2 %1258 }
 0x79c   : > { %v1264_v6 = vmul.f32 %v1259_v5, %v2174_v12 }
 0x79e   : > { %v2458_v7 = vsub.f32 %v2439_v51, %v1264_v6 }
 0x7a0   : > { %v1270_v8 = vmul.f32 %v2458_v7, %v2458_v7 }
 0x7a2   : > { %v1275_v9 = vsel %vm488_vm0, %v1270_v8, 0.0 }
 0x7a3   : > { %1276 = vadd.xlane.f32.xlu0 %v1275_v9 }
 0x7b6   : > { %v1262_v10 = vpop.xlane.xlu0 %1261 }
 0x7b7   : > { %v1265_v63 = vmul.f32 %v1262_v10, %v2174_v12 }
 0x7b9   : > { %v2465_v11 = vsub.f32 %v2445_v61, %v1265_v63 }
 0x7bb   : > { %v1271_v13 = vmul.f32 %v2465_v11, %v2465_v11 }
 0x7bd   : > { %v1278_v14 = vsel %vm488_vm0, %v1271_v13, 0.0 }
 0x7be   : > { %1279 = vadd.xlane.f32.xlu2 %v1278_v14 }
 0x80e   : > { %v1274_v32 = vpop.xlane.xlu2 %1273 }
 0x80f   : > { %v1281_v37 = vmul.f32 %v1274_v32, %v2174_v12  ;;  %v1342_v32 = vld [vmem:[%s2613_s11] sm:$0x3] }
 0x810   : > { %v1344_v39 = vperm.slane %v1342_v32, 0  ;;  %v1345_v44 = vperm.slane %v1342_v32, 1 }
 0x811   : > { %v1284_v43 = vadd.f32 1e-05, %v1281_v37  ;;  %v1941_v37 = vld [vmem:[%s2614_s12 + $0x50] sm:$0xff] }
 0x813   : > { %2033 = vrsqrt.f32 %v1284_v43  ;;  %vm1293_vm1 = vweird.f32 %v1284_v43 }
 0x816   : > { %v1277_v54 = vpop.xlane.xlu0 %1276 }
 0x817   : > { %v1282_v23 = vmul.f32 %v1277_v54, %v2174_v12  ;;  %v1939_v54 = vld [vmem:[%s2614_s12 + $0x40] sm:$0xff] }
 0x819   : > { %v2034_v46 = vpop.eup %2033  ;;  %v1285_v47 = vadd.f32 1e-05, %v1282_v23 }
 0x81a   : > { %v1288_v26 = vmul.f32 %v2034_v46, %v1284_v43  ;;  %vm1294_vm15 = vweird.f32 %v2034_v46 }
 0x81b   : > { %2035 = vrsqrt.f32 %v1285_v47  ;;  %vm1295_vm2 = vmor %vm1293_vm1, %vm1294_vm15  ;;  %vm1303_vm4 = vweird.f32 %v1285_v47 }
 0x81c   : > { %v1289_v48 = vmul.f32 %v2034_v46, %v1288_v26 }
 0x81e   : > { %v1290_v49 = vmul.f32 0.5, %v1289_v48 }
 0x820   : > { %v1291_v0 = vsub.f32 1.5, %v1290_v49 }
 0x821   : > { %v2036_v52 = vpop.eup %2035 }
 0x822   : > { %v1292_v30 = vmul.f32 %v2034_v46, %v1291_v0  ;;  %v1298_v53 = vmul.f32 %v2036_v52, %v1285_v47  ;;  %vm1304_vm3 = vweird.f32 %v2036_v52 }
 0x823   : > { %vm1305_vm5 = vmor %vm1303_vm4, %vm1304_vm3 }
 0x824   : > { %v1299_v55 = vmul.f32 %v2036_v52, %v1298_v53  ;;  %v1296_v56 = vsel %vm1295_vm2, %v2034_v46, %v1292_v30 }
 0x825   : > { %v1317_v4 = vmul.f32 %v1296_v56, %v2451_v3 }
 0x826   : > { %v1300_v58 = vmul.f32 0.5, %v1299_v55 }
 0x827   : > { %v1323_v35 = vmul.f32 %v1974_v60, %v1317_v4 }
 0x828   : > { %v1301_v59 = vsub.f32 1.5, %v1300_v58 }
 0x829   : > { %v1329_v6 = vadd.f32 %v1975_v2, %v1323_v35 }
 0x82a   : > { %v1302_v62 = vmul.f32 %v2036_v52, %v1301_v59 }
 0x82c   : > { %v1306_v1 = vsel %vm1305_vm5, %v2036_v52, %v1302_v62 }
 0x82d   : > { %v1318_v57 = vmul.f32 %v1306_v1, %v2458_v7 }
 0x82f   : > { %v1324_v5 = vmul.f32 %v1974_v60, %v1318_v57 }
 0x831   : > { %v1330_v8 = vadd.f32 %v1975_v2, %v1324_v5  ;;  %v1280_v9 = vpop.xlane.xlu2 %1279 }
 0x832   : > { %v1283_v10 = vmul.f32 %v1280_v9, %v2174_v12 }
 0x833   : > { %v1332_v63 = vpack.c.bf16 %v1330_v8, %v1329_v6 }
 0x834   : > { %v1286_v13 = vadd.f32 1e-05, %v1283_v10 }
 0x835   : > { %1841 = vmatmul.msk.bf16.vlgmr.msra.gmra.mxu1 %vm488_vm0, %v1332_v63  ;;  %1843 = vmatmul.msk.bf16.vlgmr.msra.gmra.mxu2 %vm488_vm0, %v1332_v63 }
 0x836   : > { %2037 = vrsqrt.f32 %v1286_v13  ;;  %vm1313_vm7 = vweird.f32 %v1286_v13 }
 0x83c   : > { %v2038_v3 = vpop.eup %2037 }
 0x83d   : > { %v1308_v14 = vmul.f32 %v2038_v3, %v1286_v13  ;;  %vm1314_vm6 = vweird.f32 %v2038_v3 }
 0x83e   : > { %vm1315_vm8 = vmor %vm1313_vm7, %vm1314_vm6 }
 0x83f   : > { %v1309_v16 = vmul.f32 %v2038_v3, %v1308_v14 }
 0x841   : > { %v1310_v17 = vmul.f32 0.5, %v1309_v16 }
 0x843   : > { %v1311_v18 = vsub.f32 1.5, %v1310_v17 }
 0x845   : > { %v1312_v7 = vmul.f32 %v2038_v3, %v1311_v18 }
 0x847   : > { %v1316_v19 = vsel %vm1315_vm8, %v2038_v3, %v1312_v7 }
 0x848   : > { %v1319_v50 = vmul.f32 %v1316_v19, %v2465_v11  ;;  %v1946_v11 = vld [vmem:[%s2614_s12 + $0x78] sm:$0xff] }
 0x849   : > { %1638 = vmatpush.bf16.msra.mxu0 %v1946_v11 }
 0x84a   : > { %v1325_v12 = vmul.f32 %v1974_v60, %v1319_v50 }
 0x84c   : > { %v1331_v20 = vadd.f32 %v1975_v2, %v1325_v12 }
 0x84d   : > { %1639 = vmatpush.bf16.msra.mxu0 %v1945_v27 }
 0x84e   : > { %v1333_v21 = vpack.c.bf16 %v1331_v20, %v1331_v20 }
 0x850   : > { %1842 = vmatmul.msk.bf16.gmra.mxu1 %vm488_vm0, %v1333_v21  ;;  %1844 = vmatmul.msk.bf16.gmra.mxu2 %vm488_vm0, %v1333_v21 }
 0x851   : > { %1640 = vmatpush.bf16.msra.mxu0 %v1944_v29 }
 0x855   : > { %1641 = vmatpush.bf16.msra.mxu0 %v1943_v22 }
 0x859   : > { %1642 = vmatpush.bf16.msra.mxu0 %v1942_v34 }
 0x85d   : > { %1643 = vmatpush.bf16.msra.mxu0 %v1941_v37 }
 0x861   : > { %1644 = vmatpush.bf16.msra.mxu0 %v1940_v40 }
 0x865   : > { %1645 = vmatpush.bf16.msra.mxu0 %v1939_v54 }
 0x8b2   : > { %v1403_v41 = vpop.f32.mrf.mxu1 }
 0x8b3   : > { %v1404_v42 = vadd.f32 %v1403_v41, %v1344_v39 }
 0x8b5   : > { %v1436_v43 = vmul.f32 0.044715, %v1404_v42  ;;  %v1430_v16 = vmul.f32 0.5, %v1404_v42 }
 0x8b7   : > { %v1442_v23 = vmul.f32 %v1436_v43, %v1404_v42 }
 0x8b8   : > { %v1421_v46 = vpop.f32.mrf.mxu2 }
 0x8b9   : > { %v1448_v47 = vmul.f32 %v1442_v23, %v1404_v42  ;;  %v1422_v26 = vadd.f32 %v1421_v46, %v1345_v44 }
 0x8ba   : > { %v1405_v48 = vpop.f32.mrf.mxu1 }
 0x8bb   : > { %v1454_v49 = vadd.f32 %v1448_v47, %v1404_v42  ;;  %v1437_v0 = vmul.f32 0.044715, %v1422_v26  ;;  %v1406_v52 = vadd.f32 %v1405_v48, %v1344_v39  ;;  %v1431_v15 = vmul.f32 0.5, %v1422_v26 }
 0x8bd   : > { %v1443_v30 = vmul.f32 %v1437_v0, %v1422_v26  ;;  %v1438_v53 = vmul.f32 0.044715, %v1406_v52  ;;  %v1460_v55 = vmul.f32 0.7978846, %v1454_v49  ;;  %v1432_v17 = vmul.f32 0.5, %v1406_v52 }
 0x8bf   : > { %v1449_v56 = vmul.f32 %v1443_v30, %v1422_v26  ;;  %v1444_v58 = vmul.f32 %v1438_v53, %v1406_v52  ;;  %2039 = vtanh.f32 %v1460_v55  ;;  %v1976_v30 = vld [vmem:[%s2615_s13] ss:$0 sm:$0xff] }
 0x8c0   : > { %v1423_v59 = vpop.f32.mrf.mxu2 }
 0x8c1   : > { %v1455_v60 = vadd.f32 %v1449_v56, %v1422_v26  ;;  %v1450_v4 = vmul.f32 %v1444_v58, %v1406_v52  ;;  %v1424_v62 = vadd.f32 %v1423_v59, %v1345_v44 }
 0x8c3   : > { %v1456_v1 = vadd.f32 %v1450_v4, %v1406_v52  ;;  %v1439_v2 = vmul.f32 0.044715, %v1424_v62  ;;  %v1461_v35 = vmul.f32 0.7978846, %v1455_v60  ;;  %v1433_v28 = vmul.f32 0.5, %v1424_v62 }
 0x8c5   : > { %v1462_v57 = vmul.f32 0.7978846, %v1456_v1  ;;  %v1445_v5 = vmul.f32 %v1439_v2, %v1424_v62  ;;  %v2040_v8 = vpop.eup %2039 }
 0x8c6   : > { %v1472_v63 = vadd.f32 1.0, %v2040_v8 }
 0x8c7   : > { %v1451_v6 = vmul.f32 %v1445_v5, %v1424_v62  ;;  %2041 = vtanh.f32 %v1462_v57 }
 0x8c8   : > { %2043 = vtanh.f32 %v1461_v35  ;;  %v1478_v19 = vmul.f32 %v1472_v63, %v1430_v16 }
 0x8c9   : > { %v1457_v9 = vadd.f32 %v1451_v6, %v1424_v62 }
 0x8cb   : > { %v1463_v10 = vmul.f32 0.7978846, %v1457_v9 }
 0x8cd   : > { %v2042_v13 = vpop.eup %2041  ;;  %v1408_v3 = vpop.f32.mrf.mxu1  ;;  %2045 = vtanh.f32 %v1463_v10 }
 0x8ce   : > { %v1409_v14 = vadd.f32 %v1408_v3, %v1344_v39  ;;  %v1474_v18 = vadd.f32 1.0, %v2042_v13  ;;  %v2044_v7 = vpop.eup %2043 }
 0x8cf   : > { %v1473_v21 = vadd.f32 1.0, %v2044_v7 }
 0x8d0   : > { %v1480_v50 = vmul.f32 %v1474_v18, %v1432_v17  ;;  %v1440_v12 = vmul.f32 0.044715, %v1409_v14 }
 0x8d1   : > { %v1479_v33 = vmul.f32 %v1473_v21, %v1431_v15 }
 0x8d2   : > { %v1484_v20 = vpack.c.bf16 %v1480_v50, %v1478_v19  ;;  %v1446_v24 = vmul.f32 %v1440_v12, %v1409_v14 }
 0x8d3   : > { %v2046_v25 = vpop.eup %2045  ;;  %v1426_v11 = vpop.f32.mrf.mxu2 }
 0x8d4   : > { %v1427_v27 = vadd.f32 %v1426_v11, %v1345_v44  ;;  %1628 = vmatmul.bf16.vlgmr.msra.gmra.mxu3 %v1484_v20  ;;  %v1475_v29 = vadd.f32 1.0, %v2046_v25  ;;  %v1452_v31 = vmul.f32 %v1446_v24, %v1409_v14  ;;  %v1434_v44 = vmul.f32 0.5, %v1409_v14 }
 0x8d5   : > { %v1410_v22 = vpop.f32.mrf.mxu1 }
 0x8d6   : > { %v1481_v34 = vmul.f32 %v1475_v29, %v1433_v28  ;;  %v1458_v36 = vadd.f32 %v1452_v31, %v1409_v14  ;;  %v1441_v32 = vmul.f32 0.044715, %v1427_v27  ;;  %v1435_v48 = vmul.f32 0.5, %v1427_v27 }
 0x8d8   : > { %v1485_v37 = vpack.c.bf16 %v1481_v34, %v1479_v33  ;;  %v1464_v38 = vmul.f32 0.7978846, %v1458_v36  ;;  %v1447_v39 = vmul.f32 %v1441_v32, %v1427_v27 }
 0x8da   : > { %1646 = vmatmul.bf16.vlgmr.msra.gmra.mxu0 %v1485_v37  ;;  %2047 = vtanh.f32 %v1464_v38  ;;  %v1453_v40 = vmul.f32 %v1447_v39, %v1427_v27 }
 0x8db   : > { %v1428_v41 = vpop.f32.mrf.mxu2 }
 0x8dc   : > { %v1459_v42 = vadd.f32 %v1453_v40, %v1427_v27 }
 0x8de   : > { %v1465_v43 = vmul.f32 0.7978846, %v1459_v42 }
 0x8e0   : > { %v2048_v54 = vpop.eup %2047  ;;  %2049 = vtanh.f32 %v1465_v43 }
 0x8e1   : > { %v1476_v23 = vadd.f32 1.0, %v2048_v54 }
 0x8e3   : > { %v1482_v46 = vmul.f32 %v1476_v23, %v1434_v44 }
 0x8e5   : > { %v1486_v47 = vpack.c.bf16 %v1482_v46, %v1482_v46 }
 0x8e6   : > { %v2050_v26 = vpop.eup %2049 }
 0x8e7   : > { %1633 = vmatmul.bf16.gmra.mxu3 %v1486_v47  ;;  %v1477_v49 = vadd.f32 1.0, %v2050_v26 }
 0x8e9   : > { %v1483_v0 = vmul.f32 %v1477_v49, %v1435_v48 }
 0x8eb   : > { %v1487_v52 = vpack.c.bf16 %v1483_v0, %v1483_v0 }
 0x8ed   : > { %1651 = vmatmul.bf16.gmra.mxu0 %v1487_v52 }
 0x957   : > { %v1629_v53 = vpop.f32.mrf.mxu3  ;;  %v1647_v55 = vpop.f32.mrf.mxu0 }
 0x958   : > { %v1630_v56 = vadd.f32 %v1976_v30, %v1629_v53 }
 0x95a   : > { %v1648_v58 = vadd.f32 %v1647_v55, %v1630_v56 }
 0x95c   : > { %v1656_v59 = vadd.f32 %v1648_v58, %v2434_v45 }
 0x95e   : > { %1659 = vst.msk [vmem:[%s481_s25] sm:$0xff] %vm488_vm0, %v1656_v59 }
 0x95f   : > { %v1631_v60 = vpop.f32.mrf.mxu3  ;;  %v1649_v62 = vpop.f32.mrf.mxu0 }
 0x960   : > { %v1632_v4 = vadd.f32 %v1976_v30, %v1631_v60 }
 0x962   : > { %v1650_v1 = vadd.f32 %v1649_v62, %v1632_v4 }
 0x964   : > { %v1657_v2 = vadd.f32 %v1650_v1, %v2439_v51 }
 0x966   : > { %1660 = vst.msk [vmem:[%s481_s25 + $0x8] sm:$0xff] %vm488_vm0, %v1657_v2 }
 0x96a   : > { %v1634_v35 = vpop.f32.mrf.mxu3  ;;  %v1652_v57 = vpop.f32.mrf.mxu0 }
 0x96b   : > { %v1635_v5 = vadd.f32 %v1976_v30, %v1634_v35 }
 0x96d   : > { %v1653_v6 = vadd.f32 %v1652_v57, %v1635_v5 }
 0x96f   : > { %v1658_v8 = vadd.f32 %v1653_v6, %v2445_v61 }
 0x971   : > { %1661 = vst.msk [vmem:[%s481_s25 + $0x10] sm:$0xff] %vm488_vm0, %v1658_v8 }
 0x972   : > { %v1636_v9 = vpop.f32.mrf.mxu3  ;;  %v1654_v45 = vpop.f32.mrf.mxu0 }
 0x973 PF: > { %s24_s29 = sadd.s32 1, %s2058_s29  }
 0x974   : > { %p21_p4 = scmp.ge.s32.totalorder %s24_s29, 4  }
 0x976   :  { %23 = sbr.rel (!%p21_p4) target bundleno = 1 (0x1), region = 109 }

// kernel: attend_decoder_forward.4
= control target key start
LH: loop header
LB: loop body
LE: loop exit
PB: predicated region body
PF: predicated region fallthrough
CT: control target
= control target key end

     0   :  { %s343_s12 = smov 0   ;;  %s375_s0 = inlined_call_operand.vmem [shape: f32[2,8,64], index: 0, kind: input, shape index: {}]   ;;  %s376_s1 = inlined_call_operand.vmem [shape: bf16[64,64], index: 1, kind: input, shape index: {}]   ;;  %s377_s2 = inlined_call_operand.vmem [shape: f32[1,64], index: 2, kind: input, shape index: {}]   ;;  %s378_s3 = inlined_call_operand.vmem [shape: f32[2,8,64], index: 3, kind: output, shape index: {}]  }
   0x1 LB: > { %s276_s13 = sadd.s32 4294967295, %s321_s12   ;;  %p280_p0 = scmp.ge.s32.totalorder %s321_s12, 1  ;;  %s321_s12 = sphi %s343_s12, %s13_s12  }
   0x2   : > { %p136_p1 = scmp.lt.s32.totalorder %s321_s12, 3 }
   0x4   : > { %p137_p2 = pnand %p280_p0, %p136_p1 }
   0x5   : > { %p158_p3 = scmp.lt.s32.totalorder (!%p137_p2), %s276_s13, 1 }
   0x6   : > { %140 = sbr.rel (%p137_p2) target bundleno = 161 (0xa1), region = 32 }
   0xb   : > { %v305_v0 = vld [vmem:[%s376_s1 + $0x18] sm:$0xff]  ;;  %v304_v1 = vld [vmem:[%s376_s1 + $0x10] sm:$0xff]  ;;  %s380_s13 = smov (!%p158_p3, %s276_s13), 1  ;;  %v303_v2 = vld [vmem:[%s376_s1 + $0x8] sm:$0xff]  ;;  %vm205_vm0 = vcmask 523264  }
   0xc   : > { %213 = vmatpush.bf16.msra.mxu0 %v305_v0  ;;  %s281_s18 = sshll.u32 %s380_s13, 3  ;;  %v302_v3 = vld [vmem:[%s376_s1] sm:$0xff] }
   0xd   : > { %s161_s23 = scalar_lea.vmem %s375_s0, %s281_s18  ;;  %v314_v6 = vld [vmem:[%s377_s2] ss:$0 sm:$0xff]  ;;  %s165_s30 = scalar_lea.vmem %s378_s3, %s281_s18 }
   0xe   : > { %v167_v4 = vld [vmem:[%s161_s23] sm:$0xff] }
   0xf   : > { %v168_v5 = vpack.c.bf16 %v167_v4, %v167_v4 }
  0x10   : > { %214 = vmatpush.bf16.msra.mxu0 %v304_v1 }
  0x14   : > { %215 = vmatpush.bf16.msra.mxu0 %v303_v2 }
  0x18   : > { %216 = vmatpush.bf16.msra.mxu0 %v302_v3 }
  0x1b   : > { %299 = vmatmul.msk.bf16.vlgmr.msra.gmra.mxu0 %vm205_vm0, %v168_v5 }
  0x98   : > { %v218_v7 = vpop.f32.mrf.mxu0 }
  0x99   : > { %v219_v8 = vadd.f32 %v314_v6, %v218_v7 }
  0x9b   : > { %222 = vst.msk [vmem:[%s165_s30] sm:$0xff] %vm205_vm0, %v219_v8 }
  0xa0   : > { %v220_v9 = vpop.f32.mrf.mxu0 }
  0xa1 PF: > { %s13_s12 = sadd.s32 1, %s321_s12  }
  0xa2   : > { %p10_p4 = scmp.ge.s32.totalorder %s13_s12, 4  }
  0xa4   :  { %12 = sbr.rel (!%p10_p4) target bundleno = 1 (0x1), region = 62 }

// kernel: attend_decoder_forward.7
= control target key start
LH: loop header
LB: loop body
LE: loop exit
PB: predicated region body
PF: predicated region fallthrough
CT: control target
= control target key end

     0   :  { %s1881_s0 = inlined_call_operand.vmem [shape: f32[2,8,64], index: 0, kind: input, shape index: {}]   ;;  %s1882_s1 = inlined_call_operand.vmem [shape: f32[1,64], index: 1, kind: input, shape index: {}]   ;;  %s1883_s2 = inlined_call_operand.vmem [shape: f32[1,64], index: 2, kind: input, shape index: {}]   ;;  %s1884_s3 = inlined_call_operand.vmem [shape: bf16[64,64], index: 3, kind: input, shape index: {}]   ;;  %s1885_s4 = inlined_call_operand.vmem [shape: f32[1,64], index: 4, kind: input, shape index: {}]   ;;  %s1886_s5 = inlined_call_operand.vmem [shape: bf16[2,64,128], index: 5, kind: input, shape index: {}]   ;;  %s1887_s6 = inlined_call_operand.vmem [shape: f32[2,1,128], index: 6, kind: input, shape index: {}]   ;;  %s1888_s7 = inlined_call_operand.vmem [shape: bf16[2,128,128], index: 7, kind: input, shape index: {}]   ;;  %s1889_s8 = inlined_call_operand.vmem [shape: f32[2,1,128], index: 8, kind: input, shape index: {}]   ;;  %s1890_s9 = inlined_call_operand.vmem [shape: bf16[2,128,64], index: 9, kind: input, shape index: {}]   ;;  %s1891_s10 = inlined_call_operand.vmem [shape: f32[2,1,64], index: 10, kind: input, shape index: {}]   ;;  %s1892_s11 = inlined_call_operand.vmem [shape: f32[2,1,64], index: 11, kind: input, shape index: {}]   ;;  %s1893_s12 = inlined_call_operand.vmem [shape: f32[2,1,64], index: 12, kind: input, shape index: {}]   ;;  %s1894_s13 = inlined_call_operand.hbm [shape: f32[2,8,8], index: 13, kind: output, shape index: {}]  }
   0x1   :  { %1895 = sst [smem:[#allocation6_spill]] %s1881_s0 }
   0x2   :  { %1896 = sst [smem:[#allocation7_spill]] %s1882_s1 }
   0x3   :  { %1897 = sst [smem:[#allocation8_spill]] %s1883_s2 }
   0x4   :  { %1898 = sst [smem:[#allocation9_spill]] %s1884_s3 }
   0x5   :  { %18 = vsyncpa [#allocation3], 0 }
   0x6   :  { %20 = vsyncpa [#allocation3 + $0x1], 0  ;;  %s1606_s25 = smov 0   ;;  %s1608_s26 = smov 0  }
   0x7   :  { %s1610_s27 = smov 0   ;;  %s1612_s28 = smov 0  }
   0x8 LB: > { %s1627_s29 = sadd.s32 4294967295, %s1533_s28   ;;  %s1131_s30 = sadd.s32 4294967294, %s1533_s28   ;;  %s1533_s28 = sphi %s1612_s28, %s1910_s28   ;;  %s1529_s27 = sphi %s1610_s27, %s1909_s27   ;;  %s1525_s26 = sphi %s1608_s26, %s1908_s26   ;;  %s1521_s25 = sphi %s1606_s25, %s1907_s25  }
   0x9   : > { %s1631_s14 = sadd.s32 1, %s1533_s28   ;;  %s311_s15 = sadd.s32 1, %s1529_s27 }
   0xa   : > { %s308_s16 = ssub.s32 %s1533_s28, %s1631_s14  ;;  %p321_p0 = scmp.ne.s32.totalorder %s1529_s27, %s1525_s26 }
   0xb   : > { %p309_p1 = scmp.eq.s32.totalorder %s308_s16, 0  ;;  %p322_p2 = scmp.eq.s32.totalorder %s1627_s29, 1 }
   0xc   : > { %p327_p3 = scmp.ne.s32.totalorder %s1525_s26, %s1521_s25  ;;  %p328_p4 = scmp.eq.s32.totalorder %s1131_s30, 1 }
   0xd   : > { %s1642_s17 = scalar_select %p309_p1, %s1529_s27, %s311_s15  }
   0xe   : > { %p1644_p5 = por %p322_p2, %p321_p0  ;;  %p1648_p6 = por %p328_p4, %p327_p3 }
   0xf   : > { %1899 = sst [smem:[#allocation5_spill]] %s1642_s17  ;;  %p1134_p7 = scmp.ge.s32.totalorder %s1533_s28, 1 }
  0x10   : > { %p389_p8 = scmp.lt.s32.totalorder %s1533_s28, 3 }
  0x12   : > { %p390_p9 = pnand %p1134_p7, %p389_p8 }
  0x13   : > { %p432_p10 = scmp.lt.s32.totalorder (!%p390_p9), %s1627_s29, 1  ;;  %s1902_s0 = sld [smem:[#allocation6_spill]] (!%p390_p9) }
  0x14   : > { %393 = sbr.rel (%p390_p9) target bundleno = 1246 (0x4de), region = 72  ;;  %s1903_s3 = sld [smem:[#allocation9_spill]] (!%p390_p9) }
  0x15   : > { %s1904_s1 = sld [smem:[#allocation7_spill]] (!%p390_p9)  ;;  %s1363_s22 = sshll.u32 (!%p390_p9), %s1627_s29, 3 }
  0x16   : > { %s1905_s2 = sld [smem:[#allocation8_spill]] (!%p390_p9) }
  0x19   : > { %s433_s20 = scalar_select %p432_p10, %s1627_s29, 1  ;;  %vm440_vm0 = vcmask 523264   ;;  %v1535_v2 = vmov 64.0   ;;  %v1373_v18 = vld [vmem:[%s1886_s5 + $0x18] sm:$0xff]  ;;  %v1372_v22 = vld [vmem:[%s1886_s5 + $0x10] sm:$0xff]  ;;  %v1371_v25 = vld [vmem:[%s1886_s5 + $0x8] sm:$0xff] }
  0x1a   : > { %1463 = vrcp.f32 %v1535_v2  ;;  %v1369_v14 = vld [vmem:[%s1903_s3 + $0x18] sm:$0xff]  ;;  %v1368_v15 = vld [vmem:[%s1903_s3 + $0x10] sm:$0xff]  ;;  %v1367_v16 = vld [vmem:[%s1903_s3 + $0x8] sm:$0xff]  ;;  %575 = vmatpush.bf16.msra.mxu1 %v1373_v18  ;;  %vm1054_vm11 = vcmask 64512  }
  0x1b   : > { %s1136_s21 = sshll.u32 %s433_s20, 3  ;;  %522 = vmatpush.bf16.msra.mxu3 %v1369_v14  ;;  %v1366_v17 = vld [vmem:[%s1903_s3] sm:$0xff]  ;;  %v1393_v19 = vld [vmem:[%s1886_s5 + $0x38] sm:$0xff]  ;;  %v1392_v23 = vld [vmem:[%s1886_s5 + $0x30] sm:$0xff] }
  0x1c   : > { %s435_s24 = scalar_lea.vmem %s1902_s0, %s1136_s21  ;;  %823 = vmatpush.bf16.msra.mxu0 %v1393_v19  ;;  %v1391_v26 = vld [vmem:[%s1886_s5 + $0x28] sm:$0xff]  ;;  %v1450_v33 = vld [vmem:[%s1904_s1] ss:$0 sm:$0xff]  ;;  %v1381_v42 = vld [vmem:[%s1888_s7 + $0x38] sm:$0xff]  ;;  %s429_s21 = sand.u32 1, %s1525_s26  }
  0x1d   : > { %v437_v0 = vld [vmem:[%s435_s24] sm:$0xff]  ;;  %v1401_v43 = vld [vmem:[%s1888_s7 + $0x78] sm:$0xff]  ;;  %653 = vmatpush.bf16.msra.mxu2 %v1381_v42  ;;  %v1380_v44 = vld [vmem:[%s1888_s7 + $0x30] sm:$0xff]  ;;  %s1135_s0 = sshll.u32 %s429_s21, 3  ;;  %s1067_s24 = scalar_lea.hbm %s1894_s13, %s1363_s22 }
  0x1e   : > { %v441_v1 = vsel %vm440_vm0, %v437_v0, 0.0  ;;  %576 = vmatpush.bf16.msra.mxu1 %v1372_v22  ;;  %v1451_v36 = vld [vmem:[%s1905_s2] ss:$0 sm:$0xff]  ;;  %v1400_v45 = vld [vmem:[%s1888_s7 + $0x70] sm:$0xff]  ;;  %v1379_v46 = vld [vmem:[%s1888_s7 + $0x28] sm:$0xff]  ;;  %s431_s30 = scalar_lea.vmem [#allocation2], %s1135_s0 }
  0x1f   : > { %442 = vadd.xlane.f32.xlu0 %v441_v1  ;;  %523 = vmatpush.bf16.msra.mxu3 %v1368_v15  ;;  %v1370_v40 = vld [vmem:[%s1886_s5] sm:$0xff]  ;;  %v1399_v47 = vld [vmem:[%s1888_s7 + $0x68] sm:$0xff]  ;;  %v1377_v50 = vld [vmem:[%s1888_s7 + $0x18] sm:$0xff]  ;;  %s1069_s15 = sshll.u32 %s431_s30, 4  ;;  %s1071_s1 = sshll.u32 %s1067_s24, 4  ;;  %s1070_s15 = int_to_ptr.vmem [resolvable:$true] %s1069_s15  ;;  %s1072_s1 = int_to_ptr.hbm [resolvable:$true] %s1071_s1 }
  0x20   : > { %v1464_v3 = vpop.eup %1463  ;;  %824 = vmatpush.bf16.msra.mxu0 %v1392_v23  ;;  %v1390_v41 = vld [vmem:[%s1886_s5 + $0x20] sm:$0xff]  ;;  %v1397_v51 = vld [vmem:[%s1888_s7 + $0x58] sm:$0xff]  ;;  %v1376_v52 = vld [vmem:[%s1888_s7 + $0x10] sm:$0xff]  ;;  %s1057_s16 = scalar_lea.sflag [#allocation3], %s429_s21  ;;  %s1485_s20 = sshra.s32 %s1072_s1, 4  ;;  %s1486_s20 = int_to_ptr.hbm [resolvable:$true] %s1485_s20 }
  0x21   : > { %v445_v4 = vmul.f32 64.0, %v1464_v3  ;;  %vm449_vm1 = vweird.f32 %v1464_v3  ;;  %654 = vmatpush.bf16.msra.mxu2 %v1380_v44  ;;  %v1378_v48 = vld [vmem:[%s1888_s7 + $0x20] sm:$0xff]  ;;  %v1396_v53 = vld [vmem:[%s1888_s7 + $0x50] sm:$0xff]  ;;  %v1375_v55 = vld [vmem:[%s1888_s7 + $0x8] sm:$0xff]  ;;  %s1487_s2 = scalar_lea.hbm %s1486_s20, 8  ;;  %s1491_s22 = scalar_lea.hbm %s1894_s13, 16 }
  0x22   : > { %577 = vmatpush.bf16.msra.mxu1 %v1371_v25  ;;  %v1398_v49 = vld [vmem:[%s1888_s7 + $0x60] sm:$0xff]  ;;  %v1395_v56 = vld [vmem:[%s1888_s7 + $0x48] sm:$0xff]  ;;  %v1409_v63 = vld [vmem:[%s1890_s9 + $0x78] sm:$0xff]  ;;  %p1488_p11 = scmp.ne.s32.totalorder %s1486_s20, %s1487_s2  ;;  %p1492_p0 = scmp.lt.s32.totalorder %s1486_s20, %s1894_s13 }
  0x23   : > { %v446_v5 = vsub.f32 1.0, %v445_v4  ;;  %524 = vmatpush.bf16.msra.mxu3 %v1367_v16  ;;  %v1452_v54 = vld [vmem:[%s1885_s4] ss:$0 sm:$0xff]  ;;  %v1408_v1 = vld [vmem:[%s1890_s9 + $0x70] sm:$0xff]  ;;  %v1387_v4 = vld [vmem:[%s1890_s9 + $0x28] sm:$0xff]  ;;  %p1493_p1 = scmp.lt.s32.totalorder %s1491_s22, %s1487_s2 }
  0x24   : > { %825 = vmatpush.bf16.msra.mxu0 %v1391_v26  ;;  %v1374_v61 = vld [vmem:[%s1888_s7] sm:$0xff]  ;;  %v1388_v2 = vld [vmem:[%s1890_s9 + $0x30] sm:$0xff]  ;;  %v1403_v14 = vld [vmem:[%s1890_s9 + $0x48] sm:$0xff]  ;;  %p1489_p12 = pnand %p1488_p11, %p1644_p5 }
  0x25   : > { %v447_v6 = vmul.f32 %v1464_v3, %v446_v5  ;;  %655 = vmatpush.bf16.msra.mxu2 %v1379_v46  ;;  %v1394_v62 = vld [vmem:[%s1888_s7 + $0x40] sm:$0xff]  ;;  %p1494_p2 = por %p1493_p1, %p1492_p0 }
  0x26   : > { %578 = vmatpush.bf16.msra.mxu1 %v1370_v40  ;;  %v1406_v5 = vld [vmem:[%s1890_s9 + $0x60] sm:$0xff]  ;;  %p1490_p13 = pneg %p1489_p12 }
  0x27   : > { %v448_v7 = vadd.f32 %v1464_v3, %v447_v6  ;;  %525 = vmatpush.bf16.msra.mxu3 %v1366_v17  ;;  %v1386_v6 = vld [vmem:[%s1890_s9 + $0x20] sm:$0xff] }
  0x28   : > { %826 = vmatpush.bf16.msra.mxu0 %v1390_v41  ;;  %v1402_v23 = vld [vmem:[%s1890_s9 + $0x40] sm:$0xff]  ;;  %p1495_p3 = pnand %p1494_p2, %p1490_p13 }
  0x29   : > { %v1660_v8 = vsel %vm449_vm1, %v1464_v3, %v448_v7  ;;  %656 = vmatpush.bf16.msra.mxu2 %v1378_v48  ;;  %v1407_v3 = vld [vmem:[%s1890_s9 + $0x68] sm:$0xff]  ;;  %v1405_v7 = vld [vmem:[%s1890_s9 + $0x58] sm:$0xff]  ;;  %v1382_v25 = vld [vmem:[%s1890_s9] sm:$0xff] }
  0x2a   : > { %903 = vmatpush.bf16.msrb.mxu1 %v1401_v43  ;;  %v1455_v26 = vld [vmem:[%s1889_s8 + $0x1] ss:$0 sm:$0xff]  ;;  %v1458_v41 = vld [vmem:[%s1891_s10] ss:$0 sm:$0xff] }
  0x2c   : > { %987 = vmatpush.bf16.msrb.mxu0 %v1409_v63 }
  0x2d   : > { %657 = vmatpush.bf16.msra.mxu2 %v1377_v50 }
  0x2e   : > { %904 = vmatpush.bf16.msrb.mxu1 %v1400_v45 }
  0x30   : > { %988 = vmatpush.bf16.msrb.mxu0 %v1408_v1 }
  0x31   : > { %658 = vmatpush.bf16.msra.mxu2 %v1376_v52 }
  0x32   : > { %905 = vmatpush.bf16.msrb.mxu1 %v1399_v47 }
  0x34   : > { %989 = vmatpush.bf16.msrb.mxu0 %v1407_v3 }
  0x35   : > { %659 = vmatpush.bf16.msra.mxu2 %v1375_v55 }
  0x36   : > { %906 = vmatpush.bf16.msrb.mxu1 %v1398_v49 }
  0x38   : > { %990 = vmatpush.bf16.msrb.mxu0 %v1406_v5 }
  0x39   : > { %660 = vmatpush.bf16.msra.mxu2 %v1374_v61 }
  0x3a   : > { %907 = vmatpush.bf16.msrb.mxu1 %v1397_v51 }
  0x3c   : > { %991 = vmatpush.bf16.msrb.mxu0 %v1405_v7 }
  0x3e   : > { %908 = vmatpush.bf16.msrb.mxu1 %v1396_v53 }
  0x42   : > { %909 = vmatpush.bf16.msrb.mxu1 %v1395_v56 }
  0x46   : > { %910 = vmatpush.bf16.msrb.mxu1 %v1394_v62 }
  0x92   : > { %v443_v9 = vpop.xlane.xlu0 %442 }
  0x93   : > { %v451_v10 = vmul.f32 %v1660_v8, %v443_v9  ;;  %v1385_v9 = vld [vmem:[%s1890_s9 + $0x18] sm:$0xff] }
  0x95   : > { %v452_v11 = vsub.f32 %v437_v0, %v451_v10  ;;  %v1389_v0 = vld [vmem:[%s1890_s9 + $0x38] sm:$0xff]  ;;  %v1404_v10 = vld [vmem:[%s1890_s9 + $0x50] sm:$0xff] }
  0x96   : > { %735 = vmatpush.bf16.msrb.mxu3 %v1389_v0  ;;  %992 = vmatpush.bf16.msrb.mxu0 %v1404_v10 }
  0x97   : > { %v453_v12 = vmul.f32 %v452_v11, %v452_v11 }
  0x99   : > { %v454_v13 = vsel %vm440_vm0, %v453_v12, 0.0  ;;  %v1453_v12 = vld [vmem:[%s1887_s6] ss:$0 sm:$0xff] }
  0x9a   : > { %455 = vadd.xlane.f32.xlu0 %v454_v13  ;;  %736 = vmatpush.bf16.msrb.mxu3 %v1388_v2  ;;  %v1454_v13 = vld [vmem:[%s1887_s6 + $0x1] ss:$0 sm:$0xff] }
  0x9b   : > { %993 = vmatpush.bf16.msrb.mxu0 %v1403_v14 }
  0x9e   : > { %737 = vmatpush.bf16.msrb.mxu3 %v1387_v4  ;;  %v1459_v4 = vld [vmem:[%s1892_s11 + $0x1] ss:$0 sm:$0xff] }
  0x9f   : > { %994 = vmatpush.bf16.msrb.mxu0 %v1402_v23 }
  0xa2   : > { %738 = vmatpush.bf16.msrb.mxu3 %v1386_v6 }
  0xa6   : > { %739 = vmatpush.bf16.msrb.mxu3 %v1385_v9 }
 0x10d   : > { %v456_v20 = vpop.xlane.xlu0 %455 }
 0x10e   : > { %v457_v21 = vmul.f32 %v456_v20, %v1660_v8 }
 0x110   : > { %v458_v24 = vadd.f32 1e-05, %v457_v21 }
 0x112   : > { %1465 = vrsqrt.f32 %v458_v24  ;;  %vm465_vm3 = vweird.f32 %v458_v24 }
 0x118   : > { %v1466_v27 = vpop.eup %1465 }
 0x119   : > { %v460_v28 = vmul.f32 %v1466_v27, %v458_v24  ;;  %vm466_vm2 = vweird.f32 %v1466_v27  ;;  %v1383_v24 = vld [vmem:[%s1890_s9 + $0x8] sm:$0xff] }
 0x11a   : > { %vm467_vm4 = vmor %vm465_vm3, %vm466_vm2 }
 0x11b   : > { %v461_v29 = vmul.f32 %v1466_v27, %v460_v28 }
 0x11d   : > { %v462_v30 = vmul.f32 0.5, %v461_v29 }
 0x11f   : > { %v463_v31 = vsub.f32 1.5, %v462_v30  ;;  %v1456_v30 = vld [vmem:[%s1889_s8] ss:$0 sm:$0xff] }
 0x121   : > { %v464_v32 = vmul.f32 %v1466_v27, %v463_v31 }
 0x123   : > { %v468_v34 = vsel %vm467_vm4, %v1466_v27, %v464_v32 }
 0x124   : > { %v469_v35 = vmul.f32 %v468_v34, %v452_v11  ;;  %v1384_v11 = vld [vmem:[%s1890_s9 + $0x10] sm:$0xff] }
 0x125   : > { %740 = vmatpush.bf16.msrb.mxu3 %v1384_v11 }
 0x126   : > { %v473_v37 = vmul.f32 %v1450_v33, %v469_v35 }
 0x128   : > { %v477_v38 = vadd.f32 %v1451_v36, %v473_v37  ;;  %v1457_v36 = vld [vmem:[%s1891_s10 + $0x1] ss:$0 sm:$0xff] }
 0x129   : > { %741 = vmatpush.bf16.msrb.mxu3 %v1383_v24 }
 0x12a   : > { %v478_v39 = vpack.c.bf16 %v477_v38, %v477_v38 }
 0x12c   : > { %1153 = vmatmul.msk.bf16.vlgmr.msra.gmra.mxu3 %vm440_vm0, %v478_v39 }
 0x12d   : > { %742 = vmatpush.bf16.msrb.mxu3 %v1382_v25 }
 0x1af   : > { %v527_v57 = vpop.f32.mrf.mxu3 }
 0x1b0   : > { %v528_v58 = vadd.f32 %v1452_v54, %v527_v57 }
 0x1b2   : > { %v531_v59 = vpack.c.bf16 %v528_v58, %v528_v58 }
 0x1b4   : > { %1170 = vmatmul.msk.bf16.vlgmr.msra.gmra.mxu1 %vm440_vm0, %v531_v59  ;;  %1260 = vmatmul.msk.bf16.vlgmr.msra.gmra.mxu0 %vm440_vm0, %v531_v59 }
 0x1b7   : > { %v529_v60 = vpop.f32.mrf.mxu3 }
 0x231   : > { %v580_v15 = vpop.f32.mrf.mxu1  ;;  %v828_v16 = vpop.f32.mrf.mxu0 }
 0x232   : > { %v581_v17 = vadd.f32 %v1453_v12, %v580_v15  ;;  %v829_v18 = vadd.f32 %v1454_v13, %v828_v16 }
 0x234   : > { %v584_v19 = vpack.c.bf16 %v581_v17, %v581_v17  ;;  %v832_v20 = vpack.c.bf16 %v829_v18, %v829_v18  ;;  %v1461_v18 = vld [vmem:[%s1892_s11] ss:$0 sm:$0xff] }
 0x236   : > { %661 = vmatmul.bf16.vlgmr.msra.gmra.mxu2 %v584_v19  ;;  %911 = vmatmul.bf16.vlgmr.msrb.gmra.mxu1 %v832_v20 }
 0x239   : > { %v582_v21 = vpop.f32.mrf.mxu1  ;;  %v830_v22 = vpop.f32.mrf.mxu0 }
 0x23a   : > { %v1462_v21 = vld [vmem:[%s1893_s12] ss:$0 sm:$0xff] }
 0x2b3   : > { %v912_v27 = vpop.f32.mrf.mxu1 }
 0x2b4   : > { %v913_v28 = vadd.f32 %v1455_v26, %v912_v27 }
 0x2b6   : > { %v916_v29 = vpack.c.bf16 %v913_v28, %v913_v28 }
 0x2b8   : > { %995 = vmatmul.bf16.vlgmr.msrb.gmra.mxu0 %v916_v29 }
 0x2b9   : > { %v662_v31 = vpop.f32.mrf.mxu2 }
 0x2ba   : > { %v663_v32 = vadd.f32 %v1456_v30, %v662_v31 }
 0x2bb   : > { %v914_v33 = vpop.f32.mrf.mxu1 }
 0x2bc   : > { %v666_v34 = vpack.c.bf16 %v663_v32, %v663_v32 }
 0x2be   : > { %743 = vmatmul.bf16.vlgmr.msrb.gmra.mxu3 %v666_v34 }
 0x2c1   : > { %v664_v35 = vpop.f32.mrf.mxu2 }
 0x335   : > { %v996_v37 = vpop.f32.mrf.mxu0 }
 0x336   : > { %v997_v38 = vadd.f32 %v1457_v36, %v996_v37 }
 0x338   : > { %v1004_v39 = vsel %vm440_vm0, %v997_v38, 0.0 }
 0x339   : > { %1005 = vadd.xlane.f32.xlu1 %v1004_v39 }
 0x33d   : > { %v998_v40 = vpop.f32.mrf.mxu0 }
 0x341   : > { %v744_v42 = vpop.f32.mrf.mxu3 }
 0x342   : > { %v745_v43 = vadd.f32 %v1458_v41, %v744_v42 }
 0x344   : > { %v750_v44 = vsel %vm440_vm0, %v745_v43, 0.0 }
 0x345   : > { %751 = vadd.xlane.f32.xlu1 %v750_v44 }
 0x349   : > { %v746_v45 = vpop.f32.mrf.mxu3 }
 0x3ac   : > { %v1006_v46 = vpop.xlane.xlu1 %1005 }
 0x3ad   : > { %v1007_v47 = vmul.f32 %v1006_v46, %v1660_v8 }
 0x3af   : > { %v1008_v48 = vsub.f32 %v997_v38, %v1007_v47 }
 0x3b1   : > { %v1009_v49 = vmul.f32 %v1008_v48, %v1008_v48 }
 0x3b3   : > { %v1010_v50 = vsel %vm440_vm0, %v1009_v49, 0.0 }
 0x3b4   : > { %1011 = vadd.xlane.f32.xlu2 %v1010_v50 }
 0x3b8   : > { %v752_v51 = vpop.xlane.xlu1 %751 }
 0x3b9   : > { %v753_v52 = vmul.f32 %v752_v51, %v1660_v8 }
 0x3bb   : > { %v754_v53 = vsub.f32 %v745_v43, %v753_v52 }
 0x3bd   : > { %v755_v54 = vmul.f32 %v754_v53, %v754_v53 }
 0x3bf   : > { %v756_v55 = vsel %vm440_vm0, %v755_v54, 0.0 }
 0x3c0   : > { %757 = vadd.xlane.f32.xlu2 %v756_v55 }
 0x427   : > { %v1012_v56 = vpop.xlane.xlu2 %1011 }
 0x428   : > { %v1013_v57 = vmul.f32 %v1012_v56, %v1660_v8 }
 0x42a   : > { %v1014_v58 = vadd.f32 1e-05, %v1013_v57 }
 0x42c   : > { %1467 = vrsqrt.f32 %v1014_v58  ;;  %vm1021_vm6 = vweird.f32 %v1014_v58 }
 0x432   : > { %v1468_v59 = vpop.eup %1467 }
 0x433   : > { %v1016_v60 = vmul.f32 %v1468_v59, %v1014_v58  ;;  %v758_v61 = vpop.xlane.xlu2 %757  ;;  %vm1022_vm5 = vweird.f32 %v1468_v59 }
 0x434   : > { %v759_v62 = vmul.f32 %v758_v61, %v1660_v8  ;;  %vm1023_vm7 = vmor %vm1021_vm6, %vm1022_vm5  ;;  %v1460_v8 = vld [vmem:[%s1893_s12 + $0x1] ss:$0 sm:$0xff] }
 0x435   : > { %v1017_v63 = vmul.f32 %v1468_v59, %v1016_v60 }
 0x436   : > { %v760_v0 = vadd.f32 1e-05, %v759_v62 }
 0x437   : > { %v1018_v1 = vmul.f32 0.5, %v1017_v63 }
 0x438   : > { %1469 = vrsqrt.f32 %v760_v0  ;;  %vm767_vm9 = vweird.f32 %v760_v0 }
 0x439   : > { %v1019_v2 = vsub.f32 1.5, %v1018_v1 }
 0x43b   : > { %v1020_v3 = vmul.f32 %v1468_v59, %v1019_v2 }
 0x43d   : > { %v1024_v5 = vsel %vm1023_vm7, %v1468_v59, %v1020_v3 }
 0x43e   : > { %v1470_v6 = vpop.eup %1469  ;;  %v1025_v7 = vmul.f32 %v1024_v5, %v1008_v48 }
 0x43f   : > { %v762_v9 = vmul.f32 %v1470_v6, %v760_v0  ;;  %vm768_vm8 = vweird.f32 %v1470_v6 }
 0x440   : > { %v1029_v10 = vmul.f32 %v1459_v4, %v1025_v7  ;;  %vm769_vm10 = vmor %vm767_vm9, %vm768_vm8 }
 0x441   : > { %v763_v11 = vmul.f32 %v1470_v6, %v762_v9 }
 0x442   : > { %v1033_v12 = vadd.f32 %v1460_v8, %v1029_v10 }
 0x443   : > { %v764_v13 = vmul.f32 0.5, %v763_v11 }
 0x444   : > { %v1034_v14 = vpack.c.bf16 %v1033_v12, %v1033_v12 }
 0x445   : > { %v765_v15 = vsub.f32 1.5, %v764_v13 }
 0x446   : > { %v1039_v16 = vsel %vm440_vm0, %v1034_v14, 0 }
 0x447   : > { %v766_v17 = vmul.f32 %v1470_v6, %v765_v15  ;;  %1048 = vmatpush.bf16.xpose.msrb.mxu2 %v1039_v16 }
 0x449   : > { %v770_v19 = vsel %vm769_vm10, %v1470_v6, %v766_v17 }
 0x44a   : > { %v771_v20 = vmul.f32 %v770_v19, %v754_v53 }
 0x44c   : > { %v775_v22 = vmul.f32 %v1461_v18, %v771_v20 }
 0x44e   : > { %v779_v23 = vadd.f32 %v1462_v21, %v775_v22 }
 0x450   : > { %v780_v24 = vpack.c.bf16 %v779_v23, %v779_v23 }
 0x452   : > { %1361 = vmatmul.msk.bf16.vlgmr.msrb.gmra.mxu2 %vm440_vm0, %v780_v24 }
 0x4d5   : > { %v1050_v25 = vpop.f32.mrf.mxu2 }
 0x4d6   : > { %1055 = vst.msk [vmem:[%s431_s30] sm:$0xff] %vm1054_vm11, %v1050_v25 }
 0x4d7   : > { %1498 = shalt.err (!%p1495_p3)
}
 0x4d8   : > { %1410 = dma.vmem_to_hbm [thread:$0]  (%p1644_p5), %s1070_s15, 128, %s1072_s1, %s1057_s16  }
 0x4dd   : > { %v1052_v26 = vpop.f32.mrf.mxu2 }
 0x4de PF: > { %p1416_p4 = scmp.ge.s32.totalorder %s1533_s28, 2  ;;  %s1083_s21 = sand.u32 1, %s1521_s25  }
 0x4df   : > { %s1084_s3 = scalar_lea.sflag [#allocation3], %s1083_s21 }
 0x4e0   : > { %p1413_p7 = pnand %p1416_p4, %p1648_p6 }
 0x4e2   : > { %p1414_p8 = pneg %p1413_p7 }
 0x4e4   : > { %1516 = dma.done.wait (%p1414_p8), %s1084_s3, 128  }
 0x4e5   : > { %1518 = vsyncadd (%p1414_p8), %s1084_s3, 4294967168  ;;  %s1906_s2 = sld [smem:[#allocation5_spill]]  ;;  %p23_p9 = scmp.ge.s32.totalorder %s1631_s14, 4  }
 0x4e6   : > { %s1907_s25 = smov %s1525_s26  ;;  %s1908_s26 = smov %s1529_s27 }
 0x4e7   : > { %s1910_s28 = smov %s1631_s14  ;;  %25 = sbr.rel (!%p23_p9) target bundleno = 8 (0x8), region = 115 }
 0x4eb   : > { %s1909_s27 = smov %s1906_s2 }
 0x4ec   :  { %1090 = vsyncpa [#allocation3], 1 }
 0x4ed   :  { %1092 = vsyncpa [#allocation3 + $0x1], 1 }

// kernel: attend_decoder_forward.5
= control target key start
LH: loop header
LB: loop body
LE: loop exit
PB: predicated region body
PF: predicated region fallthrough
CT: control target
= control target key end

     0   :  { %s2144_s29 = smov 0   ;;  %s2602_s0 = inlined_call_operand.vmem [shape: f32[2,24,64], index: 0, kind: input, shape index: {}, may-alias: {0,14}]   ;;  %s2603_s1 = inlined_call_operand.vmem [shape: f32[2,1,24], index: 1, kind: input, shape index: {}]   ;;  %s2604_s2 = inlined_call_operand.vmem [shape: f32[1,64], index: 2, kind: input, shape index: {}]   ;;  %s2605_s3 = inlined_call_operand.vmem [shape: f32[1,64], index: 3, kind: input, shape index: {}]   ;;  %s2606_s4 = inlined_call_operand.vmem [shape: bf16[64,192], index: 4, kind: input, shape index: {}]   ;;  %s2607_s5 = inlined_call_operand.vmem [shape: f32[1,192], index: 5, kind: input, shape index: {}]   ;;  %s2608_s6 = inlined_call_operand.vmem [shape: bf16[64,64], index: 6, kind: input, shape index: {}]   ;;  %s2609_s7 = inlined_call_operand.vmem [shape: f32[1,64], index: 7, kind: input, shape index: {}]   ;;  %s2610_s8 = inlined_call_operand.vmem [shape: f32[1,64], index: 8, kind: input, shape index: {}]   ;;  %s2611_s9 = inlined_call_operand.vmem [shape: f32[1,64], index: 9, kind: input, shape index: {}]   ;;  %s2612_s10 = inlined_call_operand.vmem [shape: bf16[64,256], index: 10, kind: input, shape index: {}]   ;;  %s2613_s11 = inlined_call_operand.vmem [shape: f32[1,256], index: 11, kind: input, shape index: {}]   ;;  %s2614_s12 = inlined_call_operand.vmem [shape: bf16[256,64], index: 12, kind: input, shape index: {}]   ;;  %s2615_s13 = inlined_call_operand.vmem [shape: f32[1,64], index: 13, kind: input, shape index: {}]   ;;  %s2616_s14 = inlined_call_operand.vmem [shape: f32[2,24,64], index: 14, kind: output, shape index: {}, may-alias: {0,14}]  }
   0x1 LB: > { %s1726_s30 = sadd.s32 4294967295, %s2058_s29   ;;  %p1730_p0 = scmp.ge.s32.totalorder %s2058_s29, 1  ;;  %s2058_s29 = sphi %s2144_s29, %s24_s29  }
   0x2   : > { %p420_p1 = scmp.lt.s32.totalorder %s2058_s29, 3 }
   0x4   : > { %p421_p2 = pnand %p1730_p0, %p420_p1 }
   0x5   : > { %p469_p3 = scmp.lt.s32.totalorder (!%p421_p2), %s1726_s30, 1  ;;  %s2061_s21 = smov (!%p421_p2), 64  }
   0x6   : > { %424 = sbr.rel (%p421_p2) target bundleno = 2419 (0x973), region = 76  ;;  %s2063_s25 = smov (!%p421_p2), 112  }
   0x7   : > { %s2064_s26 = smov (!%p421_p2), 32   ;;  %s2065_s27 = smov (!%p421_p2), 48  }
   0x8   : > { %s2066_s28 = smov (!%p421_p2), 96   ;;  %s2067_s16 = smov (!%p421_p2), 16  }
   0x9   : > { %s2068_s17 = smov (!%p421_p2), 80  }
   0xb   : > { %s2618_s30 = smov (!%p469_p3, %s1726_s30), 1  ;;  %vm488_vm0 = vcmask 523264   ;;  %v2060_v6 = vmov 64.0   ;;  %v1759_v28 = vld [vmem:[%s2606_s4 + $0x30] sm:$0xf]  ;;  %vm761_vm11 = vcmask 1043456  }
   0xc   : > { %s1953_s15 = smul.u32 24, %s2618_s30  ;;  %1977 = vrcp.f32 %v2060_v6  ;;  %v1918_v29 = vld [vmem:[%s2606_s4 + $0x34] sm:$0xf0]  ;;  %v1751_v31 = vld [vmem:[%s2606_s4 + $0x20] sm:$0xf]  ;;  %vm688_vm12 = vcmask 130048   ;;  %s476_s24 = scalar_lea.vmem %s2603_s1, %s2618_s30 }
   0xd   : > { %v1760_v30 = vor.u32 %v1918_v29, %v1759_v28  ;;  %v1916_v32 = vld [vmem:[%s2606_s4 + $0x24] sm:$0xf0]  ;;  %v1743_v34 = vld [vmem:[%s2606_s4 + $0x10] sm:$0xf]  ;;  %v1914_v35 = vld [vmem:[%s2606_s4 + $0x14] sm:$0xf0] }
   0xe   : > { %s2160_s18 = scalar_lea.vmem %s2602_s0, %s1953_s15  ;;  %v1752_v33 = vor.u32 %v1916_v32, %v1751_v31  ;;  %v1744_v36 = vor.u32 %v1914_v35, %v1743_v34  ;;  %v1735_v39 = vld [vmem:[%s2606_s4] sm:$0xf]  ;;  %v1912_v40 = vld [vmem:[%s2606_s4 + $0x4] sm:$0xf0]  ;;  %v1917_v48 = vld [vmem:[%s2606_s4 + $0x34] sm:$0xf] }
   0xf   : > { %v2163_v0 = vld [vmem:[%s2160_s18] sm:$0xff]  ;;  %v485_v1 = vld [vmem:[%s2160_s18 + $0x10] sm:$0xff]  ;;  %v2170_v4 = vld [vmem:[%s2160_s18 + $0x8] sm:$0xff]  ;;  %640 = vmatpush.bf16.msra.mxu0 %v1760_v30  ;;  %1947 = vmatpush.bf16.msra.mxu1 %v1760_v30  ;;  %v1736_v41 = vor.u32 %v1912_v40, %v1735_v39  ;;  %vm719_vm14 = vcmask 195584  }
  0x10   : > { %v489_v2 = vsel %vm488_vm0, %v2163_v0, 0.0  ;;  %v495_v3 = vsel %vm488_vm0, %v485_v1, 0.0  ;;  %v492_v5 = vsel %vm488_vm0, %v2170_v4, 0.0  ;;  %v1761_v49 = vld [vmem:[%s2606_s4 + $0x38] sm:$0xf0] }
  0x11   : > { %490 = vadd.xlane.f32.xlu0 %v489_v2  ;;  %496 = vadd.xlane.f32.xlu1 %v495_v3  ;;  %v1764_v51 = vor.u32 %v1917_v48, %v1761_v49  ;;  %v1915_v52 = vld [vmem:[%s2606_s4 + $0x24] sm:$0xf]  ;;  %v1753_v53 = vld [vmem:[%s2606_s4 + $0x28] sm:$0xf0]  ;;  %v1913_v58 = vld [vmem:[%s2606_s4 + $0x14] sm:$0xf] }
  0x12   : > { %v1978_v7 = vpop.eup %1977  ;;  %v1756_v56 = vor.u32 %v1915_v52, %v1753_v53  ;;  %v1745_v59 = vld [vmem:[%s2606_s4 + $0x18] sm:$0xf0]  ;;  %v1911_v3 = vld [vmem:[%s2606_s4 + $0x4] sm:$0xf] }
  0x13   : > { %v499_v8 = vmul.f32 64.0, %v1978_v7  ;;  %vm503_vm1 = vweird.f32 %v1978_v7  ;;  %641 = vmatpush.bf16.msra.mxu0 %v1752_v33  ;;  %1948 = vmatpush.bf16.msra.mxu1 %v1752_v33  ;;  %v1748_v2 = vor.u32 %v1913_v58, %v1745_v59 }
  0x15   : > { %v500_v9 = vsub.f32 1.0, %v499_v8 }
  0x17   : > { %v501_v10 = vmul.f32 %v1978_v7, %v500_v9  ;;  %642 = vmatpush.bf16.msra.mxu0 %v1744_v36  ;;  %1949 = vmatpush.bf16.msra.mxu1 %v1744_v36  ;;  %v584_v36 = vld [vmem:[%s2607_s5] sm:$0x3] }
  0x19   : > { %493 = vadd.xlane.f32.xlu0 %v492_v5  ;;  %v502_v11 = vadd.f32 %v1978_v7, %v501_v10  ;;  %v1737_v5 = vld [vmem:[%s2606_s4 + $0x8] sm:$0xf0] }
  0x1a   : > { %v1740_v9 = vor.u32 %v1911_v3, %v1737_v5 }
  0x1b   : > { %v2174_v12 = vsel %vm503_vm1, %v1978_v7, %v502_v11  ;;  %643 = vmatpush.bf16.msra.mxu0 %v1736_v41  ;;  %1950 = vmatpush.bf16.msra.mxu1 %v1736_v41 }
  0x1f   : > { %658 = vmatpush.bf16.msrb.mxu1 %v1764_v51 }
  0x23   : > { %659 = vmatpush.bf16.msrb.mxu1 %v1756_v56 }
  0x27   : > { %660 = vmatpush.bf16.msrb.mxu1 %v1748_v2 }
  0x2b   : > { %661 = vmatpush.bf16.msrb.mxu1 %v1740_v9 }
  0x84   : > { %v491_v13 = vpop.xlane.xlu0 %490  ;;  %v497_v17 = vpop.xlane.xlu1 %496 }
  0x85   : > { %v505_v14 = vmul.f32 %v2174_v12, %v491_v13  ;;  %v507_v21 = vmul.f32 %v2174_v12, %v497_v17 }
  0x87   : > { %v2178_v15 = vsub.f32 %v2163_v0, %v505_v14  ;;  %v2188_v23 = vsub.f32 %v485_v1, %v507_v21  ;;  %v1971_v14 = vld [vmem:[%s2604_s2] ss:$0 sm:$0xff] }
  0x89   : > { %v511_v16 = vmul.f32 %v2178_v15, %v2178_v15  ;;  %v513_v26 = vmul.f32 %v2188_v23, %v2188_v23 }
  0x8b   : > { %v514_v18 = vsel %vm488_vm0, %v511_v16, 0.0  ;;  %v520_v27 = vsel %vm488_vm0, %v513_v26, 0.0 }
  0x8c   : > { %515 = vadd.xlane.f32.xlu1 %v514_v18  ;;  %v494_v19 = vpop.xlane.xlu0 %493 }
  0x8d   : > { %v506_v20 = vmul.f32 %v2174_v12, %v494_v19 }
  0x8f   : > { %v2186_v22 = vsub.f32 %v2170_v4, %v506_v20 }
  0x91   : > { %v512_v24 = vmul.f32 %v2186_v22, %v2186_v22 }
  0x93   : > { %v517_v25 = vsel %vm488_vm0, %v512_v24, 0.0  ;;  %v1972_v24 = vld [vmem:[%s2605_s3] ss:$0 sm:$0xff] }
  0x94   : > { %518 = vadd.xlane.f32.xlu2 %v517_v25 }
  0x9c   : > { %521 = vadd.xlane.f32.xlu2 %v520_v27 }
  0xff   : > { %v516_v37 = vpop.xlane.xlu1 %515 }
 0x100   : > { %v523_v38 = vmul.f32 %v516_v37, %v2174_v12  ;;  %v586_v37 = vperm.slane %v584_v36, 0 }
 0x102   : > { %v526_v42 = vadd.f32 1e-05, %v523_v38 }
 0x104   : > { %1979 = vrsqrt.f32 %v526_v42  ;;  %vm535_vm3 = vweird.f32 %v526_v42 }
 0x107   : > { %v519_v43 = vpop.xlane.xlu2 %518 }
 0x108   : > { %v524_v44 = vmul.f32 %v519_v43, %v2174_v12 }
 0x10a   : > { %v1980_v45 = vpop.eup %1979  ;;  %v527_v46 = vadd.f32 1e-05, %v524_v44 }
 0x10b   : > { %v530_v47 = vmul.f32 %v1980_v45, %v526_v42  ;;  %vm536_vm2 = vweird.f32 %v1980_v45 }
 0x10c   : > { %1981 = vrsqrt.f32 %v527_v46  ;;  %vm537_vm4 = vmor %vm535_vm3, %vm536_vm2  ;;  %vm545_vm6 = vweird.f32 %v527_v46 }
 0x10d   : > { %v531_v50 = vmul.f32 %v1980_v45, %v530_v47  ;;  %v587_v47 = vperm.slane %v584_v36, 1 }
 0x10f   : > { %v532_v54 = vmul.f32 0.5, %v531_v50  ;;  %v522_v55 = vpop.xlane.xlu2 %521 }
 0x110   : > { %v525_v57 = vmul.f32 %v522_v55, %v2174_v12 }
 0x111   : > { %v533_v60 = vsub.f32 1.5, %v532_v54 }
 0x112   : > { %v1982_v61 = vpop.eup %1981  ;;  %v528_v62 = vadd.f32 1e-05, %v525_v57 }
 0x113   : > { %v534_v63 = vmul.f32 %v1980_v45, %v533_v60  ;;  %v540_v1 = vmul.f32 %v1982_v61, %v527_v46  ;;  %vm546_vm5 = vweird.f32 %v1982_v61  ;;  %v672_v60 = vld [vmem:[%s476_s24] sm:$0x1] }
 0x114   : > { %1983 = vrsqrt.f32 %v528_v62  ;;  %vm547_vm7 = vmor %vm545_vm6, %vm546_vm5  ;;  %vm555_vm9 = vweird.f32 %v528_v62  ;;  %vm673_vm13 = vcmp.eq.f32.partialorder %v672_v60, 0.0 }
 0x115   : > { %v541_v6 = vmul.f32 %v1982_v61, %v540_v1  ;;  %v538_v7 = vsel %vm537_vm4, %v1980_v45, %v534_v63 }
 0x116   : > { %v559_v13 = vmul.f32 %v538_v7, %v2178_v15 }
 0x117   : > { %v542_v8 = vmul.f32 0.5, %v541_v6 }
 0x118   : > { %v565_v21 = vmul.f32 %v1971_v14, %v559_v13 }
 0x119   : > { %v543_v10 = vsub.f32 1.5, %v542_v8 }
 0x11a   : > { %v1984_v11 = vpop.eup %1983  ;;  %v571_v27 = vadd.f32 %v1972_v24, %v565_v21 }
 0x11b   : > { %v544_v16 = vmul.f32 %v1982_v61, %v543_v10  ;;  %v550_v17 = vmul.f32 %v1984_v11, %v528_v62  ;;  %vm556_vm8 = vweird.f32 %v1984_v11 }
 0x11c   : > { %vm557_vm10 = vmor %vm555_vm9, %vm556_vm8 }
 0x11d   : > { %v548_v18 = vsel %vm547_vm7, %v1982_v61, %v544_v16  ;;  %v551_v19 = vmul.f32 %v1984_v11, %v550_v17  ;;  %v2062_v61 = vmov 0.0  }
 0x11e   : > { %v560_v20 = vmul.f32 %v548_v18, %v2186_v22  ;;  %v674_v62 = vsel %vm673_vm13, -1e+30, %v2062_v61 }
 0x11f   : > { %v552_v25 = vmul.f32 0.5, %v551_v19  ;;  %v2287_v63 = vperm.slane %v674_v62, 0 }
 0x120   : > { %v566_v15 = vmul.f32 %v1971_v14, %v560_v20 }
 0x121   : > { %v553_v26 = vsub.f32 1.5, %v552_v25 }
 0x122   : > { %v572_v28 = vadd.f32 %v1972_v24, %v566_v15 }
 0x123   : > { %v554_v29 = vmul.f32 %v1984_v11, %v553_v26 }
 0x124   : > { %v574_v30 = vpack.c.bf16 %v572_v28, %v571_v27 }
 0x125   : > { %v558_v31 = vsel %vm557_vm10, %v1984_v11, %v554_v29 }
 0x126   : > { %1765 = vmatmul.msk.bf16.vlgmr.msra.gmra.mxu0 %vm488_vm0, %v574_v30  ;;  %v561_v22 = vmul.f32 %v558_v31, %v2188_v23 }
 0x128   : > { %v567_v32 = vmul.f32 %v1971_v14, %v561_v22 }
 0x12a   : > { %v573_v33 = vadd.f32 %v1972_v24, %v567_v32 }
 0x12c   : > { %v575_v34 = vpack.c.bf16 %v573_v33, %v573_v33 }
 0x12e   : > { %1766 = vmatmul.msk.bf16.vlgmr.msra.gmra.mxu1 %vm488_vm0, %v575_v34 }
 0x13e   : > { %1767 = vmatmul.msk.bf16.vlgmr.msrb.gmra.mxu1 %vm488_vm0, %v574_v30  ;;  %v1919_v30 = vld [vmem:[%s2608_s6] sm:$0xff] }
 0x14e   : > { %1768 = vmatmul.msk.bf16.gmra.mxu1 %vm488_vm0, %v575_v34 }
 0x1a3   : > { %v645_v35 = vpop.f32.mrf.mxu0 }
 0x1a4   : > { %v646_v40 = vadd.f32 %v645_v35, %v586_v37 }
 0x1ab   : > { %v647_v38 = vpop.f32.mrf.mxu0  ;;  %v650_v39 = vpop.f32.mrf.mxu1 }
 0x1ac   : > { %v648_v41 = vadd.f32 %v647_v38, %v586_v37  ;;  %v651_v23 = vadd.f32 %v650_v39, %v586_v37 }
 0x1ae   : > { %v2263_v42 = vpack.c.bf16 %v648_v41, %v646_v40  ;;  %v2265_v43 = vpack.c.bf16 %v651_v23, %v651_v23 }
 0x1b0   : > { %684 = vrot.lane.b32.xlu1 %v2263_v42, %s2061_s21  ;;  %686 = vrot.lane.b32.xlu0 %v2265_v43, %s2061_s21 }
 0x1b3   : > { %v652_v44 = vpop.f32.mrf.mxu1 }
 0x1bb   : > { %v663_v45 = vpop.f32.mrf.mxu1 }
 0x1bc   : > { %v664_v53 = vadd.f32 %v663_v45, %v587_v47 }
 0x1c3   : > { %v665_v46 = vpop.f32.mrf.mxu1 }
 0x1c4   : > { %v666_v51 = vadd.f32 %v665_v46, %v587_v47 }
 0x1c6   : > { %v2273_v54 = vpack.c.bf16 %v666_v51, %v664_v53 }
 0x1cb   : > { %v668_v48 = vpop.f32.mrf.mxu1 }
 0x1cc   : > { %v669_v49 = vadd.f32 %v668_v48, %v587_v47 }
 0x1ce   : > { %v2269_v50 = vpack.c.bf16 %v669_v49, %v669_v49 }
 0x1d0   : > { %v763_v52 = vsel %vm761_vm11, %v2269_v50, 0 }
 0x1d1   : > { %1951 = vmatpush.bf16.msra.mxu3 %v763_v52 }
 0x1d3   : > { %v670_v55 = vpop.f32.mrf.mxu1 }
 0x1d5   : > { %1952 = vmatpush.bf16.msra.mxu3 %v2273_v54 }
 0x222   : > { %v687_v56 = vpop.permute.xlu0 %686  ;;  %v685_v58 = vpop.permute.xlu1 %684 }
 0x223   : > { %v699_v57 = vsel %vm688_vm12, %v687_v56, 0  ;;  %v696_v59 = vsel %vm688_vm12, %v685_v58, 0 }
 0x224   : > { %707 = vmatpush.bf16.xpose.msra.mxu2 %v699_v57 }
 0x22c   : > { %708 = vmatpush.bf16.xpose.msra.mxu2 %v696_v59 }
 0x233   : > { %1769 = vmatmul.msk.bf16.vlgmr.msra.gmra.mxu2 %vm688_vm12, %v2263_v42 }
 0x234   : > { %771 = vmatpush.bf16.msrb.mxu2 %v763_v52 }
 0x238   : > { %772 = vmatpush.bf16.msrb.mxu2 %v2273_v54 }
 0x23c   : > { %947 = vmatpush.bf16.msra.mxu2 %v1919_v30 }
 0x243   : > { %1770 = vmatmul.msk.bf16.gmra.mxu2 %vm688_vm12, %v2265_v43 }
 0x2b6   : > { %v710_v1 = vpop.f32.mrf.mxu2 }
 0x2b7   : > { %v711_v2 = vadd.f32 %v710_v1, %v2287_v63 }
 0x2b9   : > { %v720_v3 = vsel %vm719_vm14, %v711_v2, -inf }
 0x2ba   : > { %721 = vmax.xlane.f32.xlu2 %v720_v3 }
 0x2be   : > { %v712_v5 = vpop.f32.mrf.mxu2 }
 0x2bf   : > { %v713_v6 = vadd.f32 %v712_v5, %v2287_v63 }
 0x2c1   : > { %v723_v7 = vsel %vm719_vm14, %v713_v6, -inf }
 0x2c2   : > { %724 = vmax.xlane.f32.xlu2 %v723_v7 }
 0x2c6   : > { %v715_v8 = vpop.f32.mrf.mxu2 }
 0x2c7   : > { %v716_v9 = vadd.f32 %v715_v8, %v2287_v63 }
 0x2c9   : > { %v726_v10 = vsel %vm719_vm14, %v716_v9, -inf }
 0x2ca   : > { %727 = vmax.xlane.f32.xlu2 %v726_v10 }
 0x2ce   : > { %v717_v11 = vpop.f32.mrf.mxu2 }
 0x32d   : > { %v722_v13 = vpop.xlane.xlu2 %721 }
 0x32e   : > { %v729_v14 = vsub.f32 %v711_v2, %v722_v13 }
 0x330   : > { %v732_v16 = vmul.f32 1.442695, %v729_v14 }
 0x332   : > { %1985 = vpow2.f32 %v732_v16 }
 0x335   : > { %v725_v17 = vpop.xlane.xlu2 %724 }
 0x336   : > { %v730_v18 = vsub.f32 %v713_v6, %v725_v17 }
 0x338   : > { %v1986_v19 = vpop.eup %1985  ;;  %v734_v20 = vmul.f32 1.442695, %v730_v18 }
 0x339   : > { %v738_v21 = vsel %vm719_vm14, %v1986_v19, 0.0 }
 0x33a   : > { %1987 = vpow2.f32 %v734_v20  ;;  %739 = vadd.xlane.f32.xlu0 %v738_v21 }
 0x33d   : > { %v728_v24 = vpop.xlane.xlu2 %727 }
 0x33e   : > { %v731_v25 = vsub.f32 %v716_v9, %v728_v24 }
 0x340   : > { %v1988_v15 = vpop.eup %1987  ;;  %v736_v26 = vmul.f32 1.442695, %v731_v25 }
 0x341   : > { %v741_v27 = vsel %vm719_vm14, %v1988_v15, 0.0 }
 0x342   : > { %1989 = vpow2.f32 %v736_v26  ;;  %742 = vadd.xlane.f32.xlu2 %v741_v27 }
 0x348   : > { %v1990_v28 = vpop.eup %1989 }
 0x349   : > { %v744_v29 = vsel %vm719_vm14, %v1990_v28, 0.0 }
 0x34a   : > { %745 = vadd.xlane.f32.xlu1 %v744_v29 }
 0x34e   : > { %787 = vrot.lane.b32.xlu0 %v2263_v42, %s2063_s25 }
 0x356   : > { %962 = vrot.lane.b32.xlu0 %v2263_v42, %s2064_s26 }
 0x35a   : > { %793 = vrot.lane.b32.xlu2 %v2265_v43, %s2065_s27 }
 0x35e   : > { %958 = vrot.lane.b32.xlu0 %v2263_v42, %s2066_s28 }
 0x362   : > { %791 = vrot.lane.b32.xlu2 %v2263_v42, %s2065_s27 }
 0x363   : > { %789 = vrot.lane.b32.xlu1 %v2265_v43, %s2063_s25 }
 0x36a   : > { %1106 = vrot.lane.b32.xlu2 %v2265_v43, %s2067_s16 }
 0x36b   : > { %1102 = vrot.lane.b32.xlu1 %v2265_v43, %s2068_s17 }
 0x372   : > { %964 = vrot.lane.b32.xlu2 %v2265_v43, %s2064_s26 }
 0x37a   : > { %1104 = vrot.lane.b32.xlu2 %v2263_v42, %s2067_s16 }
 0x382   : > { %1100 = vrot.lane.b32.xlu2 %v2263_v42, %s2068_s17 }
 0x38a   : > { %960 = vrot.lane.b32.xlu2 %v2265_v43, %s2066_s28 }
 0x3ad   : > { %v740_v31 = vpop.xlane.xlu0 %739 }
 0x3ae   : > { %1991 = vrcp.f32 %v740_v31 }
 0x3b4   : > { %v1992_v32 = vpop.eup %1991 }
 0x3b5   : > { %v743_v22 = vpop.xlane.xlu2 %742  ;;  %v750_v34 = vmul.f32 %v1992_v32, %v1986_v19 }
 0x3b6   : > { %1993 = vrcp.f32 %v743_v22 }
 0x3bc   : > { %v1994_v33 = vpop.eup %1993 }
 0x3bd   : > { %v751_v35 = vmul.f32 %v1994_v33, %v1988_v15  ;;  %v746_v36 = vpop.xlane.xlu1 %745  ;;  %v794_v37 = vpop.permute.xlu2 %793 }
 0x3be   : > { %1995 = vrcp.f32 %v746_v36  ;;  %v805_v38 = vsel %vm688_vm12, %v794_v37, 0 }
 0x3bf   : > { %813 = vmatpush.bf16.xpose.msrb.mxu3 %v805_v38  ;;  %v753_v39 = vpack.c.bf16 %v751_v35, %v750_v34 }
 0x3c0   : > { %v788_v46 = vpop.permute.xlu0 %787 }
 0x3c1   : > { %1771 = vmatmul.msk.bf16.vlgmr.msrb.gmra.mxu2 %vm719_vm14, %v753_v39 }
 0x3c4   : > { %v1996_v40 = vpop.eup %1995 }
 0x3c5   : > { %v792_v41 = vpop.permute.xlu2 %791  ;;  %v752_v23 = vmul.f32 %v1996_v40, %v1990_v28 }
 0x3c6   : > { %v802_v42 = vsel %vm688_vm12, %v792_v41, 0 }
 0x3c7   : > { %814 = vmatpush.bf16.xpose.msrb.mxu3 %v802_v42  ;;  %v754_v43 = vpack.c.bf16 %v752_v23, %v752_v23 }
 0x3c8   : > { %v963_v49 = vpop.permute.xlu0 %962 }
 0x3c9   : > { %1772 = vmatmul.msk.bf16.vlgmr.msra.gmra.mxu3 %vm719_vm14, %v754_v43  ;;  %v973_v52 = vsel %vm688_vm12, %v963_v49, 0 }
 0x3cd   : > { %v1107_v44 = vpop.permute.xlu2 %1106 }
 0x3ce   : > { %v1118_v45 = vsel %vm688_vm12, %v1107_v44, 0 }
 0x3cf   : > { %1126 = vmatpush.bf16.xpose.msrb.mxu2 %v1118_v45 }
 0x3d0   : > { %v959_v56 = vpop.permute.xlu0 %958 }
 0x3d5   : > { %v965_v47 = vpop.permute.xlu2 %964  ;;  %v790_v55 = vpop.permute.xlu1 %789 }
 0x3d6   : > { %v976_v48 = vsel %vm688_vm12, %v965_v47, 0 }
 0x3d7   : > { %984 = vmatpush.bf16.xpose.msra.mxu3 %v976_v48 }
 0x3d9   : > { %1773 = vmatmul.msk.bf16.vlgmr.msrb.gmra.mxu3 %vm688_vm12, %v788_v46 }
 0x3dd   : > { %v1105_v51 = vpop.permute.xlu2 %1104  ;;  %v1103_v18 = vpop.permute.xlu1 %1102 }
 0x3de   : > { %v1115_v53 = vsel %vm688_vm12, %v1105_v51, 0 }
 0x3df   : > { %985 = vmatpush.bf16.xpose.msra.mxu3 %v973_v52  ;;  %1127 = vmatpush.bf16.xpose.msrb.mxu2 %v1115_v53 }
 0x3e5   : > { %v1101_v57 = vpop.permute.xlu2 %1100 }
 0x3e9   : > { %1774 = vmatmul.msk.bf16.gmra.mxu3 %vm688_vm12, %v790_v55 }
 0x3ed   : > { %v961_v58 = vpop.permute.xlu2 %960 }
 0x3f9   : > { %1789 = vmatmul.msk.bf16.vlgmr.msra.gmra.mxu3 %vm688_vm12, %v959_v56 }
 0x409   : > { %1790 = vmatmul.msk.bf16.gmra.mxu3 %vm688_vm12, %v961_v58 }
 0x444   : > { %v774_v59 = vpop.f32.mrf.mxu2 }
 0x44c   : > { %v776_v60 = vpop.f32.mrf.mxu2  ;;  %v779_v61 = vpop.f32.mrf.mxu3 }
 0x44d   : > { %v783_v62 = vpack.c.bf16 %v776_v60, %v774_v59  ;;  %v784_v3 = vpack.c.bf16 %v779_v61, %v779_v61 }
 0x44f   : > { %1787 = vmatmul.msk.bf16.vlgmr.msra.gmra.mxu2 %vm688_vm12, %v783_v62 }
 0x454   : > { %v781_v1 = vpop.f32.mrf.mxu3 }
 0x45c   : > { %v816_v2 = vpop.f32.mrf.mxu3 }
 0x45d   : > { %v817_v5 = vadd.f32 %v816_v2, %v2287_v63 }
 0x45f   : > { %1788 = vmatmul.msk.bf16.gmra.mxu2 %vm688_vm12, %v784_v3  ;;  %v825_v6 = vsel %vm719_vm14, %v817_v5, -inf }
 0x460   : > { %826 = vmax.xlane.f32.xlu0 %v825_v6 }
 0x464   : > { %v818_v7 = vpop.f32.mrf.mxu3 }
 0x465   : > { %v819_v8 = vadd.f32 %v818_v7, %v2287_v63 }
 0x467   : > { %v828_v9 = vsel %vm719_vm14, %v819_v8, -inf }
 0x468   : > { %829 = vmax.xlane.f32.xlu1 %v828_v9 }
 0x46c   : > { %v821_v10 = vpop.f32.mrf.mxu3 }
 0x46d   : > { %v822_v11 = vadd.f32 %v821_v10, %v2287_v63 }
 0x46f   : > { %1799 = vmatmul.msk.bf16.vlgmr.msrb.gmra.mxu2 %vm688_vm12, %v1101_v57  ;;  %v831_v13 = vsel %vm719_vm14, %v822_v11, -inf }
 0x470   : > { %832 = vmax.xlane.f32.xlu2 %v831_v13 }
 0x474   : > { %v823_v14 = vpop.f32.mrf.mxu3 }
 0x47c   : > { %v987_v16 = vpop.f32.mrf.mxu3 }
 0x47d   : > { %v988_v17 = vadd.f32 %v987_v16, %v2287_v63 }
 0x47f   : > { %1800 = vmatmul.msk.bf16.gmra.mxu2 %vm688_vm12, %v1103_v18  ;;  %v996_v19 = vsel %vm719_vm14, %v988_v17, -inf }
 0x480   : > { %997 = vmax.xlane.f32.xlu2 %v996_v19 }
 0x484   : > { %v989_v20 = vpop.f32.mrf.mxu3 }
 0x485   : > { %v990_v21 = vadd.f32 %v989_v20, %v2287_v63 }
 0x487   : > { %v999_v24 = vsel %vm719_vm14, %v990_v21, -inf }
 0x488   : > { %1000 = vmax.xlane.f32.xlu0 %v999_v24 }
 0x48c   : > { %v992_v25 = vpop.f32.mrf.mxu3 }
 0x48d   : > { %v993_v58 = vadd.f32 %v992_v25, %v2287_v63 }
 0x48f   : > { %v1002_v62 = vsel %vm719_vm14, %v993_v58, -inf }
 0x494   : > { %v994_v15 = vpop.f32.mrf.mxu3 }
 0x4d2   : > { %v2345_v26 = vpop.f32.mrf.mxu2 }
 0x4d3   : > { %v827_v27 = vpop.xlane.xlu0 %826 }
 0x4d4   : > { %v834_v28 = vsub.f32 %v817_v5, %v827_v27 }
 0x4d6   : > { %v837_v29 = vmul.f32 1.442695, %v834_v28 }
 0x4d8   : > { %1997 = vpow2.f32 %v837_v29 }
 0x4da   : > { %v2347_v30 = vpop.f32.mrf.mxu2 }
 0x4db   : > { %v830_v31 = vpop.xlane.xlu1 %829 }
 0x4dc   : > { %v835_v22 = vsub.f32 %v819_v8, %v830_v31 }
 0x4de   : > { %v2349_v32 = vpop.eup %1997  ;;  %v839_v33 = vmul.f32 1.442695, %v835_v22 }
 0x4df   : > { %v843_v34 = vsel %vm719_vm14, %v2349_v32, 0.0 }
 0x4e0   : > { %1999 = vpow2.f32 %v839_v33  ;;  %844 = vadd.xlane.f32.xlu1 %v843_v34 }
 0x4e2   : > { %v2353_v35 = vpop.f32.mrf.mxu2 }
 0x4e3   : > { %v833_v36 = vpop.xlane.xlu2 %832 }
 0x4e4   : > { %v836_v37 = vsub.f32 %v822_v11, %v833_v36 }
 0x4e6   : > { %v2355_v38 = vpop.eup %1999  ;;  %v841_v39 = vmul.f32 1.442695, %v836_v37 }
 0x4e7   : > { %v846_v40 = vsel %vm719_vm14, %v2355_v38, 0.0 }
 0x4e8   : > { %2001 = vpow2.f32 %v841_v39  ;;  %847 = vadd.xlane.f32.xlu2 %v846_v40 }
 0x4ea   : > { %v956_v41 = vpop.f32.mrf.mxu2 }
 0x4ee   : > { %v2359_v23 = vpop.eup %2001 }
 0x4ef   : > { %v849_v42 = vsel %vm719_vm14, %v2359_v23, 0.0 }
 0x4f0   : > { %850 = vadd.xlane.f32.xlu2 %v849_v42 }
 0x4f2   : > { %v1129_v43 = vpop.f32.mrf.mxu2 }
 0x4f3   : > { %v1130_v44 = vadd.f32 %v1129_v43, %v2287_v63  ;;  %v998_v52 = vpop.xlane.xlu2 %997 }
 0x4f4   : > { %v1005_v53 = vsub.f32 %v988_v17, %v998_v52  ;;  %v1920_v52 = vld [vmem:[%s2608_s6 + $0x8] sm:$0xff] }
 0x4f5   : > { %v1138_v45 = vsel %vm719_vm14, %v1130_v44, -inf  ;;  %917 = vmatpush.bf16.msra.mxu1 %v1920_v52 }
 0x4f6   : > { %1139 = vmax.xlane.f32.xlu0 %v1138_v45  ;;  %v1008_v55 = vmul.f32 1.442695, %v1005_v53 }
 0x4f8   : > { %2003 = vpow2.f32 %v1008_v55 }
 0x4fa   : > { %v1131_v46 = vpop.f32.mrf.mxu2 }
 0x4fb   : > { %v1132_v47 = vadd.f32 %v1131_v46, %v2287_v63  ;;  %v1001_v56 = vpop.xlane.xlu0 %1000 }
 0x4fc   : > { %v1006_v59 = vsub.f32 %v990_v21, %v1001_v56 }
 0x4fd   : > { %v1141_v48 = vsel %vm719_vm14, %v1132_v47, -inf }
 0x4fe   : > { %1142 = vmax.xlane.f32.xlu1 %v1141_v48  ;;  %v2373_v57 = vpop.eup %2003  ;;  %v1010_v61 = vmul.f32 1.442695, %v1006_v59 }
 0x4ff   : > { %v1014_v60 = vsel %vm719_vm14, %v2373_v57, 0.0 }
 0x500   : > { %2005 = vpow2.f32 %v1010_v61 }
 0x502   : > { %v1134_v49 = vpop.f32.mrf.mxu2 }
 0x503   : > { %v1135_v1 = vadd.f32 %v1134_v49, %v2287_v63 }
 0x505   : > { %v1144_v2 = vsel %vm719_vm14, %v1135_v1, -inf }
 0x506   : > { %v2381_v3 = vpop.eup %2005 }
 0x507   : > { %v1017_v5 = vsel %vm719_vm14, %v2381_v3, 0.0 }
 0x508   : > { %1175 = vrot.lane.b32.xlu2 %v2269_v50, %s2068_s17 }
 0x50a   : > { %v1136_v51 = vpop.f32.mrf.mxu2  ;;  %864 = vrot.lane.b32.xlu0 %v2269_v50, %s2063_s25 }
 0x517   : > { %862 = vrot.lane.b32.xlu1 %v2273_v54, %s2063_s25  ;;  %s481_s25 = scalar_lea.vmem %s2616_s14, %s1953_s15 }
 0x531   : > { %1015 = vadd.xlane.f32.xlu2 %v1014_v60 }
 0x534   : > { %1003 = vmax.xlane.f32.xlu0 %v1002_v62 }
 0x539   : > { %1145 = vmax.xlane.f32.xlu2 %v1144_v2 }
 0x541   : > { %1018 = vadd.xlane.f32.xlu2 %v1017_v5 }
 0x548   : > { %1033 = vrot.lane.b32.xlu0 %v2269_v50, %s2066_s28 }
 0x553   : > { %v845_v8 = vpop.xlane.xlu1 %844 }
 0x55b   : > { %v848_v6 = vpop.xlane.xlu2 %847 }
 0x563   : > { %v851_v7 = vpop.xlane.xlu2 %850 }
 0x569   : > { %v1140_v9 = vpop.xlane.xlu0 %1139 }
 0x56a   : > { %v1147_v10 = vsub.f32 %v1130_v44, %v1140_v9 }
 0x56b   : > { %v1176_v63 = vpop.permute.xlu2 %1175 }
 0x56c   : > { %v1150_v11 = vmul.f32 1.442695, %v1147_v10  ;;  %v1185_v13 = vsel %vm761_vm11, %v1176_v63, 0 }
 0x56d   : > { %1193 = vmatpush.bf16.msrb.mxu3 %v1185_v13 }
 0x56e   : > { %2007 = vpow2.f32 %v1150_v11 }
 0x571   : > { %v1143_v14 = vpop.xlane.xlu1 %1142 }
 0x572   : > { %v1148_v16 = vsub.f32 %v1132_v47, %v1143_v14 }
 0x574   : > { %v2388_v17 = vpop.eup %2007  ;;  %v1152_v18 = vmul.f32 1.442695, %v1148_v16 }
 0x575   : > { %v1156_v19 = vsel %vm719_vm14, %v2388_v17, 0.0 }
 0x576   : > { %2009 = vpow2.f32 %v1152_v18  ;;  %1157 = vadd.xlane.f32.xlu2 %v1156_v19  ;;  %v1921_v18 = vld [vmem:[%s2608_s6 + $0x10] sm:$0xff]  ;;  %v1922_v19 = vld [vmem:[%s2608_s6 + $0x18] sm:$0xff] }
 0x577   : > { %2011 = vrcp.f32 %v848_v6  ;;  %1086 = vmatpush.bf16.msrb.mxu1 %v1921_v18  ;;  %v1929_v18 = vld [vmem:[%s2612_s10 + $0x34] sm:$0xf] }
 0x578   : > { %2013 = vrcp.f32 %v845_v8 }
 0x579   : > { %2015 = vrcp.f32 %v851_v7 }
 0x57c   : > { %v2010_v50 = vpop.eup %2009  ;;  %v865_v20 = vpop.permute.xlu0 %864 }
 0x57d   : > { %v1159_v21 = vsel %vm719_vm14, %v2010_v50, 0.0  ;;  %v874_v24 = vsel %vm761_vm11, %v865_v20, 0  ;;  %v2012_v25 = vpop.eup %2011 }
 0x57e   : > { %1160 = vadd.xlane.f32.xlu1 %v1159_v21  ;;  %882 = vmatpush.bf16.msrb.mxu0 %v874_v24  ;;  %v2014_v15 = vpop.eup %2013  ;;  %v856_v27 = vmul.f32 %v2012_v25, %v2355_v38 }
 0x57f   : > { %v855_v28 = vmul.f32 %v2014_v15, %v2349_v32  ;;  %v2016_v22 = vpop.eup %2015 }
 0x580   : > { %v857_v33 = vmul.f32 %v2016_v22, %v2359_v23 }
 0x581   : > { %v858_v31 = vpack.c.bf16 %v856_v27, %v855_v28 }
 0x582   : > { %v859_v34 = vpack.c.bf16 %v857_v33, %v857_v33 }
 0x589   : > { %v863_v29 = vpop.permute.xlu1 %862 }
 0x58a   : > { %883 = vmatpush.bf16.msrb.mxu0 %v863_v29 }
 0x58d   : > { %1775 = vmatmul.msk.bf16.vlgmr.msrb.gmra.mxu0 %vm719_vm14, %v858_v31 }
 0x58e   : > { %1031 = vrot.lane.b32.xlu2 %v2273_v54, %s2066_s28 }
 0x597   : > { %1173 = vrot.lane.b32.xlu1 %v2273_v54, %s2068_s17 }
 0x59d   : > { %1776 = vmatmul.msk.bf16.gmra.mxu0 %vm719_vm14, %v859_v34 }
 0x5a4   : > { %v1016_v36 = vpop.xlane.xlu2 %1015 }
 0x5a7   : > { %v1004_v32 = vpop.xlane.xlu0 %1003 }
 0x5a8   : > { %v1007_v37 = vsub.f32 %v993_v58, %v1004_v32 }
 0x5aa   : > { %v1012_v38 = vmul.f32 1.442695, %v1007_v37 }
 0x5ac   : > { %2017 = vpow2.f32 %v1012_v38  ;;  %v1146_v39 = vpop.xlane.xlu2 %1145 }
 0x5ad   : > { %v1149_v40 = vsub.f32 %v1135_v1, %v1146_v39 }
 0x5af   : > { %v1154_v41 = vmul.f32 1.442695, %v1149_v40 }
 0x5b1   : > { %2019 = vpow2.f32 %v1154_v41 }
 0x5b2   : > { %v2018_v42 = vpop.eup %2017 }
 0x5b3   : > { %v1020_v43 = vsel %vm719_vm14, %v2018_v42, 0.0 }
 0x5b4   : > { %1021 = vadd.xlane.f32.xlu0 %v1020_v43  ;;  %v1019_v46 = vpop.xlane.xlu2 %1018  ;;  %v1973_v43 = vld [vmem:[%s2609_s7] ss:$0 sm:$0xff] }
 0x5b5   : > { %2021 = vrcp.f32 %v1019_v46 }
 0x5b6   : > { %2023 = vrcp.f32 %v1016_v36 }
 0x5b7   : > { %v2020_v44 = vpop.eup %2019 }
 0x5b8   : > { %v1162_v54 = vsel %vm719_vm14, %v2020_v44, 0.0 }
 0x5b9   : > { %1163 = vadd.xlane.f32.xlu2 %v1162_v54 }
 0x5ba   : > { %v1034_v23 = vpop.permute.xlu0 %1033 }
 0x5bb   : > { %v1043_v45 = vsel %vm761_vm11, %v1034_v23, 0  ;;  %v2022_v48 = vpop.eup %2021 }
 0x5bc   : > { %1051 = vmatpush.bf16.msra.mxu0 %v1043_v45  ;;  %v2024_v49 = vpop.eup %2023  ;;  %v1027_v51 = vmul.f32 %v2022_v48, %v2381_v3 }
 0x5bd   : > { %v1026_v53 = vmul.f32 %v2024_v49, %v2373_v57 }
 0x5bf   : > { %v1029_v56 = vpack.c.bf16 %v1027_v51, %v1026_v53 }
 0x5e9   : > { %v1158_v47 = vpop.xlane.xlu2 %1157 }
 0x5f1   : > { %v1032_v55 = vpop.permute.xlu2 %1031  ;;  %v1161_v58 = vpop.xlane.xlu1 %1160 }
 0x5f2   : > { %1052 = vmatpush.bf16.msra.mxu0 %v1032_v55  ;;  %2025 = vrcp.f32 %v1161_v58 }
 0x5f3   : > { %2027 = vrcp.f32 %v1158_v47 }
 0x5f5   : > { %1791 = vmatmul.msk.bf16.vlgmr.msra.gmra.mxu0 %vm719_vm14, %v1029_v56 }
 0x5f6   : > { %1228 = vmatpush.bf16.msrb.mxu0 %v1922_v19 }
 0x5f8   : > { %v2026_v59 = vpop.eup %2025 }
 0x5f9   : > { %v2028_v60 = vpop.eup %2027  ;;  %v1169_v61 = vmul.f32 %v2026_v59, %v2010_v50  ;;  %v2051_v59 = vld [vmem:[%s2160_s18 + $0x10] sm:$0xff] }
 0x5fa   : > { %v1168_v62 = vmul.f32 %v2028_v60, %v2388_v17 }
 0x5fc   : > { %v1171_v3 = vpack.c.bf16 %v1169_v61, %v1168_v62 }
 0x609   : > { %v1174_v1 = vpop.permute.xlu1 %1173 }
 0x60a   : > { %v885_v2 = vpop.f32.mrf.mxu0  ;;  %1194 = vmatpush.bf16.msrb.mxu3 %v1174_v1 }
 0x60d   : > { %1801 = vmatmul.msk.bf16.vlgmr.msrb.gmra.mxu3 %vm719_vm14, %v1171_v3 }
 0x612   : > { %v887_v57 = vpop.f32.mrf.mxu0 }
 0x613   : > { %v894_v5 = vpack.c.bf16 %v887_v57, %v885_v2 }
 0x615   : > { %1781 = vmatmul.msk.bf16.vlgmr.msra.gmra.mxu1 %vm688_vm12, %v894_v5 }
 0x61a   : > { %v890_v6 = vpop.f32.mrf.mxu0 }
 0x61b   : > { %v895_v8 = vpack.c.bf16 %v890_v6, %v890_v6 }
 0x622   : > { %v892_v7 = vpop.f32.mrf.mxu0 }
 0x625   : > { %1782 = vmatmul.msk.bf16.gmra.mxu1 %vm688_vm12, %v895_v8 }
 0x627   : > { %v1022_v9 = vpop.xlane.xlu0 %1021 }
 0x628   : > { %2029 = vrcp.f32 %v1022_v9 }
 0x62c   : > { %v1164_v10 = vpop.xlane.xlu2 %1163 }
 0x62d   : > { %2031 = vrcp.f32 %v1164_v10 }
 0x62e   : > { %v2030_v63 = vpop.eup %2029 }
 0x62f   : > { %v1028_v11 = vmul.f32 %v2030_v63, %v2018_v42 }
 0x631   : > { %v1030_v13 = vpack.c.bf16 %v1028_v11, %v1028_v11 }
 0x633   : > { %v2032_v14 = vpop.eup %2031  ;;  %1792 = vmatmul.msk.bf16.gmra.mxu0 %vm719_vm14, %v1030_v13 }
 0x634   : > { %v1170_v16 = vmul.f32 %v2032_v14, %v2020_v44 }
 0x636   : > { %v1172_v17 = vpack.c.bf16 %v1170_v16, %v1170_v16  ;;  %v1835_v16 = vld [vmem:[%s2612_s10 + $0x30] sm:$0xf] }
 0x638   : > { %1802 = vmatmul.msk.bf16.gmra.mxu3 %vm719_vm14, %v1172_v17  ;;  %v1930_v17 = vld [vmem:[%s2612_s10 + $0x34] sm:$0xf0] }
 0x639   : > { %v1836_v19 = vor.u32 %v1930_v17, %v1835_v16 }
 0x63b   : > { %1398 = vmatpush.bf16.msra.mxu1 %v1836_v19 }
 0x672   : > { %v1054_v50 = vpop.f32.mrf.mxu0 }
 0x67a   : > { %v1056_v20 = vpop.f32.mrf.mxu0 }
 0x67b   : > { %v1063_v21 = vpack.c.bf16 %v1056_v20, %v1054_v50  ;;  %v1837_v50 = vld [vmem:[%s2612_s10 + $0x38] sm:$0xf0] }
 0x67c   : > { %v1840_v20 = vor.u32 %v1929_v18, %v1837_v50 }
 0x67d   : > { %1797 = vmatmul.msk.bf16.vlgmr.msrb.gmra.mxu1 %vm688_vm12, %v1063_v21  ;;  %v1827_v21 = vld [vmem:[%s2612_s10 + $0x20] sm:$0xf] }
 0x67e   : > { %1416 = vmatpush.bf16.msra.mxu2 %v1840_v20 }
 0x690   : > { %v1196_v24 = vpop.f32.mrf.mxu3 }
 0x692   : > { %v919_v25 = vpop.f32.mrf.mxu1 }
 0x693   : > { %v950_v39 = vadd.f32 %v2345_v26, %v919_v25  ;;  %v1927_v25 = vld [vmem:[%s2612_s10 + $0x24] sm:$0xf] }
 0x698   : > { %v1198_v15 = vpop.f32.mrf.mxu3 }
 0x699   : > { %v1205_v27 = vpack.c.bf16 %v1198_v15, %v1196_v24  ;;  %v1928_v24 = vld [vmem:[%s2612_s10 + $0x24] sm:$0xf0] }
 0x69a   : > { %v921_v28 = vpop.f32.mrf.mxu1  ;;  %v1828_v15 = vor.u32 %v1928_v24, %v1827_v21  ;;  %v1938_v24 = vld [vmem:[%s2614_s12 + $0x38] sm:$0xff] }
 0x69b   : > { %1807 = vmatmul.msk.bf16.vlgmr.msrb.gmra.mxu0 %vm688_vm12, %v1205_v27  ;;  %v952_v23 = vadd.f32 %v2347_v30, %v921_v28  ;;  %v1829_v27 = vld [vmem:[%s2612_s10 + $0x28] sm:$0xf0]  ;;  %1620 = vmatpush.bf16.msra.mxu3 %v1938_v24 }
 0x69c   : > { %v1832_v28 = vor.u32 %v1927_v25, %v1829_v27  ;;  %1399 = vmatpush.bf16.msra.mxu1 %v1828_v15  ;;  %v1937_v25 = vld [vmem:[%s2614_s12 + $0x30] sm:$0xff]  ;;  %v1936_v15 = vld [vmem:[%s2614_s12 + $0x28] sm:$0xff] }
 0x69d   : > { %v1945_v27 = vld [vmem:[%s2614_s12 + $0x70] sm:$0xff] }
 0x69e   : > { %1417 = vmatpush.bf16.msra.mxu2 %v1832_v28  ;;  %v1935_v28 = vld [vmem:[%s2614_s12 + $0x20] sm:$0xff] }
 0x69f   : > { %1621 = vmatpush.bf16.msra.mxu3 %v1937_v25 }
 0x6a2   : > { %v924_v29 = vpop.f32.mrf.mxu1 }
 0x6a3   : > { %v955_v30 = vadd.f32 %v2353_v35, %v924_v29  ;;  %v1819_v29 = vld [vmem:[%s2612_s10 + $0x10] sm:$0xf]  ;;  %1622 = vmatpush.bf16.msra.mxu3 %v1936_v15 }
 0x6a7   : > { %1623 = vmatpush.bf16.msra.mxu3 %v1935_v28 }
 0x6aa   : > { %v926_v31 = vpop.f32.mrf.mxu1 }
 0x6ab   : > { %v1926_v31 = vld [vmem:[%s2612_s10 + $0x14] sm:$0xf0] }
 0x6b0   : > { %v1059_v22 = vpop.f32.mrf.mxu0 }
 0x6b1   : > { %v1064_v33 = vpack.c.bf16 %v1059_v22, %v1059_v22  ;;  %v1925_v22 = vld [vmem:[%s2612_s10 + $0x14] sm:$0xf] }
 0x6b3   : > { %1798 = vmatmul.msk.bf16.gmra.mxu1 %vm688_vm12, %v1064_v33  ;;  %v1820_v33 = vor.u32 %v1926_v31, %v1819_v29  ;;  %v1944_v29 = vld [vmem:[%s2614_s12 + $0x68] sm:$0xff]  ;;  %v1934_v31 = vld [vmem:[%s2614_s12 + $0x18] sm:$0xff] }
 0x6b4   : > { %1624 = vmatpush.bf16.msra.mxu3 %v1934_v31 }
 0x6b5   : > { %1400 = vmatpush.bf16.msra.mxu1 %v1820_v33  ;;  %v1933_v33 = vld [vmem:[%s2614_s12 + $0x10] sm:$0xff] }
 0x6b8   : > { %v1061_v34 = vpop.f32.mrf.mxu0  ;;  %1625 = vmatpush.bf16.msra.mxu3 %v1933_v33 }
 0x6b9   : > { %v1821_v34 = vld [vmem:[%s2612_s10 + $0x18] sm:$0xf0] }
 0x6bb   : > { %v1201_v36 = vpop.f32.mrf.mxu3 }
 0x6bc   : > { %v1206_v32 = vpack.c.bf16 %v1201_v36, %v1201_v36  ;;  %v1824_v36 = vor.u32 %v1925_v22, %v1821_v34  ;;  %v1943_v22 = vld [vmem:[%s2614_s12 + $0x60] sm:$0xff]  ;;  %v1942_v34 = vld [vmem:[%s2614_s12 + $0x58] sm:$0xff] }
 0x6be   : > { %1808 = vmatmul.msk.bf16.gmra.mxu0 %vm688_vm12, %v1206_v32  ;;  %1418 = vmatpush.bf16.msra.mxu2 %v1824_v36  ;;  %v1932_v36 = vld [vmem:[%s2614_s12 + $0x8] sm:$0xff] }
 0x6bf   : > { %1626 = vmatpush.bf16.msra.mxu3 %v1932_v36 }
 0x6c3   : > { %v1203_v37 = vpop.f32.mrf.mxu3 }
 0x6fa   : > { %v1088_v38 = vpop.f32.mrf.mxu1 }
 0x6fb   : > { %v1097_v40 = vadd.f32 %v1088_v38, %v950_v39  ;;  %v1811_v38 = vld [vmem:[%s2612_s10] sm:$0xf]  ;;  %v1924_v39 = vld [vmem:[%s2612_s10 + $0x4] sm:$0xf0] }
 0x702   : > { %v1090_v54 = vpop.f32.mrf.mxu1 }
 0x703   : > { %v1098_v46 = vadd.f32 %v1090_v54, %v952_v23 }
 0x718   : > { %v1230_v41 = vpop.f32.mrf.mxu0 }
 0x719   : > { %v1239_v42 = vadd.f32 %v1230_v41, %v1097_v40  ;;  %v1923_v40 = vld [vmem:[%s2612_s10 + $0x4] sm:$0xf]  ;;  %v1812_v41 = vor.u32 %v1924_v39, %v1811_v38 }
 0x71a   : > { %v1931_v38 = vld [vmem:[%s2614_s12] sm:$0xff] }
 0x71b   : > { %v1242_v44 = vadd.f32 %v1239_v42, %v2163_v0  ;;  %v1813_v42 = vld [vmem:[%s2612_s10 + $0x8] sm:$0xf0]  ;;  %1401 = vmatpush.bf16.msra.mxu1 %v1812_v41  ;;  %1627 = vmatpush.bf16.msra.mxu3 %v1931_v38 }
 0x71d   : > { %v2434_v45 = vadd.f32 %v1973_v43, %v1242_v44  ;;  %v1816_v44 = vor.u32 %v1923_v40, %v1813_v42  ;;  %v1940_v40 = vld [vmem:[%s2614_s12 + $0x48] sm:$0xff] }
 0x71f   : > { %v1254_v47 = vsel %vm488_vm0, %v2434_v45, 0.0  ;;  %1419 = vmatpush.bf16.msra.mxu2 %v1816_v44 }
 0x720   : > { %1255 = vadd.xlane.f32.xlu1 %v1254_v47  ;;  %v1232_v26 = vpop.f32.mrf.mxu0 }
 0x721   : > { %v1240_v48 = vadd.f32 %v1232_v26, %v1098_v46 }
 0x723   : > { %v1243_v49 = vadd.f32 %v1240_v48, %v2170_v4 }
 0x725   : > { %v2439_v51 = vadd.f32 %v1973_v43, %v1243_v49 }
 0x727   : > { %v1257_v0 = vsel %vm488_vm0, %v2439_v51, 0.0 }
 0x728   : > { %1258 = vadd.xlane.f32.xlu2 %v1257_v0 }
 0x730   : > { %v1093_v52 = vpop.f32.mrf.mxu1 }
 0x731   : > { %v1099_v55 = vadd.f32 %v1093_v52, %v955_v30 }
 0x738   : > { %v1095_v53 = vpop.f32.mrf.mxu1 }
 0x73b   : > { %v1235_v56 = vpop.f32.mrf.mxu0 }
 0x73c   : > { %v1241_v58 = vadd.f32 %v1235_v56, %v1099_v55 }
 0x73e   : > { %v1244_v60 = vadd.f32 %v2051_v59, %v1241_v58 }
 0x740   : > { %v2445_v61 = vadd.f32 %v1973_v43, %v1244_v60  ;;  %v1974_v60 = vld [vmem:[%s2610_s8] ss:$0 sm:$0xff] }
 0x742   : > { %v1260_v4 = vsel %vm488_vm0, %v2445_v61, 0.0 }
 0x743   : > { %1261 = vadd.xlane.f32.xlu0 %v1260_v4  ;;  %v1237_v62 = vpop.f32.mrf.mxu0 }
 0x793   : > { %v1256_v1 = vpop.xlane.xlu1 %1255 }
 0x794   : > { %v1263_v2 = vmul.f32 %v1256_v1, %v2174_v12 }
 0x796   : > { %v2451_v3 = vsub.f32 %v2434_v45, %v1263_v2  ;;  %v1975_v2 = vld [vmem:[%s2611_s9] ss:$0 sm:$0xff] }
 0x798   : > { %v1269_v35 = vmul.f32 %v2451_v3, %v2451_v3 }
 0x79a   : > { %v1272_v57 = vsel %vm488_vm0, %v1269_v35, 0.0 }
 0x79b   : > { %1273 = vadd.xlane.f32.xlu2 %v1272_v57  ;;  %v1259_v5 = vpop.xlane.xlu2 %1258 }
 0x79c   : > { %v1264_v6 = vmul.f32 %v1259_v5, %v2174_v12 }
 0x79e   : > { %v2458_v7 = vsub.f32 %v2439_v51, %v1264_v6 }
 0x7a0   : > { %v1270_v8 = vmul.f32 %v2458_v7, %v2458_v7 }
 0x7a2   : > { %v1275_v9 = vsel %vm488_vm0, %v1270_v8, 0.0 }
 0x7a3   : > { %1276 = vadd.xlane.f32.xlu0 %v1275_v9 }
 0x7b6   : > { %v1262_v10 = vpop.xlane.xlu0 %1261 }
 0x7b7   : > { %v1265_v63 = vmul.f32 %v1262_v10, %v2174_v12 }
 0x7b9   : > { %v2465_v11 = vsub.f32 %v2445_v61, %v1265_v63 }
 0x7bb   : > { %v1271_v13 = vmul.f32 %v2465_v11, %v2465_v11 }
 0x7bd   : > { %v1278_v14 = vsel %vm488_vm0, %v1271_v13, 0.0 }
 0x7be   : > { %1279 = vadd.xlane.f32.xlu2 %v1278_v14 }
 0x80e   : > { %v1274_v32 = vpop.xlane.xlu2 %1273 }
 0x80f   : > { %v1281_v37 = vmul.f32 %v1274_v32, %v2174_v12  ;;  %v1342_v32 = vld [vmem:[%s2613_s11] sm:$0x3] }
 0x810   : > { %v1344_v39 = vperm.slane %v1342_v32, 0  ;;  %v1345_v44 = vperm.slane %v1342_v32, 1 }
 0x811   : > { %v1284_v43 = vadd.f32 1e-05, %v1281_v37  ;;  %v1941_v37 = vld [vmem:[%s2614_s12 + $0x50] sm:$0xff] }
 0x813   : > { %2033 = vrsqrt.f32 %v1284_v43  ;;  %vm1293_vm1 = vweird.f32 %v1284_v43 }
 0x816   : > { %v1277_v54 = vpop.xlane.xlu0 %1276 }
 0x817   : > { %v1282_v23 = vmul.f32 %v1277_v54, %v2174_v12  ;;  %v1939_v54 = vld [vmem:[%s2614_s12 + $0x40] sm:$0xff] }
 0x819   : > { %v2034_v46 = vpop.eup %2033  ;;  %v1285_v47 = vadd.f32 1e-05, %v1282_v23 }
 0x81a   : > { %v1288_v26 = vmul.f32 %v2034_v46, %v1284_v43  ;;  %vm1294_vm15 = vweird.f32 %v2034_v46 }
 0x81b   : > { %2035 = vrsqrt.f32 %v1285_v47  ;;  %vm1295_vm2 = vmor %vm1293_vm1, %vm1294_vm15  ;;  %vm1303_vm4 = vweird.f32 %v1285_v47 }
 0x81c   : > { %v1289_v48 = vmul.f32 %v2034_v46, %v1288_v26 }
 0x81e   : > { %v1290_v49 = vmul.f32 0.5, %v1289_v48 }
 0x820   : > { %v1291_v0 = vsub.f32 1.5, %v1290_v49 }
 0x821   : > { %v2036_v52 = vpop.eup %2035 }
 0x822   : > { %v1292_v30 = vmul.f32 %v2034_v46, %v1291_v0  ;;  %v1298_v53 = vmul.f32 %v2036_v52, %v1285_v47  ;;  %vm1304_vm3 = vweird.f32 %v2036_v52 }
 0x823   : > { %vm1305_vm5 = vmor %vm1303_vm4, %vm1304_vm3 }
 0x824   : > { %v1299_v55 = vmul.f32 %v2036_v52, %v1298_v53  ;;  %v1296_v56 = vsel %vm1295_vm2, %v2034_v46, %v1292_v30 }
 0x825   : > { %v1317_v4 = vmul.f32 %v1296_v56, %v2451_v3 }
 0x826   : > { %v1300_v58 = vmul.f32 0.5, %v1299_v55 }
 0x827   : > { %v1323_v35 = vmul.f32 %v1974_v60, %v1317_v4 }
 0x828   : > { %v1301_v59 = vsub.f32 1.5, %v1300_v58 }
 0x829   : > { %v1329_v6 = vadd.f32 %v1975_v2, %v1323_v35 }
 0x82a   : > { %v1302_v62 = vmul.f32 %v2036_v52, %v1301_v59 }
 0x82c   : > { %v1306_v1 = vsel %vm1305_vm5, %v2036_v52, %v1302_v62 }
 0x82d   : > { %v1318_v57 = vmul.f32 %v1306_v1, %v2458_v7 }
 0x82f   : > { %v1324_v5 = vmul.f32 %v1974_v60, %v1318_v57 }
 0x831   : > { %v1330_v8 = vadd.f32 %v1975_v2, %v1324_v5  ;;  %v1280_v9 = vpop.xlane.xlu2 %1279 }
 0x832   : > { %v1283_v10 = vmul.f32 %v1280_v9, %v2174_v12 }
 0x833   : > { %v1332_v63 = vpack.c.bf16 %v1330_v8, %v1329_v6 }
 0x834   : > { %v1286_v13 = vadd.f32 1e-05, %v1283_v10 }
 0x835   : > { %1841 = vmatmul.msk.bf16.vlgmr.msra.gmra.mxu1 %vm488_vm0, %v1332_v63  ;;  %1843 = vmatmul.msk.bf16.vlgmr.msra.gmra.mxu2 %vm488_vm0, %v1332_v63 }
 0x836   : > { %2037 = vrsqrt.f32 %v1286_v13  ;;  %vm1313_vm7 = vweird.f32 %v1286_v13 }
 0x83c   : > { %v2038_v3 = vpop.eup %2037 }
 0x83d   : > { %v1308_v14 = vmul.f32 %v2038_v3, %v1286_v13  ;;  %vm1314_vm6 = vweird.f32 %v2038_v3 }
 0x83e   : > { %vm1315_vm8 = vmor %vm1313_vm7, %vm1314_vm6 }
 0x83f   : > { %v1309_v16 = vmul.f32 %v2038_v3, %v1308_v14 }
 0x841   : > { %v1310_v17 = vmul.f32 0.5, %v1309_v16 }
 0x843   : > { %v1311_v18 = vsub.f32 1.5, %v1310_v17 }
 0x845   : > { %v1312_v7 = vmul.f32 %v2038_v3, %v1311_v18 }
 0x847   : > { %v1316_v19 = vsel %vm1315_vm8, %v2038_v3, %v1312_v7 }
 0x848   : > { %v1319_v50 = vmul.f32 %v1316_v19, %v2465_v11  ;;  %v1946_v11 = vld [vmem:[%s2614_s12 + $0x78] sm:$0xff] }
 0x849   : > { %1638 = vmatpush.bf16.msra.mxu0 %v1946_v11 }
 0x84a   : > { %v1325_v12 = vmul.f32 %v1974_v60, %v1319_v50 }
 0x84c   : > { %v1331_v20 = vadd.f32 %v1975_v2, %v1325_v12 }
 0x84d   : > { %1639 = vmatpush.bf16.msra.mxu0 %v1945_v27 }
 0x84e   : > { %v1333_v21 = vpack.c.bf16 %v1331_v20, %v1331_v20 }
 0x850   : > { %1842 = vmatmul.msk.bf16.gmra.mxu1 %vm488_vm0, %v1333_v21  ;;  %1844 = vmatmul.msk.bf16.gmra.mxu2 %vm488_vm0, %v1333_v21 }
 0x851   : > { %1640 = vmatpush.bf16.msra.mxu0 %v1944_v29 }
 0x855   : > { %1641 = vmatpush.bf16.msra.mxu0 %v1943_v22 }
 0x859   : > { %1642 = vmatpush.bf16.msra.mxu0 %v1942_v34 }
 0x85d   : > { %1643 = vmatpush.bf16.msra.mxu0 %v1941_v37 }
 0x861   : > { %1644 = vmatpush.bf16.msra.mxu0 %v1940_v40 }
 0x865   : > { %1645 = vmatpush.bf16.msra.mxu0 %v1939_v54 }
 0x8b2   : > { %v1403_v41 = vpop.f32.mrf.mxu1 }
 0x8b3   : > { %v1404_v42 = vadd.f32 %v1403_v41, %v1344_v39 }
 0x8b5   : > { %v1436_v43 = vmul.f32 0.044715, %v1404_v42  ;;  %v1430_v16 = vmul.f32 0.5, %v1404_v42 }
 0x8b7   : > { %v1442_v23 = vmul.f32 %v1436_v43, %v1404_v42 }
 0x8b8   : > { %v1421_v46 = vpop.f32.mrf.mxu2 }
 0x8b9   : > { %v1448_v47 = vmul.f32 %v1442_v23, %v1404_v42  ;;  %v1422_v26 = vadd.f32 %v1421_v46, %v1345_v44 }
 0x8ba   : > { %v1405_v48 = vpop.f32.mrf.mxu1 }
 0x8bb   : > { %v1454_v49 = vadd.f32 %v1448_v47, %v1404_v42  ;;  %v1437_v0 = vmul.f32 0.044715, %v1422_v26  ;;  %v1406_v52 = vadd.f32 %v1405_v48, %v1344_v39  ;;  %v1431_v15 = vmul.f32 0.5, %v1422_v26 }
 0x8bd   : > { %v1443_v30 = vmul.f32 %v1437_v0, %v1422_v26  ;;  %v1438_v53 = vmul.f32 0.044715, %v1406_v52  ;;  %v1460_v55 = vmul.f32 0.7978846, %v1454_v49  ;;  %v1432_v17 = vmul.f32 0.5, %v1406_v52 }
 0x8bf   : > { %v1449_v56 = vmul.f32 %v1443_v30, %v1422_v26  ;;  %v1444_v58 = vmul.f32 %v1438_v53, %v1406_v52  ;;  %2039 = vtanh.f32 %v1460_v55  ;;  %v1976_v30 = vld [vmem:[%s2615_s13] ss:$0 sm:$0xff] }
 0x8c0   : > { %v1423_v59 = vpop.f32.mrf.mxu2 }
 0x8c1   : > { %v1455_v60 = vadd.f32 %v1449_v56, %v1422_v26  ;;  %v1450_v4 = vmul.f32 %v1444_v58, %v1406_v52  ;;  %v1424_v62 = vadd.f32 %v1423_v59, %v1345_v44 }
 0x8c3   : > { %v1456_v1 = vadd.f32 %v1450_v4, %v1406_v52  ;;  %v1439_v2 = vmul.f32 0.044715, %v1424_v62  ;;  %v1461_v35 = vmul.f32 0.7978846, %v1455_v60  ;;  %v1433_v28 = vmul.f32 0.5, %v1424_v62 }
 0x8c5   : > { %v1462_v57 = vmul.f32 0.7978846, %v1456_v1  ;;  %v1445_v5 = vmul.f32 %v1439_v2, %v1424_v62  ;;  %v2040_v8 = vpop.eup %2039 }
 0x8c6   : > { %v1472_v63 = vadd.f32 1.0, %v2040_v8 }
 0x8c7   : > { %v1451_v6 = vmul.f32 %v1445_v5, %v1424_v62  ;;  %2041 = vtanh.f32 %v1462_v57 }
 0x8c8   : > { %2043 = vtanh.f32 %v1461_v35  ;;  %v1478_v19 = vmul.f32 %v1472_v63, %v1430_v16 }
 0x8c9   : > { %v1457_v9 = vadd.f32 %v1451_v6, %v1424_v62 }
 0x8cb   : > { %v1463_v10 = vmul.f32 0.7978846, %v1457_v9 }
 0x8cd   : > { %v2042_v13 = vpop.eup %2041  ;;  %v1408_v3 = vpop.f32.mrf.mxu1  ;;  %2045 = vtanh.f32 %v1463_v10 }
 0x8ce   : > { %v1409_v14 = vadd.f32 %v1408_v3, %v1344_v39  ;;  %v1474_v18 = vadd.f32 1.0, %v2042_v13  ;;  %v2044_v7 = vpop.eup %2043 }
 0x8cf   : > { %v1473_v21 = vadd.f32 1.0, %v2044_v7 }
 0x8d0   : > { %v1480_v50 = vmul.f32 %v1474_v18, %v1432_v17  ;;  %v1440_v12 = vmul.f32 0.044715, %v1409_v14 }
 0x8d1   : > { %v1479_v33 = vmul.f32 %v1473_v21, %v1431_v15 }
 0x8d2   : > { %v1484_v20 = vpack.c.bf16 %v1480_v50, %v1478_v19  ;;  %v1446_v24 = vmul.f32 %v1440_v12, %v1409_v14 }
 0x8d3   : > { %v2046_v25 = vpop.eup %2045  ;;  %v1426_v11 = vpop.f32.mrf.mxu2 }
 0x8d4   : > { %v1427_v27 = vadd.f32 %v1426_v11, %v1345_v44  ;;  %1628 = vmatmul.bf16.vlgmr.msra.gmra.mxu3 %v1484_v20  ;;  %v1475_v29 = vadd.f32 1.0, %v2046_v25  ;;  %v1452_v31 = vmul.f32 %v1446_v24, %v1409_v14  ;;  %v1434_v44 = vmul.f32 0.5, %v1409_v14 }
 0x8d5   : > { %v1410_v22 = vpop.f32.mrf.mxu1 }
 0x8d6   : > { %v1481_v34 = vmul.f32 %v1475_v29, %v1433_v28  ;;  %v1458_v36 = vadd.f32 %v1452_v31, %v1409_v14  ;;  %v1441_v32 = vmul.f32 0.044715, %v1427_v27  ;;  %v1435_v48 = vmul.f32 0.5, %v1427_v27 }
 0x8d8   : > { %v1485_v37 = vpack.c.bf16 %v1481_v34, %v1479_v33  ;;  %v1464_v38 = vmul.f32 0.7978846, %v1458_v36  ;;  %v1447_v39 = vmul.f32 %v1441_v32, %v1427_v27 }
 0x8da   : > { %1646 = vmatmul.bf16.vlgmr.msra.gmra.mxu0 %v1485_v37  ;;  %2047 = vtanh.f32 %v1464_v38  ;;  %v1453_v40 = vmul.f32 %v1447_v39, %v1427_v27 }
 0x8db   : > { %v1428_v41 = vpop.f32.mrf.mxu2 }
 0x8dc   : > { %v1459_v42 = vadd.f32 %v1453_v40, %v1427_v27 }
 0x8de   : > { %v1465_v43 = vmul.f32 0.7978846, %v1459_v42 }
 0x8e0   : > { %v2048_v54 = vpop.eup %2047  ;;  %2049 = vtanh.f32 %v1465_v43 }
 0x8e1   : > { %v1476_v23 = vadd.f32 1.0, %v2048_v54 }
 0x8e3   : > { %v1482_v46 = vmul.f32 %v1476_v23, %v1434_v44 }
 0x8e5   : > { %v1486_v47 = vpack.c.bf16 %v1482_v46, %v1482_v46 }
 0x8e6   : > { %v2050_v26 = vpop.eup %2049 }
 0x8e7   : > { %1633 = vmatmul.bf16.gmra.mxu3 %v1486_v47  ;;  %v1477_v49 = vadd.f32 1.0, %v2050_v26 }
 0x8e9   : > { %v1483_v0 = vmul.f32 %v1477_v49, %v1435_v48 }
 0x8eb   : > { %v1487_v52 = vpack.c.bf16 %v1483_v0, %v1483_v0 }
 0x8ed   : > { %1651 = vmatmul.bf16.gmra.mxu0 %v1487_v52 }
 0x957   : > { %v1629_v53 = vpop.f32.mrf.mxu3  ;;  %v1647_v55 = vpop.f32.mrf.mxu0 }
 0x958   : > { %v1630_v56 = vadd.f32 %v1976_v30, %v1629_v53 }
 0x95a   : > { %v1648_v58 = vadd.f32 %v1647_v55, %v1630_v56 }
 0x95c   : > { %v1656_v59 = vadd.f32 %v1648_v58, %v2434_v45 }
 0x95e   : > { %1659 = vst.msk [vmem:[%s481_s25] sm:$0xff] %vm488_vm0, %v1656_v59 }
 0x95f   : > { %v1631_v60 = vpop.f32.mrf.mxu3  ;;  %v1649_v62 = vpop.f32.mrf.mxu0 }
 0x960   : > { %v1632_v4 = vadd.f32 %v1976_v30, %v1631_v60 }
 0x962   : > { %v1650_v1 = vadd.f32 %v1649_v62, %v1632_v4 }
 0x964   : > { %v1657_v2 = vadd.f32 %v1650_v1, %v2439_v51 }
 0x966   : > { %1660 = vst.msk [vmem:[%s481_s25 + $0x8] sm:$0xff] %vm488_vm0, %v1657_v2 }
 0x96a   : > { %v1634_v35 = vpop.f32.mrf.mxu3  ;;  %v1652_v57 = vpop.f32.mrf.mxu0 }
 0x96b   : > { %v1635_v5 = vadd.f32 %v1976_v30, %v1634_v35 }
 0x96d   : > { %v1653_v6 = vadd.f32 %v1652_v57, %v1635_v5 }
 0x96f   : > { %v1658_v8 = vadd.f32 %v1653_v6, %v2445_v61 }
 0x971   : > { %1661 = vst.msk [vmem:[%s481_s25 + $0x10] sm:$0xff] %vm488_vm0, %v1658_v8 }
 0x972   : > { %v1636_v9 = vpop.f32.mrf.mxu3  ;;  %v1654_v45 = vpop.f32.mrf.mxu0 }
 0x973 PF: > { %s24_s29 = sadd.s32 1, %s2058_s29  }
 0x974   : > { %p21_p4 = scmp.ge.s32.totalorder %s24_s29, 4  }
 0x976   :  { %23 = sbr.rel (!%p21_p4) target bundleno = 1 (0x1), region = 109 }

</bundles_post_ra>
